<compile_context>
chip_gen: v6e
topology: v6e:2x2x1
jax: 0.10.0
libtpu: 0.0.40
codegen_flags: <defaults>
</compile_context>

<pallas_src>
import functools

import numpy as np
import jax
import jax.numpy as jnp
from jax import lax
from jax.experimental import pallas as pl
from jax.experimental.pallas import tpu as pltpu

_INV_SQRT2 = 0.7071067811865476


def _inner_product_kernel(trig_ref, out_ref, *, n_qubits, n_layers):
    tb = out_ref.shape[-1]          # batch tile (params1 rows)
    tb2 = 2 * tb                    # fused batch (params1 rows + params2 rows)
    nf = n_qubits * n_layers
    lane_bits = min(n_qubits, 7)    # low qubits live on the lane axis
    L = 1 << lane_bits
    nslab = 1 << (n_qubits - lane_bits)   # high qubits index the slab list

    lane_idx = lax.broadcasted_iota(jnp.int32, (1, L), 1)
    # hoisted lane-bit masks (broadcast once, reused every layer)
    bit1 = [jnp.broadcast_to(((lane_idx >> q) & 1) == 1, (tb2, L))
            for q in range(lane_bits)]

    # All CZ gates of one layer collapse into a single, layer-invariant +-1
    # sign vector per slab.
    cz_pairs = ([(2 * i, 2 * i + 1) for i in range(n_qubits // 2)]
                + [(2 * i + 1, 2 * i + 2) for i in range((n_qubits - 1) // 2)])
    cz_sign = []
    for slab in range(nslab):
        full_idx = lane_idx + slab * L
        par = jnp.zeros_like(lane_idx)
        for qa, qb in cz_pairs:
            par = par + ((full_idx >> qa) & 1) * ((full_idx >> qb) & 1)
        sign = jnp.where((par & 1) == 1, jnp.float32(-1.0), jnp.float32(1.0))
        cz_sign.append(jnp.broadcast_to(sign, (tb2, L)))

    # H^{(x)n}|0> is exactly the uniform superposition: skip the Hadamard layer.
    amp = jnp.float32(1.0 / float(np.sqrt(float(1 << n_qubits))))
    state = [jnp.full((tb2, L), amp, jnp.float32) for _ in range(nslab)]

    def ry_low(x, q, cb, sb):
        # real rotation part of YPhase on a lane-axis qubit: [[c,-s],[s,c]]
        stride = 1 << q
        fwd = pltpu.roll(x, L - stride, axis=1)   # -> x[j + stride]
        bwd = pltpu.roll(x, stride, axis=1)       # -> x[j - stride]
        # roll wrap-around only touches positions masked out by the select
        signed_p = jnp.where(bit1[q], bwd, -fwd)  # +- partner amplitude
        return cb * x + sb * signed_p

    for l in range(n_layers):
        for q in range(n_qubits):
            f = q * n_layers + l
            c = trig_ref[0, :, f:f + 1]              # (2tb,1) cos(pi*alpha/2)
            s = trig_ref[0, :, nf + f:nf + f + 1]    # (2tb,1) sin(pi*alpha/2)
            cb = jnp.broadcast_to(c, (tb2, L))       # hoisted lane broadcast
            sb = jnp.broadcast_to(s, (tb2, L))
            if q < lane_bits:
                state = [ry_low(x, q, cb, sb) for x in state]
            else:
                hb = q - lane_bits                   # slab-axis qubit: no rolls
                new_state = []
                for slab in range(nslab):
                    p = state[slab ^ (1 << hb)]
                    if (slab >> hb) & 1:
                        new_state.append(cb * state[slab] + sb * p)
                    else:
                        new_state.append(cb * state[slab] - sb * p)
                state = new_state
        # both CZ sub-layers: one VPU multiply per slab
        state = [state[slab] * cz_sign[slab] for slab in range(nslab)]

    # <psi2|psi1> for real statevectors: rows [0,tb) hold psi(params1),
    # rows [tb,2tb) hold psi(params2).
    prod = state[0][:tb, :] * state[0][tb:, :]
    for slab in range(1, nslab):
        prod = prod + state[slab][:tb, :] * state[slab][tb:, :]
    # Lane-dense (1, tb) result via a tiny MXU dot (avoids a (tb,1) column of
    # masked stores and the sublane->lane relayout).
    ones_row = jnp.ones((1, L), jnp.float32)
    res = lax.dot_general(ones_row, prod, (((1,), (1,)), ((), ())),
                          preferred_element_type=jnp.float32)   # (1, tb)
    out_ref[0] = res


def _round_up(x, m):
    return -(-x // m) * m


def _pick_tile(batch, n_qubits):
    dim = 1 << n_qubits
    # ~12 MiB budget for the fused (2*tb, dim) f32 state with ~6x headroom for
    # old/new slab lists and roll temporaries -> fits the default scoped VMEM
    # on v5e / v6e / v7x (v7x has only 64 MiB physical VMEM).
    budget = 12 * 1024 * 1024
    max_tb = budget // (2 * dim * 4 * 6)
    max_tb = max(8, (max_tb // 8) * 8)
    b8 = _round_up(batch, 8)
    tb = min(512, b8, max_tb)
    # Big single-tile batches: split in two so the "parallel" grid axis can be
    # sharded across megacore / the two v7x TensorCores.
    if tb == b8 and b8 >= 256:
        tb = _round_up(b8 // 2, 8)
    return tb


def inner_product(params1, params2, *, batch_tile=None):
    batch, n_qubits, n_layers = params1.shape
    assert params2.shape == params1.shape
    nf = n_qubits * n_layers

    p1 = params1.astype(jnp.float32)
    p2 = params2.astype(jnp.float32)

    if batch_tile is None:
        tb = _pick_tile(batch, n_qubits)
    else:
        tb = max(8, (int(batch_tile) // 8) * 8)
    batch_pad = _round_up(batch, tb)
    nt = batch_pad // tb

    half_pi = jnp.float32(0.5 * np.pi)

    def tiles(p):
        flat = p.reshape(batch, nf)
        if batch_pad != batch:
            flat = jnp.pad(flat, ((0, batch_pad - batch), (0, 0)))
        return (half_pi * flat).reshape(nt, tb, nf)

    # One packed input per grid step: rows = [params1 tile ; params2 tile],
    # columns = [cos table (nf) ; sin table (nf)].
    th = jnp.concatenate([tiles(p1), tiles(p2)], axis=1)            # (nt,2tb,nf)
    trig = jnp.concatenate([jnp.cos(th), jnp.sin(th)], axis=2)      # (nt,2tb,2nf)

    kern = functools.partial(_inner_product_kernel,
                             n_qubits=n_qubits, n_layers=n_layers)
    real_ip = pl.pallas_call(
        kern,
        grid=(nt,),
        in_specs=[pl.BlockSpec((1, 2 * tb, 2 * nf), lambda i: (i, 0, 0))],
        out_specs=pl.BlockSpec((1, 1, tb), lambda i: (i, 0, 0)),
        out_shape=jax.ShapeDtypeStruct((nt, 1, tb), jnp.float32),
        compiler_params=pltpu.CompilerParams(
            dimension_semantics=("parallel",)),
    )(trig)
    real_ip = real_ip.reshape(batch_pad)[:batch]

    # qtree YPhase global phase: exp(i*pi*alpha/2) per gate.
    phase = half_pi * jnp.sum(p1 - p2, axis=(1, 2))
    return (real_ip * jnp.exp(1j * phase)).astype(jnp.complex64)


class InnerProduct:
    """Mirror of the PyTorch module: fixed (n_qubits, n_layers) ansatz."""

    def __init__(self, n_qubits, n_layers):
        self.n_qubits = n_qubits
        self.n_layers = n_layers

    def __call__(self, params1, params2):
        assert params1.shape[1:] == (self.n_qubits, self.n_layers)
        return inner_product(params1, params2)


# ---------------- pure-JAX reference (no Pallas) for a correctness check ----
def _reference(params1, params2):
    batch, nq, nl = params1.shape
    dim = 1 << nq
    H = jnp.array([[1.0, 1.0], [1.0, -1.0]], jnp.float32) * np.float32(_INV_SQRT2)
    idx = jnp.arange(dim)

    def apply_1q(state, q, mat):
        stride = 1 << q
        st = state.reshape(batch, dim // (2 * stride), 2, stride)
        if mat.ndim == 2:
            new = jnp.einsum('ij,bkjs->bkis', mat, st)
        else:
            new = jnp.einsum('bij,bkjs->bkis', mat, st)
        return new.reshape(batch, dim)

    def cz_mask(qa, qb):
        both = ((idx >> qa) & 1) & ((idx >> qb) & 1)
        return jnp.where(both == 1, -1.0, 1.0).astype(jnp.float32)

    def statevec(params):
        state = jnp.zeros((batch, dim), jnp.float32).at[:, 0].set(1.0)
        for q in range(nq):
            state = apply_1q(state, q, H)
        for l in range(nl):
            for q in range(nq):
                th = (jnp.pi / 2) * params[:, q, l]
                c, s = jnp.cos(th), jnp.sin(th)
                mat = jnp.stack([jnp.stack([c, -s], -1),
                                 jnp.stack([s, c], -1)], -2)  # (batch,2,2)
                state = apply_1q(state, q, mat)
            for i in range(nq // 2):
                state = state * cz_mask(2 * i, 2 * i + 1)
            for i in range((nq - 1) // 2):
                state = state * cz_mask(2 * i + 1, 2 * i + 2)
        return state

    psi1 = statevec(params1.astype(jnp.float32))
    psi2 = statevec(params2.astype(jnp.float32))
    real_ip = jnp.sum(psi1 * psi2, axis=1)
    phase = (jnp.pi / 2) * jnp.sum(params1 - params2, axis=(1, 2))
    return (real_ip * jnp.exp(1j * phase)).astype(jnp.complex64)


if __name__ == "__main__":
    batch, n_qubits, n_layers = 16, 8, 4
    key = jax.random.PRNGKey(0)
    k1, k2 = jax.random.split(key)
    params1 = jax.random.normal(k1, (batch, n_qubits, n_layers), jnp.float32)
    params2 = jax.random.normal(k2, (batch, n_qubits, n_layers), jnp.float32)

    module = InnerProduct(n_qubits, n_layers)
    out = jax.block_until_ready(module(params1, params2))

    ref = jax.block_until_ready(_reference(params1, params2))
    np.testing.assert_allclose(np.asarray(out), np.asarray(ref),
                               atol=3e-5, rtol=3e-5)
    print("KERNEL_OK")
</pallas_src>

<mosaic_0001>
module attributes {stable_mosaic.version = 11 : i64} {
  func.func @_inner_product_kernel(%arg0: i32, %arg1: memref<1x32x64xf32, #tpu.memory_space<vmem>>, %arg2: memref<1x1x16xf32, #tpu.memory_space<vmem>>) attributes {dimension_semantics = [#tpu.dimension_semantics<parallel>], iteration_bounds = array<i64: 1>, scalar_prefetch = 0 : i64, scratch_operands = 0 : i64, tpu.core_type = #tpu.core_type<tc>, window_params = [{transform_indices = @transform_0, window_bounds = array<i64: 1, 32, 64>}, {transform_indices = @transform_1, window_bounds = array<i64: 1, 1, 16>}]} {
    %0 = tpu.iota {dimensions = array<i32: 1>} : vector<1x128xi32>
    %c0_i32 = arith.constant 0 : i32
    %1 = vector.broadcast %c0_i32 : i32 to vector<1x128xi32>
    %2 = arith.shrsi %0, %1 : vector<1x128xi32>
    %c1_i32 = arith.constant 1 : i32
    %3 = vector.broadcast %c1_i32 : i32 to vector<1x128xi32>
    %4 = arith.andi %2, %3 : vector<1x128xi32>
    %c1_i32_0 = arith.constant 1 : i32
    %5 = vector.broadcast %c1_i32_0 : i32 to vector<1x128xi32>
    %6 = arith.cmpi eq, %4, %5 : vector<1x128xi32>
    %7 = vector.shape_cast %6 : vector<1x128xi1> to vector<1x128xi1>
    %8 = vector.broadcast %7 : vector<1x128xi1> to vector<32x128xi1>
    %c1_i32_1 = arith.constant 1 : i32
    %9 = vector.broadcast %c1_i32_1 : i32 to vector<1x128xi32>
    %10 = arith.shrsi %0, %9 : vector<1x128xi32>
    %c1_i32_2 = arith.constant 1 : i32
    %11 = vector.broadcast %c1_i32_2 : i32 to vector<1x128xi32>
    %12 = arith.andi %10, %11 : vector<1x128xi32>
    %c1_i32_3 = arith.constant 1 : i32
    %13 = vector.broadcast %c1_i32_3 : i32 to vector<1x128xi32>
    %14 = arith.cmpi eq, %12, %13 : vector<1x128xi32>
    %15 = vector.shape_cast %14 : vector<1x128xi1> to vector<1x128xi1>
    %16 = vector.broadcast %15 : vector<1x128xi1> to vector<32x128xi1>
    %c2_i32 = arith.constant 2 : i32
    %17 = vector.broadcast %c2_i32 : i32 to vector<1x128xi32>
    %18 = arith.shrsi %0, %17 : vector<1x128xi32>
    %c1_i32_4 = arith.constant 1 : i32
    %19 = vector.broadcast %c1_i32_4 : i32 to vector<1x128xi32>
    %20 = arith.andi %18, %19 : vector<1x128xi32>
    %c1_i32_5 = arith.constant 1 : i32
    %21 = vector.broadcast %c1_i32_5 : i32 to vector<1x128xi32>
    %22 = arith.cmpi eq, %20, %21 : vector<1x128xi32>
    %23 = vector.shape_cast %22 : vector<1x128xi1> to vector<1x128xi1>
    %24 = vector.broadcast %23 : vector<1x128xi1> to vector<32x128xi1>
    %c3_i32 = arith.constant 3 : i32
    %25 = vector.broadcast %c3_i32 : i32 to vector<1x128xi32>
    %26 = arith.shrsi %0, %25 : vector<1x128xi32>
    %c1_i32_6 = arith.constant 1 : i32
    %27 = vector.broadcast %c1_i32_6 : i32 to vector<1x128xi32>
    %28 = arith.andi %26, %27 : vector<1x128xi32>
    %c1_i32_7 = arith.constant 1 : i32
    %29 = vector.broadcast %c1_i32_7 : i32 to vector<1x128xi32>
    %30 = arith.cmpi eq, %28, %29 : vector<1x128xi32>
    %31 = vector.shape_cast %30 : vector<1x128xi1> to vector<1x128xi1>
    %32 = vector.broadcast %31 : vector<1x128xi1> to vector<32x128xi1>
    %c4_i32 = arith.constant 4 : i32
    %33 = vector.broadcast %c4_i32 : i32 to vector<1x128xi32>
    %34 = arith.shrsi %0, %33 : vector<1x128xi32>
    %c1_i32_8 = arith.constant 1 : i32
    %35 = vector.broadcast %c1_i32_8 : i32 to vector<1x128xi32>
    %36 = arith.andi %34, %35 : vector<1x128xi32>
    %c1_i32_9 = arith.constant 1 : i32
    %37 = vector.broadcast %c1_i32_9 : i32 to vector<1x128xi32>
    %38 = arith.cmpi eq, %36, %37 : vector<1x128xi32>
    %39 = vector.shape_cast %38 : vector<1x128xi1> to vector<1x128xi1>
    %40 = vector.broadcast %39 : vector<1x128xi1> to vector<32x128xi1>
    %c5_i32 = arith.constant 5 : i32
    %41 = vector.broadcast %c5_i32 : i32 to vector<1x128xi32>
    %42 = arith.shrsi %0, %41 : vector<1x128xi32>
    %c1_i32_10 = arith.constant 1 : i32
    %43 = vector.broadcast %c1_i32_10 : i32 to vector<1x128xi32>
    %44 = arith.andi %42, %43 : vector<1x128xi32>
    %c1_i32_11 = arith.constant 1 : i32
    %45 = vector.broadcast %c1_i32_11 : i32 to vector<1x128xi32>
    %46 = arith.cmpi eq, %44, %45 : vector<1x128xi32>
    %47 = vector.shape_cast %46 : vector<1x128xi1> to vector<1x128xi1>
    %48 = vector.broadcast %47 : vector<1x128xi1> to vector<32x128xi1>
    %c6_i32 = arith.constant 6 : i32
    %49 = vector.broadcast %c6_i32 : i32 to vector<1x128xi32>
    %50 = arith.shrsi %0, %49 : vector<1x128xi32>
    %c1_i32_12 = arith.constant 1 : i32
    %51 = vector.broadcast %c1_i32_12 : i32 to vector<1x128xi32>
    %52 = arith.andi %50, %51 : vector<1x128xi32>
    %c1_i32_13 = arith.constant 1 : i32
    %53 = vector.broadcast %c1_i32_13 : i32 to vector<1x128xi32>
    %54 = arith.cmpi eq, %52, %53 : vector<1x128xi32>
    %55 = vector.shape_cast %54 : vector<1x128xi1> to vector<1x128xi1>
    %56 = vector.broadcast %55 : vector<1x128xi1> to vector<32x128xi1>
    %c0_i32_14 = arith.constant 0 : i32
    %57 = vector.broadcast %c0_i32_14 : i32 to vector<1x128xi32>
    %58 = arith.addi %0, %57 : vector<1x128xi32>
    %c0_i32_15 = arith.constant 0 : i32
    %59 = vector.broadcast %c0_i32_15 : i32 to vector<1x128xi32>
    %c0_i32_16 = arith.constant 0 : i32
    %60 = vector.broadcast %c0_i32_16 : i32 to vector<1x128xi32>
    %61 = arith.shrsi %58, %60 : vector<1x128xi32>
    %c1_i32_17 = arith.constant 1 : i32
    %62 = vector.broadcast %c1_i32_17 : i32 to vector<1x128xi32>
    %63 = arith.andi %61, %62 : vector<1x128xi32>
    %c1_i32_18 = arith.constant 1 : i32
    %64 = vector.broadcast %c1_i32_18 : i32 to vector<1x128xi32>
    %65 = arith.shrsi %58, %64 : vector<1x128xi32>
    %c1_i32_19 = arith.constant 1 : i32
    %66 = vector.broadcast %c1_i32_19 : i32 to vector<1x128xi32>
    %67 = arith.andi %65, %66 : vector<1x128xi32>
    %68 = arith.muli %63, %67 : vector<1x128xi32>
    %69 = arith.addi %59, %68 : vector<1x128xi32>
    %c2_i32_20 = arith.constant 2 : i32
    %70 = vector.broadcast %c2_i32_20 : i32 to vector<1x128xi32>
    %71 = arith.shrsi %58, %70 : vector<1x128xi32>
    %c1_i32_21 = arith.constant 1 : i32
    %72 = vector.broadcast %c1_i32_21 : i32 to vector<1x128xi32>
    %73 = arith.andi %71, %72 : vector<1x128xi32>
    %c3_i32_22 = arith.constant 3 : i32
    %74 = vector.broadcast %c3_i32_22 : i32 to vector<1x128xi32>
    %75 = arith.shrsi %58, %74 : vector<1x128xi32>
    %c1_i32_23 = arith.constant 1 : i32
    %76 = vector.broadcast %c1_i32_23 : i32 to vector<1x128xi32>
    %77 = arith.andi %75, %76 : vector<1x128xi32>
    %78 = arith.muli %73, %77 : vector<1x128xi32>
    %79 = arith.addi %69, %78 : vector<1x128xi32>
    %c4_i32_24 = arith.constant 4 : i32
    %80 = vector.broadcast %c4_i32_24 : i32 to vector<1x128xi32>
    %81 = arith.shrsi %58, %80 : vector<1x128xi32>
    %c1_i32_25 = arith.constant 1 : i32
    %82 = vector.broadcast %c1_i32_25 : i32 to vector<1x128xi32>
    %83 = arith.andi %81, %82 : vector<1x128xi32>
    %c5_i32_26 = arith.constant 5 : i32
    %84 = vector.broadcast %c5_i32_26 : i32 to vector<1x128xi32>
    %85 = arith.shrsi %58, %84 : vector<1x128xi32>
    %c1_i32_27 = arith.constant 1 : i32
    %86 = vector.broadcast %c1_i32_27 : i32 to vector<1x128xi32>
    %87 = arith.andi %85, %86 : vector<1x128xi32>
    %88 = arith.muli %83, %87 : vector<1x128xi32>
    %89 = arith.addi %79, %88 : vector<1x128xi32>
    %c6_i32_28 = arith.constant 6 : i32
    %90 = vector.broadcast %c6_i32_28 : i32 to vector<1x128xi32>
    %91 = arith.shrsi %58, %90 : vector<1x128xi32>
    %c1_i32_29 = arith.constant 1 : i32
    %92 = vector.broadcast %c1_i32_29 : i32 to vector<1x128xi32>
    %93 = arith.andi %91, %92 : vector<1x128xi32>
    %c7_i32 = arith.constant 7 : i32
    %94 = vector.broadcast %c7_i32 : i32 to vector<1x128xi32>
    %95 = arith.shrsi %58, %94 : vector<1x128xi32>
    %c1_i32_30 = arith.constant 1 : i32
    %96 = vector.broadcast %c1_i32_30 : i32 to vector<1x128xi32>
    %97 = arith.andi %95, %96 : vector<1x128xi32>
    %98 = arith.muli %93, %97 : vector<1x128xi32>
    %99 = arith.addi %89, %98 : vector<1x128xi32>
    %c1_i32_31 = arith.constant 1 : i32
    %100 = vector.broadcast %c1_i32_31 : i32 to vector<1x128xi32>
    %101 = arith.shrsi %58, %100 : vector<1x128xi32>
    %c1_i32_32 = arith.constant 1 : i32
    %102 = vector.broadcast %c1_i32_32 : i32 to vector<1x128xi32>
    %103 = arith.andi %101, %102 : vector<1x128xi32>
    %c2_i32_33 = arith.constant 2 : i32
    %104 = vector.broadcast %c2_i32_33 : i32 to vector<1x128xi32>
    %105 = arith.shrsi %58, %104 : vector<1x128xi32>
    %c1_i32_34 = arith.constant 1 : i32
    %106 = vector.broadcast %c1_i32_34 : i32 to vector<1x128xi32>
    %107 = arith.andi %105, %106 : vector<1x128xi32>
    %108 = arith.muli %103, %107 : vector<1x128xi32>
    %109 = arith.addi %99, %108 : vector<1x128xi32>
    %c3_i32_35 = arith.constant 3 : i32
    %110 = vector.broadcast %c3_i32_35 : i32 to vector<1x128xi32>
    %111 = arith.shrsi %58, %110 : vector<1x128xi32>
    %c1_i32_36 = arith.constant 1 : i32
    %112 = vector.broadcast %c1_i32_36 : i32 to vector<1x128xi32>
    %113 = arith.andi %111, %112 : vector<1x128xi32>
    %c4_i32_37 = arith.constant 4 : i32
    %114 = vector.broadcast %c4_i32_37 : i32 to vector<1x128xi32>
    %115 = arith.shrsi %58, %114 : vector<1x128xi32>
    %c1_i32_38 = arith.constant 1 : i32
    %116 = vector.broadcast %c1_i32_38 : i32 to vector<1x128xi32>
    %117 = arith.andi %115, %116 : vector<1x128xi32>
    %118 = arith.muli %113, %117 : vector<1x128xi32>
    %119 = arith.addi %109, %118 : vector<1x128xi32>
    %c5_i32_39 = arith.constant 5 : i32
    %120 = vector.broadcast %c5_i32_39 : i32 to vector<1x128xi32>
    %121 = arith.shrsi %58, %120 : vector<1x128xi32>
    %c1_i32_40 = arith.constant 1 : i32
    %122 = vector.broadcast %c1_i32_40 : i32 to vector<1x128xi32>
    %123 = arith.andi %121, %122 : vector<1x128xi32>
    %c6_i32_41 = arith.constant 6 : i32
    %124 = vector.broadcast %c6_i32_41 : i32 to vector<1x128xi32>
    %125 = arith.shrsi %58, %124 : vector<1x128xi32>
    %c1_i32_42 = arith.constant 1 : i32
    %126 = vector.broadcast %c1_i32_42 : i32 to vector<1x128xi32>
    %127 = arith.andi %125, %126 : vector<1x128xi32>
    %128 = arith.muli %123, %127 : vector<1x128xi32>
    %129 = arith.addi %119, %128 : vector<1x128xi32>
    %c1_i32_43 = arith.constant 1 : i32
    %130 = vector.broadcast %c1_i32_43 : i32 to vector<1x128xi32>
    %131 = arith.andi %129, %130 : vector<1x128xi32>
    %c1_i32_44 = arith.constant 1 : i32
    %132 = vector.broadcast %c1_i32_44 : i32 to vector<1x128xi32>
    %133 = arith.cmpi eq, %131, %132 : vector<1x128xi32>
    %cst = arith.constant -1.000000e+00 : f32
    %cst_45 = arith.constant 1.000000e+00 : f32
    %134 = vector.broadcast %cst : f32 to vector<1x128xf32>
    %135 = vector.broadcast %cst_45 : f32 to vector<1x128xf32>
    %136 = arith.select %133, %134, %135 : vector<1x128xi1>, vector<1x128xf32>
    %137 = vector.shape_cast %136 : vector<1x128xf32> to vector<1x128xf32>
    %138 = vector.broadcast %137 : vector<1x128xf32> to vector<32x128xf32>
    %c128_i32 = arith.constant 128 : i32
    %139 = vector.broadcast %c128_i32 : i32 to vector<1x128xi32>
    %140 = arith.addi %0, %139 : vector<1x128xi32>
    %c0_i32_46 = arith.constant 0 : i32
    %141 = vector.broadcast %c0_i32_46 : i32 to vector<1x128xi32>
    %c0_i32_47 = arith.constant 0 : i32
    %142 = vector.broadcast %c0_i32_47 : i32 to vector<1x128xi32>
    %143 = arith.shrsi %140, %142 : vector<1x128xi32>
    %c1_i32_48 = arith.constant 1 : i32
    %144 = vector.broadcast %c1_i32_48 : i32 to vector<1x128xi32>
    %145 = arith.andi %143, %144 : vector<1x128xi32>
    %c1_i32_49 = arith.constant 1 : i32
    %146 = vector.broadcast %c1_i32_49 : i32 to vector<1x128xi32>
    %147 = arith.shrsi %140, %146 : vector<1x128xi32>
    %c1_i32_50 = arith.constant 1 : i32
    %148 = vector.broadcast %c1_i32_50 : i32 to vector<1x128xi32>
    %149 = arith.andi %147, %148 : vector<1x128xi32>
    %150 = arith.muli %145, %149 : vector<1x128xi32>
    %151 = arith.addi %141, %150 : vector<1x128xi32>
    %c2_i32_51 = arith.constant 2 : i32
    %152 = vector.broadcast %c2_i32_51 : i32 to vector<1x128xi32>
    %153 = arith.shrsi %140, %152 : vector<1x128xi32>
    %c1_i32_52 = arith.constant 1 : i32
    %154 = vector.broadcast %c1_i32_52 : i32 to vector<1x128xi32>
    %155 = arith.andi %153, %154 : vector<1x128xi32>
    %c3_i32_53 = arith.constant 3 : i32
    %156 = vector.broadcast %c3_i32_53 : i32 to vector<1x128xi32>
    %157 = arith.shrsi %140, %156 : vector<1x128xi32>
    %c1_i32_54 = arith.constant 1 : i32
    %158 = vector.broadcast %c1_i32_54 : i32 to vector<1x128xi32>
    %159 = arith.andi %157, %158 : vector<1x128xi32>
    %160 = arith.muli %155, %159 : vector<1x128xi32>
    %161 = arith.addi %151, %160 : vector<1x128xi32>
    %c4_i32_55 = arith.constant 4 : i32
    %162 = vector.broadcast %c4_i32_55 : i32 to vector<1x128xi32>
    %163 = arith.shrsi %140, %162 : vector<1x128xi32>
    %c1_i32_56 = arith.constant 1 : i32
    %164 = vector.broadcast %c1_i32_56 : i32 to vector<1x128xi32>
    %165 = arith.andi %163, %164 : vector<1x128xi32>
    %c5_i32_57 = arith.constant 5 : i32
    %166 = vector.broadcast %c5_i32_57 : i32 to vector<1x128xi32>
    %167 = arith.shrsi %140, %166 : vector<1x128xi32>
    %c1_i32_58 = arith.constant 1 : i32
    %168 = vector.broadcast %c1_i32_58 : i32 to vector<1x128xi32>
    %169 = arith.andi %167, %168 : vector<1x128xi32>
    %170 = arith.muli %165, %169 : vector<1x128xi32>
    %171 = arith.addi %161, %170 : vector<1x128xi32>
    %c6_i32_59 = arith.constant 6 : i32
    %172 = vector.broadcast %c6_i32_59 : i32 to vector<1x128xi32>
    %173 = arith.shrsi %140, %172 : vector<1x128xi32>
    %c1_i32_60 = arith.constant 1 : i32
    %174 = vector.broadcast %c1_i32_60 : i32 to vector<1x128xi32>
    %175 = arith.andi %173, %174 : vector<1x128xi32>
    %c7_i32_61 = arith.constant 7 : i32
    %176 = vector.broadcast %c7_i32_61 : i32 to vector<1x128xi32>
    %177 = arith.shrsi %140, %176 : vector<1x128xi32>
    %c1_i32_62 = arith.constant 1 : i32
    %178 = vector.broadcast %c1_i32_62 : i32 to vector<1x128xi32>
    %179 = arith.andi %177, %178 : vector<1x128xi32>
    %180 = arith.muli %175, %179 : vector<1x128xi32>
    %181 = arith.addi %171, %180 : vector<1x128xi32>
    %c1_i32_63 = arith.constant 1 : i32
    %182 = vector.broadcast %c1_i32_63 : i32 to vector<1x128xi32>
    %183 = arith.shrsi %140, %182 : vector<1x128xi32>
    %c1_i32_64 = arith.constant 1 : i32
    %184 = vector.broadcast %c1_i32_64 : i32 to vector<1x128xi32>
    %185 = arith.andi %183, %184 : vector<1x128xi32>
    %c2_i32_65 = arith.constant 2 : i32
    %186 = vector.broadcast %c2_i32_65 : i32 to vector<1x128xi32>
    %187 = arith.shrsi %140, %186 : vector<1x128xi32>
    %c1_i32_66 = arith.constant 1 : i32
    %188 = vector.broadcast %c1_i32_66 : i32 to vector<1x128xi32>
    %189 = arith.andi %187, %188 : vector<1x128xi32>
    %190 = arith.muli %185, %189 : vector<1x128xi32>
    %191 = arith.addi %181, %190 : vector<1x128xi32>
    %c3_i32_67 = arith.constant 3 : i32
    %192 = vector.broadcast %c3_i32_67 : i32 to vector<1x128xi32>
    %193 = arith.shrsi %140, %192 : vector<1x128xi32>
    %c1_i32_68 = arith.constant 1 : i32
    %194 = vector.broadcast %c1_i32_68 : i32 to vector<1x128xi32>
    %195 = arith.andi %193, %194 : vector<1x128xi32>
    %c4_i32_69 = arith.constant 4 : i32
    %196 = vector.broadcast %c4_i32_69 : i32 to vector<1x128xi32>
    %197 = arith.shrsi %140, %196 : vector<1x128xi32>
    %c1_i32_70 = arith.constant 1 : i32
    %198 = vector.broadcast %c1_i32_70 : i32 to vector<1x128xi32>
    %199 = arith.andi %197, %198 : vector<1x128xi32>
    %200 = arith.muli %195, %199 : vector<1x128xi32>
    %201 = arith.addi %191, %200 : vector<1x128xi32>
    %c5_i32_71 = arith.constant 5 : i32
    %202 = vector.broadcast %c5_i32_71 : i32 to vector<1x128xi32>
    %203 = arith.shrsi %140, %202 : vector<1x128xi32>
    %c1_i32_72 = arith.constant 1 : i32
    %204 = vector.broadcast %c1_i32_72 : i32 to vector<1x128xi32>
    %205 = arith.andi %203, %204 : vector<1x128xi32>
    %c6_i32_73 = arith.constant 6 : i32
    %206 = vector.broadcast %c6_i32_73 : i32 to vector<1x128xi32>
    %207 = arith.shrsi %140, %206 : vector<1x128xi32>
    %c1_i32_74 = arith.constant 1 : i32
    %208 = vector.broadcast %c1_i32_74 : i32 to vector<1x128xi32>
    %209 = arith.andi %207, %208 : vector<1x128xi32>
    %210 = arith.muli %205, %209 : vector<1x128xi32>
    %211 = arith.addi %201, %210 : vector<1x128xi32>
    %c1_i32_75 = arith.constant 1 : i32
    %212 = vector.broadcast %c1_i32_75 : i32 to vector<1x128xi32>
    %213 = arith.andi %211, %212 : vector<1x128xi32>
    %c1_i32_76 = arith.constant 1 : i32
    %214 = vector.broadcast %c1_i32_76 : i32 to vector<1x128xi32>
    %215 = arith.cmpi eq, %213, %214 : vector<1x128xi32>
    %cst_77 = arith.constant -1.000000e+00 : f32
    %cst_78 = arith.constant 1.000000e+00 : f32
    %216 = vector.broadcast %cst_77 : f32 to vector<1x128xf32>
    %217 = vector.broadcast %cst_78 : f32 to vector<1x128xf32>
    %218 = arith.select %215, %216, %217 : vector<1x128xi1>, vector<1x128xf32>
    %219 = vector.shape_cast %218 : vector<1x128xf32> to vector<1x128xf32>
    %220 = vector.broadcast %219 : vector<1x128xf32> to vector<32x128xf32>
    %cst_79 = arith.constant 6.250000e-02 : f32
    %221 = vector.broadcast %cst_79 : f32 to vector<32x128xf32>
    %cst_80 = arith.constant 6.250000e-02 : f32
    %222 = vector.broadcast %cst_80 : f32 to vector<32x128xf32>
    %c0 = arith.constant 0 : index
    %c0_81 = arith.constant 0 : index
    %c0_82 = arith.constant 0 : index
    %223 = vector.load %arg1[%c0, %c0_81, %c0_82] : memref<1x32x64xf32, #tpu.memory_space<vmem>>, vector<1x32x1xf32>
    %224 = vector.shape_cast %223 : vector<1x32x1xf32> to vector<32x1xf32>
    %c0_83 = arith.constant 0 : index
    %c0_84 = arith.constant 0 : index
    %c32 = arith.constant 32 : index
    %225 = vector.load %arg1[%c0_83, %c0_84, %c32] : memref<1x32x64xf32, #tpu.memory_space<vmem>>, vector<1x32x1xf32>
    %226 = vector.shape_cast %225 : vector<1x32x1xf32> to vector<32x1xf32>
    %227 = vector.shape_cast %224 : vector<32x1xf32> to vector<32x1xf32>
    %228 = vector.broadcast %227 : vector<32x1xf32> to vector<32x128xf32>
    %229 = vector.shape_cast %226 : vector<32x1xf32> to vector<32x1xf32>
    %230 = vector.broadcast %229 : vector<32x1xf32> to vector<32x128xf32>
    %c127_i32 = arith.constant 127 : i32
    %231 = tpu.dynamic_rotate %221 by %c127_i32 dim 1 : vector<32x128xf32>, i32 -> vector<32x128xf32>
    %c1_i32_85 = arith.constant 1 : i32
    %232 = tpu.dynamic_rotate %221 by %c1_i32_85 dim 1 : vector<32x128xf32>, i32 -> vector<32x128xf32>
    %cst_86 = arith.constant 0.000000e+00 : f32
    %233 = vector.broadcast %cst_86 : f32 to vector<32x128xf32>
    %234 = arith.subf %233, %231 : vector<32x128xf32>
    %235 = arith.select %8, %232, %234 : vector<32x128xi1>, vector<32x128xf32>
    %236 = arith.mulf %228, %221 : vector<32x128xf32>
    %237 = arith.mulf %230, %235 : vector<32x128xf32>
    %238 = arith.addf %236, %237 : vector<32x128xf32>
    %c127_i32_87 = arith.constant 127 : i32
    %239 = tpu.dynamic_rotate %222 by %c127_i32_87 dim 1 : vector<32x128xf32>, i32 -> vector<32x128xf32>
    %c1_i32_88 = arith.constant 1 : i32
    %240 = tpu.dynamic_rotate %222 by %c1_i32_88 dim 1 : vector<32x128xf32>, i32 -> vector<32x128xf32>
    %cst_89 = arith.constant 0.000000e+00 : f32
    %241 = vector.broadcast %cst_89 : f32 to vector<32x128xf32>
    %242 = arith.subf %241, %239 : vector<32x128xf32>
    %243 = arith.select %8, %240, %242 : vector<32x128xi1>, vector<32x128xf32>
    %244 = arith.mulf %228, %222 : vector<32x128xf32>
    %245 = arith.mulf %230, %243 : vector<32x128xf32>
    %246 = arith.addf %244, %245 : vector<32x128xf32>
    %c0_90 = arith.constant 0 : index
    %c0_91 = arith.constant 0 : index
    %c4 = arith.constant 4 : index
    %247 = vector.load %arg1[%c0_90, %c0_91, %c4] : memref<1x32x64xf32, #tpu.memory_space<vmem>>, vector<1x32x1xf32>
    %248 = vector.shape_cast %247 : vector<1x32x1xf32> to vector<32x1xf32>
    %c0_92 = arith.constant 0 : index
    %c0_93 = arith.constant 0 : index
    %c36 = arith.constant 36 : index
    %249 = vector.load %arg1[%c0_92, %c0_93, %c36] : memref<1x32x64xf32, #tpu.memory_space<vmem>>, vector<1x32x1xf32>
    %250 = vector.shape_cast %249 : vector<1x32x1xf32> to vector<32x1xf32>
    %251 = vector.shape_cast %248 : vector<32x1xf32> to vector<32x1xf32>
    %252 = vector.broadcast %251 : vector<32x1xf32> to vector<32x128xf32>
    %253 = vector.shape_cast %250 : vector<32x1xf32> to vector<32x1xf32>
    %254 = vector.broadcast %253 : vector<32x1xf32> to vector<32x128xf32>
    %c126_i32 = arith.constant 126 : i32
    %255 = tpu.dynamic_rotate %238 by %c126_i32 dim 1 : vector<32x128xf32>, i32 -> vector<32x128xf32>
    %c2_i32_94 = arith.constant 2 : i32
    %256 = tpu.dynamic_rotate %238 by %c2_i32_94 dim 1 : vector<32x128xf32>, i32 -> vector<32x128xf32>
    %cst_95 = arith.constant 0.000000e+00 : f32
    %257 = vector.broadcast %cst_95 : f32 to vector<32x128xf32>
    %258 = arith.subf %257, %255 : vector<32x128xf32>
    %259 = arith.select %16, %256, %258 : vector<32x128xi1>, vector<32x128xf32>
    %260 = arith.mulf %252, %238 : vector<32x128xf32>
    %261 = arith.mulf %254, %259 : vector<32x128xf32>
    %262 = arith.addf %260, %261 : vector<32x128xf32>
    %c126_i32_96 = arith.constant 126 : i32
    %263 = tpu.dynamic_rotate %246 by %c126_i32_96 dim 1 : vector<32x128xf32>, i32 -> vector<32x128xf32>
    %c2_i32_97 = arith.constant 2 : i32
    %264 = tpu.dynamic_rotate %246 by %c2_i32_97 dim 1 : vector<32x128xf32>, i32 -> vector<32x128xf32>
    %cst_98 = arith.constant 0.000000e+00 : f32
    %265 = vector.broadcast %cst_98 : f32 to vector<32x128xf32>
    %266 = arith.subf %265, %263 : vector<32x128xf32>
    %267 = arith.select %16, %264, %266 : vector<32x128xi1>, vector<32x128xf32>
    %268 = arith.mulf %252, %246 : vector<32x128xf32>
    %269 = arith.mulf %254, %267 : vector<32x128xf32>
    %270 = arith.addf %268, %269 : vector<32x128xf32>
    %c0_99 = arith.constant 0 : index
    %c0_100 = arith.constant 0 : index
    %c8 = arith.constant 8 : index
    %271 = vector.load %arg1[%c0_99, %c0_100, %c8] : memref<1x32x64xf32, #tpu.memory_space<vmem>>, vector<1x32x1xf32>
    %272 = vector.shape_cast %271 : vector<1x32x1xf32> to vector<32x1xf32>
    %c0_101 = arith.constant 0 : index
    %c0_102 = arith.constant 0 : index
    %c40 = arith.constant 40 : index
    %273 = vector.load %arg1[%c0_101, %c0_102, %c40] : memref<1x32x64xf32, #tpu.memory_space<vmem>>, vector<1x32x1xf32>
    %274 = vector.shape_cast %273 : vector<1x32x1xf32> to vector<32x1xf32>
    %275 = vector.shape_cast %272 : vector<32x1xf32> to vector<32x1xf32>
    %276 = vector.broadcast %275 : vector<32x1xf32> to vector<32x128xf32>
    %277 = vector.shape_cast %274 : vector<32x1xf32> to vector<32x1xf32>
    %278 = vector.broadcast %277 : vector<32x1xf32> to vector<32x128xf32>
    %c124_i32 = arith.constant 124 : i32
    %279 = tpu.dynamic_rotate %262 by %c124_i32 dim 1 : vector<32x128xf32>, i32 -> vector<32x128xf32>
    %c4_i32_103 = arith.constant 4 : i32
    %280 = tpu.dynamic_rotate %262 by %c4_i32_103 dim 1 : vector<32x128xf32>, i32 -> vector<32x128xf32>
    %cst_104 = arith.constant 0.000000e+00 : f32
    %281 = vector.broadcast %cst_104 : f32 to vector<32x128xf32>
    %282 = arith.subf %281, %279 : vector<32x128xf32>
    %283 = arith.select %24, %280, %282 : vector<32x128xi1>, vector<32x128xf32>
    %284 = arith.mulf %276, %262 : vector<32x128xf32>
    %285 = arith.mulf %278, %283 : vector<32x128xf32>
    %286 = arith.addf %284, %285 : vector<32x128xf32>
    %c124_i32_105 = arith.constant 124 : i32
    %287 = tpu.dynamic_rotate %270 by %c124_i32_105 dim 1 : vector<32x128xf32>, i32 -> vector<32x128xf32>
    %c4_i32_106 = arith.constant 4 : i32
    %288 = tpu.dynamic_rotate %270 by %c4_i32_106 dim 1 : vector<32x128xf32>, i32 -> vector<32x128xf32>
    %cst_107 = arith.constant 0.000000e+00 : f32
    %289 = vector.broadcast %cst_107 : f32 to vector<32x128xf32>
    %290 = arith.subf %289, %287 : vector<32x128xf32>
    %291 = arith.select %24, %288, %290 : vector<32x128xi1>, vector<32x128xf32>
    %292 = arith.mulf %276, %270 : vector<32x128xf32>
    %293 = arith.mulf %278, %291 : vector<32x128xf32>
    %294 = arith.addf %292, %293 : vector<32x128xf32>
    %c0_108 = arith.constant 0 : index
    %c0_109 = arith.constant 0 : index
    %c12 = arith.constant 12 : index
    %295 = vector.load %arg1[%c0_108, %c0_109, %c12] : memref<1x32x64xf32, #tpu.memory_space<vmem>>, vector<1x32x1xf32>
    %296 = vector.shape_cast %295 : vector<1x32x1xf32> to vector<32x1xf32>
    %c0_110 = arith.constant 0 : index
    %c0_111 = arith.constant 0 : index
    %c44 = arith.constant 44 : index
    %297 = vector.load %arg1[%c0_110, %c0_111, %c44] : memref<1x32x64xf32, #tpu.memory_space<vmem>>, vector<1x32x1xf32>
    %298 = vector.shape_cast %297 : vector<1x32x1xf32> to vector<32x1xf32>
    %299 = vector.shape_cast %296 : vector<32x1xf32> to vector<32x1xf32>
    %300 = vector.broadcast %299 : vector<32x1xf32> to vector<32x128xf32>
    %301 = vector.shape_cast %298 : vector<32x1xf32> to vector<32x1xf32>
    %302 = vector.broadcast %301 : vector<32x1xf32> to vector<32x128xf32>
    %c120_i32 = arith.constant 120 : i32
    %303 = tpu.dynamic_rotate %286 by %c120_i32 dim 1 : vector<32x128xf32>, i32 -> vector<32x128xf32>
    %c8_i32 = arith.constant 8 : i32
    %304 = tpu.dynamic_rotate %286 by %c8_i32 dim 1 : vector<32x128xf32>, i32 -> vector<32x128xf32>
    %cst_112 = arith.constant 0.000000e+00 : f32
    %305 = vector.broadcast %cst_112 : f32 to vector<32x128xf32>
    %306 = arith.subf %305, %303 : vector<32x128xf32>
    %307 = arith.select %32, %304, %306 : vector<32x128xi1>, vector<32x128xf32>
    %308 = arith.mulf %300, %286 : vector<32x128xf32>
    %309 = arith.mulf %302, %307 : vector<32x128xf32>
    %310 = arith.addf %308, %309 : vector<32x128xf32>
    %c120_i32_113 = arith.constant 120 : i32
    %311 = tpu.dynamic_rotate %294 by %c120_i32_113 dim 1 : vector<32x128xf32>, i32 -> vector<32x128xf32>
    %c8_i32_114 = arith.constant 8 : i32
    %312 = tpu.dynamic_rotate %294 by %c8_i32_114 dim 1 : vector<32x128xf32>, i32 -> vector<32x128xf32>
    %cst_115 = arith.constant 0.000000e+00 : f32
    %313 = vector.broadcast %cst_115 : f32 to vector<32x128xf32>
    %314 = arith.subf %313, %311 : vector<32x128xf32>
    %315 = arith.select %32, %312, %314 : vector<32x128xi1>, vector<32x128xf32>
    %316 = arith.mulf %300, %294 : vector<32x128xf32>
    %317 = arith.mulf %302, %315 : vector<32x128xf32>
    %318 = arith.addf %316, %317 : vector<32x128xf32>
    %c0_116 = arith.constant 0 : index
    %c0_117 = arith.constant 0 : index
    %c16 = arith.constant 16 : index
    %319 = vector.load %arg1[%c0_116, %c0_117, %c16] : memref<1x32x64xf32, #tpu.memory_space<vmem>>, vector<1x32x1xf32>
    %320 = vector.shape_cast %319 : vector<1x32x1xf32> to vector<32x1xf32>
    %c0_118 = arith.constant 0 : index
    %c0_119 = arith.constant 0 : index
    %c48 = arith.constant 48 : index
    %321 = vector.load %arg1[%c0_118, %c0_119, %c48] : memref<1x32x64xf32, #tpu.memory_space<vmem>>, vector<1x32x1xf32>
    %322 = vector.shape_cast %321 : vector<1x32x1xf32> to vector<32x1xf32>
    %323 = vector.shape_cast %320 : vector<32x1xf32> to vector<32x1xf32>
    %324 = vector.broadcast %323 : vector<32x1xf32> to vector<32x128xf32>
    %325 = vector.shape_cast %322 : vector<32x1xf32> to vector<32x1xf32>
    %326 = vector.broadcast %325 : vector<32x1xf32> to vector<32x128xf32>
    %c112_i32 = arith.constant 112 : i32
    %327 = tpu.dynamic_rotate %310 by %c112_i32 dim 1 : vector<32x128xf32>, i32 -> vector<32x128xf32>
    %c16_i32 = arith.constant 16 : i32
    %328 = tpu.dynamic_rotate %310 by %c16_i32 dim 1 : vector<32x128xf32>, i32 -> vector<32x128xf32>
    %cst_120 = arith.constant 0.000000e+00 : f32
    %329 = vector.broadcast %cst_120 : f32 to vector<32x128xf32>
    %330 = arith.subf %329, %327 : vector<32x128xf32>
    %331 = arith.select %40, %328, %330 : vector<32x128xi1>, vector<32x128xf32>
    %332 = arith.mulf %324, %310 : vector<32x128xf32>
    %333 = arith.mulf %326, %331 : vector<32x128xf32>
    %334 = arith.addf %332, %333 : vector<32x128xf32>
    %c112_i32_121 = arith.constant 112 : i32
    %335 = tpu.dynamic_rotate %318 by %c112_i32_121 dim 1 : vector<32x128xf32>, i32 -> vector<32x128xf32>
    %c16_i32_122 = arith.constant 16 : i32
    %336 = tpu.dynamic_rotate %318 by %c16_i32_122 dim 1 : vector<32x128xf32>, i32 -> vector<32x128xf32>
    %cst_123 = arith.constant 0.000000e+00 : f32
    %337 = vector.broadcast %cst_123 : f32 to vector<32x128xf32>
    %338 = arith.subf %337, %335 : vector<32x128xf32>
    %339 = arith.select %40, %336, %338 : vector<32x128xi1>, vector<32x128xf32>
    %340 = arith.mulf %324, %318 : vector<32x128xf32>
    %341 = arith.mulf %326, %339 : vector<32x128xf32>
    %342 = arith.addf %340, %341 : vector<32x128xf32>
    %c0_124 = arith.constant 0 : index
    %c0_125 = arith.constant 0 : index
    %c20 = arith.constant 20 : index
    %343 = vector.load %arg1[%c0_124, %c0_125, %c20] : memref<1x32x64xf32, #tpu.memory_space<vmem>>, vector<1x32x1xf32>
    %344 = vector.shape_cast %343 : vector<1x32x1xf32> to vector<32x1xf32>
    %c0_126 = arith.constant 0 : index
    %c0_127 = arith.constant 0 : index
    %c52 = arith.constant 52 : index
    %345 = vector.load %arg1[%c0_126, %c0_127, %c52] : memref<1x32x64xf32, #tpu.memory_space<vmem>>, vector<1x32x1xf32>
    %346 = vector.shape_cast %345 : vector<1x32x1xf32> to vector<32x1xf32>
    %347 = vector.shape_cast %344 : vector<32x1xf32> to vector<32x1xf32>
    %348 = vector.broadcast %347 : vector<32x1xf32> to vector<32x128xf32>
    %349 = vector.shape_cast %346 : vector<32x1xf32> to vector<32x1xf32>
    %350 = vector.broadcast %349 : vector<32x1xf32> to vector<32x128xf32>
    %c96_i32 = arith.constant 96 : i32
    %351 = tpu.dynamic_rotate %334 by %c96_i32 dim 1 : vector<32x128xf32>, i32 -> vector<32x128xf32>
    %c32_i32 = arith.constant 32 : i32
    %352 = tpu.dynamic_rotate %334 by %c32_i32 dim 1 : vector<32x128xf32>, i32 -> vector<32x128xf32>
    %cst_128 = arith.constant 0.000000e+00 : f32
    %353 = vector.broadcast %cst_128 : f32 to vector<32x128xf32>
    %354 = arith.subf %353, %351 : vector<32x128xf32>
    %355 = arith.select %48, %352, %354 : vector<32x128xi1>, vector<32x128xf32>
    %356 = arith.mulf %348, %334 : vector<32x128xf32>
    %357 = arith.mulf %350, %355 : vector<32x128xf32>
    %358 = arith.addf %356, %357 : vector<32x128xf32>
    %c96_i32_129 = arith.constant 96 : i32
    %359 = tpu.dynamic_rotate %342 by %c96_i32_129 dim 1 : vector<32x128xf32>, i32 -> vector<32x128xf32>
    %c32_i32_130 = arith.constant 32 : i32
    %360 = tpu.dynamic_rotate %342 by %c32_i32_130 dim 1 : vector<32x128xf32>, i32 -> vector<32x128xf32>
    %cst_131 = arith.constant 0.000000e+00 : f32
    %361 = vector.broadcast %cst_131 : f32 to vector<32x128xf32>
    %362 = arith.subf %361, %359 : vector<32x128xf32>
    %363 = arith.select %48, %360, %362 : vector<32x128xi1>, vector<32x128xf32>
    %364 = arith.mulf %348, %342 : vector<32x128xf32>
    %365 = arith.mulf %350, %363 : vector<32x128xf32>
    %366 = arith.addf %364, %365 : vector<32x128xf32>
    %c0_132 = arith.constant 0 : index
    %c0_133 = arith.constant 0 : index
    %c24 = arith.constant 24 : index
    %367 = vector.load %arg1[%c0_132, %c0_133, %c24] : memref<1x32x64xf32, #tpu.memory_space<vmem>>, vector<1x32x1xf32>
    %368 = vector.shape_cast %367 : vector<1x32x1xf32> to vector<32x1xf32>
    %c0_134 = arith.constant 0 : index
    %c0_135 = arith.constant 0 : index
    %c56 = arith.constant 56 : index
    %369 = vector.load %arg1[%c0_134, %c0_135, %c56] : memref<1x32x64xf32, #tpu.memory_space<vmem>>, vector<1x32x1xf32>
    %370 = vector.shape_cast %369 : vector<1x32x1xf32> to vector<32x1xf32>
    %371 = vector.shape_cast %368 : vector<32x1xf32> to vector<32x1xf32>
    %372 = vector.broadcast %371 : vector<32x1xf32> to vector<32x128xf32>
    %373 = vector.shape_cast %370 : vector<32x1xf32> to vector<32x1xf32>
    %374 = vector.broadcast %373 : vector<32x1xf32> to vector<32x128xf32>
    %c64_i32 = arith.constant 64 : i32
    %375 = tpu.dynamic_rotate %358 by %c64_i32 dim 1 : vector<32x128xf32>, i32 -> vector<32x128xf32>
    %c64_i32_136 = arith.constant 64 : i32
    %376 = tpu.dynamic_rotate %358 by %c64_i32_136 dim 1 : vector<32x128xf32>, i32 -> vector<32x128xf32>
    %cst_137 = arith.constant 0.000000e+00 : f32
    %377 = vector.broadcast %cst_137 : f32 to vector<32x128xf32>
    %378 = arith.subf %377, %375 : vector<32x128xf32>
    %379 = arith.select %56, %376, %378 : vector<32x128xi1>, vector<32x128xf32>
    %380 = arith.mulf %372, %358 : vector<32x128xf32>
    %381 = arith.mulf %374, %379 : vector<32x128xf32>
    %382 = arith.addf %380, %381 : vector<32x128xf32>
    %c64_i32_138 = arith.constant 64 : i32
    %383 = tpu.dynamic_rotate %366 by %c64_i32_138 dim 1 : vector<32x128xf32>, i32 -> vector<32x128xf32>
    %c64_i32_139 = arith.constant 64 : i32
    %384 = tpu.dynamic_rotate %366 by %c64_i32_139 dim 1 : vector<32x128xf32>, i32 -> vector<32x128xf32>
    %cst_140 = arith.constant 0.000000e+00 : f32
    %385 = vector.broadcast %cst_140 : f32 to vector<32x128xf32>
    %386 = arith.subf %385, %383 : vector<32x128xf32>
    %387 = arith.select %56, %384, %386 : vector<32x128xi1>, vector<32x128xf32>
    %388 = arith.mulf %372, %366 : vector<32x128xf32>
    %389 = arith.mulf %374, %387 : vector<32x128xf32>
    %390 = arith.addf %388, %389 : vector<32x128xf32>
    %c0_141 = arith.constant 0 : index
    %c0_142 = arith.constant 0 : index
    %c28 = arith.constant 28 : index
    %391 = vector.load %arg1[%c0_141, %c0_142, %c28] : memref<1x32x64xf32, #tpu.memory_space<vmem>>, vector<1x32x1xf32>
    %392 = vector.shape_cast %391 : vector<1x32x1xf32> to vector<32x1xf32>
    %c0_143 = arith.constant 0 : index
    %c0_144 = arith.constant 0 : index
    %c60 = arith.constant 60 : index
    %393 = vector.load %arg1[%c0_143, %c0_144, %c60] : memref<1x32x64xf32, #tpu.memory_space<vmem>>, vector<1x32x1xf32>
    %394 = vector.shape_cast %393 : vector<1x32x1xf32> to vector<32x1xf32>
    %395 = vector.shape_cast %392 : vector<32x1xf32> to vector<32x1xf32>
    %396 = vector.broadcast %395 : vector<32x1xf32> to vector<32x128xf32>
    %397 = vector.shape_cast %394 : vector<32x1xf32> to vector<32x1xf32>
    %398 = vector.broadcast %397 : vector<32x1xf32> to vector<32x128xf32>
    %399 = arith.mulf %396, %382 : vector<32x128xf32>
    %400 = arith.mulf %398, %390 : vector<32x128xf32>
    %401 = arith.subf %399, %400 : vector<32x128xf32>
    %402 = arith.mulf %396, %390 : vector<32x128xf32>
    %403 = arith.mulf %398, %382 : vector<32x128xf32>
    %404 = arith.addf %402, %403 : vector<32x128xf32>
    %405 = arith.mulf %401, %138 : vector<32x128xf32>
    %406 = arith.mulf %404, %220 : vector<32x128xf32>
    %c0_145 = arith.constant 0 : index
    %c0_146 = arith.constant 0 : index
    %c1 = arith.constant 1 : index
    %407 = vector.load %arg1[%c0_145, %c0_146, %c1] : memref<1x32x64xf32, #tpu.memory_space<vmem>>, vector<1x32x1xf32>
    %408 = vector.shape_cast %407 : vector<1x32x1xf32> to vector<32x1xf32>
    %c0_147 = arith.constant 0 : index
    %c0_148 = arith.constant 0 : index
    %c33 = arith.constant 33 : index
    %409 = vector.load %arg1[%c0_147, %c0_148, %c33] : memref<1x32x64xf32, #tpu.memory_space<vmem>>, vector<1x32x1xf32>
    %410 = vector.shape_cast %409 : vector<1x32x1xf32> to vector<32x1xf32>
    %411 = vector.shape_cast %408 : vector<32x1xf32> to vector<32x1xf32>
    %412 = vector.broadcast %411 : vector<32x1xf32> to vector<32x128xf32>
    %413 = vector.shape_cast %410 : vector<32x1xf32> to vector<32x1xf32>
    %414 = vector.broadcast %413 : vector<32x1xf32> to vector<32x128xf32>
    %c127_i32_149 = arith.constant 127 : i32
    %415 = tpu.dynamic_rotate %405 by %c127_i32_149 dim 1 : vector<32x128xf32>, i32 -> vector<32x128xf32>
    %c1_i32_150 = arith.constant 1 : i32
    %416 = tpu.dynamic_rotate %405 by %c1_i32_150 dim 1 : vector<32x128xf32>, i32 -> vector<32x128xf32>
    %cst_151 = arith.constant 0.000000e+00 : f32
    %417 = vector.broadcast %cst_151 : f32 to vector<32x128xf32>
    %418 = arith.subf %417, %415 : vector<32x128xf32>
    %419 = arith.select %8, %416, %418 : vector<32x128xi1>, vector<32x128xf32>
    %420 = arith.mulf %412, %405 : vector<32x128xf32>
    %421 = arith.mulf %414, %419 : vector<32x128xf32>
    %422 = arith.addf %420, %421 : vector<32x128xf32>
    %c127_i32_152 = arith.constant 127 : i32
    %423 = tpu.dynamic_rotate %406 by %c127_i32_152 dim 1 : vector<32x128xf32>, i32 -> vector<32x128xf32>
    %c1_i32_153 = arith.constant 1 : i32
    %424 = tpu.dynamic_rotate %406 by %c1_i32_153 dim 1 : vector<32x128xf32>, i32 -> vector<32x128xf32>
    %cst_154 = arith.constant 0.000000e+00 : f32
    %425 = vector.broadcast %cst_154 : f32 to vector<32x128xf32>
    %426 = arith.subf %425, %423 : vector<32x128xf32>
    %427 = arith.select %8, %424, %426 : vector<32x128xi1>, vector<32x128xf32>
    %428 = arith.mulf %412, %406 : vector<32x128xf32>
    %429 = arith.mulf %414, %427 : vector<32x128xf32>
    %430 = arith.addf %428, %429 : vector<32x128xf32>
    %c0_155 = arith.constant 0 : index
    %c0_156 = arith.constant 0 : index
    %c5 = arith.constant 5 : index
    %431 = vector.load %arg1[%c0_155, %c0_156, %c5] : memref<1x32x64xf32, #tpu.memory_space<vmem>>, vector<1x32x1xf32>
    %432 = vector.shape_cast %431 : vector<1x32x1xf32> to vector<32x1xf32>
    %c0_157 = arith.constant 0 : index
    %c0_158 = arith.constant 0 : index
    %c37 = arith.constant 37 : index
    %433 = vector.load %arg1[%c0_157, %c0_158, %c37] : memref<1x32x64xf32, #tpu.memory_space<vmem>>, vector<1x32x1xf32>
    %434 = vector.shape_cast %433 : vector<1x32x1xf32> to vector<32x1xf32>
    %435 = vector.shape_cast %432 : vector<32x1xf32> to vector<32x1xf32>
    %436 = vector.broadcast %435 : vector<32x1xf32> to vector<32x128xf32>
    %437 = vector.shape_cast %434 : vector<32x1xf32> to vector<32x1xf32>
    %438 = vector.broadcast %437 : vector<32x1xf32> to vector<32x128xf32>
    %c126_i32_159 = arith.constant 126 : i32
    %439 = tpu.dynamic_rotate %422 by %c126_i32_159 dim 1 : vector<32x128xf32>, i32 -> vector<32x128xf32>
    %c2_i32_160 = arith.constant 2 : i32
    %440 = tpu.dynamic_rotate %422 by %c2_i32_160 dim 1 : vector<32x128xf32>, i32 -> vector<32x128xf32>
    %cst_161 = arith.constant 0.000000e+00 : f32
    %441 = vector.broadcast %cst_161 : f32 to vector<32x128xf32>
    %442 = arith.subf %441, %439 : vector<32x128xf32>
    %443 = arith.select %16, %440, %442 : vector<32x128xi1>, vector<32x128xf32>
    %444 = arith.mulf %436, %422 : vector<32x128xf32>
    %445 = arith.mulf %438, %443 : vector<32x128xf32>
    %446 = arith.addf %444, %445 : vector<32x128xf32>
    %c126_i32_162 = arith.constant 126 : i32
    %447 = tpu.dynamic_rotate %430 by %c126_i32_162 dim 1 : vector<32x128xf32>, i32 -> vector<32x128xf32>
    %c2_i32_163 = arith.constant 2 : i32
    %448 = tpu.dynamic_rotate %430 by %c2_i32_163 dim 1 : vector<32x128xf32>, i32 -> vector<32x128xf32>
    %cst_164 = arith.constant 0.000000e+00 : f32
    %449 = vector.broadcast %cst_164 : f32 to vector<32x128xf32>
    %450 = arith.subf %449, %447 : vector<32x128xf32>
    %451 = arith.select %16, %448, %450 : vector<32x128xi1>, vector<32x128xf32>
    %452 = arith.mulf %436, %430 : vector<32x128xf32>
    %453 = arith.mulf %438, %451 : vector<32x128xf32>
    %454 = arith.addf %452, %453 : vector<32x128xf32>
    %c0_165 = arith.constant 0 : index
    %c0_166 = arith.constant 0 : index
    %c9 = arith.constant 9 : index
    %455 = vector.load %arg1[%c0_165, %c0_166, %c9] : memref<1x32x64xf32, #tpu.memory_space<vmem>>, vector<1x32x1xf32>
    %456 = vector.shape_cast %455 : vector<1x32x1xf32> to vector<32x1xf32>
    %c0_167 = arith.constant 0 : index
    %c0_168 = arith.constant 0 : index
    %c41 = arith.constant 41 : index
    %457 = vector.load %arg1[%c0_167, %c0_168, %c41] : memref<1x32x64xf32, #tpu.memory_space<vmem>>, vector<1x32x1xf32>
    %458 = vector.shape_cast %457 : vector<1x32x1xf32> to vector<32x1xf32>
    %459 = vector.shape_cast %456 : vector<32x1xf32> to vector<32x1xf32>
    %460 = vector.broadcast %459 : vector<32x1xf32> to vector<32x128xf32>
    %461 = vector.shape_cast %458 : vector<32x1xf32> to vector<32x1xf32>
    %462 = vector.broadcast %461 : vector<32x1xf32> to vector<32x128xf32>
    %c124_i32_169 = arith.constant 124 : i32
    %463 = tpu.dynamic_rotate %446 by %c124_i32_169 dim 1 : vector<32x128xf32>, i32 -> vector<32x128xf32>
    %c4_i32_170 = arith.constant 4 : i32
    %464 = tpu.dynamic_rotate %446 by %c4_i32_170 dim 1 : vector<32x128xf32>, i32 -> vector<32x128xf32>
    %cst_171 = arith.constant 0.000000e+00 : f32
    %465 = vector.broadcast %cst_171 : f32 to vector<32x128xf32>
    %466 = arith.subf %465, %463 : vector<32x128xf32>
    %467 = arith.select %24, %464, %466 : vector<32x128xi1>, vector<32x128xf32>
    %468 = arith.mulf %460, %446 : vector<32x128xf32>
    %469 = arith.mulf %462, %467 : vector<32x128xf32>
    %470 = arith.addf %468, %469 : vector<32x128xf32>
    %c124_i32_172 = arith.constant 124 : i32
    %471 = tpu.dynamic_rotate %454 by %c124_i32_172 dim 1 : vector<32x128xf32>, i32 -> vector<32x128xf32>
    %c4_i32_173 = arith.constant 4 : i32
    %472 = tpu.dynamic_rotate %454 by %c4_i32_173 dim 1 : vector<32x128xf32>, i32 -> vector<32x128xf32>
    %cst_174 = arith.constant 0.000000e+00 : f32
    %473 = vector.broadcast %cst_174 : f32 to vector<32x128xf32>
    %474 = arith.subf %473, %471 : vector<32x128xf32>
    %475 = arith.select %24, %472, %474 : vector<32x128xi1>, vector<32x128xf32>
    %476 = arith.mulf %460, %454 : vector<32x128xf32>
    %477 = arith.mulf %462, %475 : vector<32x128xf32>
    %478 = arith.addf %476, %477 : vector<32x128xf32>
    %c0_175 = arith.constant 0 : index
    %c0_176 = arith.constant 0 : index
    %c13 = arith.constant 13 : index
    %479 = vector.load %arg1[%c0_175, %c0_176, %c13] : memref<1x32x64xf32, #tpu.memory_space<vmem>>, vector<1x32x1xf32>
    %480 = vector.shape_cast %479 : vector<1x32x1xf32> to vector<32x1xf32>
    %c0_177 = arith.constant 0 : index
    %c0_178 = arith.constant 0 : index
    %c45 = arith.constant 45 : index
    %481 = vector.load %arg1[%c0_177, %c0_178, %c45] : memref<1x32x64xf32, #tpu.memory_space<vmem>>, vector<1x32x1xf32>
    %482 = vector.shape_cast %481 : vector<1x32x1xf32> to vector<32x1xf32>
    %483 = vector.shape_cast %480 : vector<32x1xf32> to vector<32x1xf32>
    %484 = vector.broadcast %483 : vector<32x1xf32> to vector<32x128xf32>
    %485 = vector.shape_cast %482 : vector<32x1xf32> to vector<32x1xf32>
    %486 = vector.broadcast %485 : vector<32x1xf32> to vector<32x128xf32>
    %c120_i32_179 = arith.constant 120 : i32
    %487 = tpu.dynamic_rotate %470 by %c120_i32_179 dim 1 : vector<32x128xf32>, i32 -> vector<32x128xf32>
    %c8_i32_180 = arith.constant 8 : i32
    %488 = tpu.dynamic_rotate %470 by %c8_i32_180 dim 1 : vector<32x128xf32>, i32 -> vector<32x128xf32>
    %cst_181 = arith.constant 0.000000e+00 : f32
    %489 = vector.broadcast %cst_181 : f32 to vector<32x128xf32>
    %490 = arith.subf %489, %487 : vector<32x128xf32>
    %491 = arith.select %32, %488, %490 : vector<32x128xi1>, vector<32x128xf32>
    %492 = arith.mulf %484, %470 : vector<32x128xf32>
    %493 = arith.mulf %486, %491 : vector<32x128xf32>
    %494 = arith.addf %492, %493 : vector<32x128xf32>
    %c120_i32_182 = arith.constant 120 : i32
    %495 = tpu.dynamic_rotate %478 by %c120_i32_182 dim 1 : vector<32x128xf32>, i32 -> vector<32x128xf32>
    %c8_i32_183 = arith.constant 8 : i32
    %496 = tpu.dynamic_rotate %478 by %c8_i32_183 dim 1 : vector<32x128xf32>, i32 -> vector<32x128xf32>
    %cst_184 = arith.constant 0.000000e+00 : f32
    %497 = vector.broadcast %cst_184 : f32 to vector<32x128xf32>
    %498 = arith.subf %497, %495 : vector<32x128xf32>
    %499 = arith.select %32, %496, %498 : vector<32x128xi1>, vector<32x128xf32>
    %500 = arith.mulf %484, %478 : vector<32x128xf32>
    %501 = arith.mulf %486, %499 : vector<32x128xf32>
    %502 = arith.addf %500, %501 : vector<32x128xf32>
    %c0_185 = arith.constant 0 : index
    %c0_186 = arith.constant 0 : index
    %c17 = arith.constant 17 : index
    %503 = vector.load %arg1[%c0_185, %c0_186, %c17] : memref<1x32x64xf32, #tpu.memory_space<vmem>>, vector<1x32x1xf32>
    %504 = vector.shape_cast %503 : vector<1x32x1xf32> to vector<32x1xf32>
    %c0_187 = arith.constant 0 : index
    %c0_188 = arith.constant 0 : index
    %c49 = arith.constant 49 : index
    %505 = vector.load %arg1[%c0_187, %c0_188, %c49] : memref<1x32x64xf32, #tpu.memory_space<vmem>>, vector<1x32x1xf32>
    %506 = vector.shape_cast %505 : vector<1x32x1xf32> to vector<32x1xf32>
    %507 = vector.shape_cast %504 : vector<32x1xf32> to vector<32x1xf32>
    %508 = vector.broadcast %507 : vector<32x1xf32> to vector<32x128xf32>
    %509 = vector.shape_cast %506 : vector<32x1xf32> to vector<32x1xf32>
    %510 = vector.broadcast %509 : vector<32x1xf32> to vector<32x128xf32>
    %c112_i32_189 = arith.constant 112 : i32
    %511 = tpu.dynamic_rotate %494 by %c112_i32_189 dim 1 : vector<32x128xf32>, i32 -> vector<32x128xf32>
    %c16_i32_190 = arith.constant 16 : i32
    %512 = tpu.dynamic_rotate %494 by %c16_i32_190 dim 1 : vector<32x128xf32>, i32 -> vector<32x128xf32>
    %cst_191 = arith.constant 0.000000e+00 : f32
    %513 = vector.broadcast %cst_191 : f32 to vector<32x128xf32>
    %514 = arith.subf %513, %511 : vector<32x128xf32>
    %515 = arith.select %40, %512, %514 : vector<32x128xi1>, vector<32x128xf32>
    %516 = arith.mulf %508, %494 : vector<32x128xf32>
    %517 = arith.mulf %510, %515 : vector<32x128xf32>
    %518 = arith.addf %516, %517 : vector<32x128xf32>
    %c112_i32_192 = arith.constant 112 : i32
    %519 = tpu.dynamic_rotate %502 by %c112_i32_192 dim 1 : vector<32x128xf32>, i32 -> vector<32x128xf32>
    %c16_i32_193 = arith.constant 16 : i32
    %520 = tpu.dynamic_rotate %502 by %c16_i32_193 dim 1 : vector<32x128xf32>, i32 -> vector<32x128xf32>
    %cst_194 = arith.constant 0.000000e+00 : f32
    %521 = vector.broadcast %cst_194 : f32 to vector<32x128xf32>
    %522 = arith.subf %521, %519 : vector<32x128xf32>
    %523 = arith.select %40, %520, %522 : vector<32x128xi1>, vector<32x128xf32>
    %524 = arith.mulf %508, %502 : vector<32x128xf32>
    %525 = arith.mulf %510, %523 : vector<32x128xf32>
    %526 = arith.addf %524, %525 : vector<32x128xf32>
    %c0_195 = arith.constant 0 : index
    %c0_196 = arith.constant 0 : index
    %c21 = arith.constant 21 : index
    %527 = vector.load %arg1[%c0_195, %c0_196, %c21] : memref<1x32x64xf32, #tpu.memory_space<vmem>>, vector<1x32x1xf32>
    %528 = vector.shape_cast %527 : vector<1x32x1xf32> to vector<32x1xf32>
    %c0_197 = arith.constant 0 : index
    %c0_198 = arith.constant 0 : index
    %c53 = arith.constant 53 : index
    %529 = vector.load %arg1[%c0_197, %c0_198, %c53] : memref<1x32x64xf32, #tpu.memory_space<vmem>>, vector<1x32x1xf32>
    %530 = vector.shape_cast %529 : vector<1x32x1xf32> to vector<32x1xf32>
    %531 = vector.shape_cast %528 : vector<32x1xf32> to vector<32x1xf32>
    %532 = vector.broadcast %531 : vector<32x1xf32> to vector<32x128xf32>
    %533 = vector.shape_cast %530 : vector<32x1xf32> to vector<32x1xf32>
    %534 = vector.broadcast %533 : vector<32x1xf32> to vector<32x128xf32>
    %c96_i32_199 = arith.constant 96 : i32
    %535 = tpu.dynamic_rotate %518 by %c96_i32_199 dim 1 : vector<32x128xf32>, i32 -> vector<32x128xf32>
    %c32_i32_200 = arith.constant 32 : i32
    %536 = tpu.dynamic_rotate %518 by %c32_i32_200 dim 1 : vector<32x128xf32>, i32 -> vector<32x128xf32>
    %cst_201 = arith.constant 0.000000e+00 : f32
    %537 = vector.broadcast %cst_201 : f32 to vector<32x128xf32>
    %538 = arith.subf %537, %535 : vector<32x128xf32>
    %539 = arith.select %48, %536, %538 : vector<32x128xi1>, vector<32x128xf32>
    %540 = arith.mulf %532, %518 : vector<32x128xf32>
    %541 = arith.mulf %534, %539 : vector<32x128xf32>
    %542 = arith.addf %540, %541 : vector<32x128xf32>
    %c96_i32_202 = arith.constant 96 : i32
    %543 = tpu.dynamic_rotate %526 by %c96_i32_202 dim 1 : vector<32x128xf32>, i32 -> vector<32x128xf32>
    %c32_i32_203 = arith.constant 32 : i32
    %544 = tpu.dynamic_rotate %526 by %c32_i32_203 dim 1 : vector<32x128xf32>, i32 -> vector<32x128xf32>
    %cst_204 = arith.constant 0.000000e+00 : f32
    %545 = vector.broadcast %cst_204 : f32 to vector<32x128xf32>
    %546 = arith.subf %545, %543 : vector<32x128xf32>
    %547 = arith.select %48, %544, %546 : vector<32x128xi1>, vector<32x128xf32>
    %548 = arith.mulf %532, %526 : vector<32x128xf32>
    %549 = arith.mulf %534, %547 : vector<32x128xf32>
    %550 = arith.addf %548, %549 : vector<32x128xf32>
    %c0_205 = arith.constant 0 : index
    %c0_206 = arith.constant 0 : index
    %c25 = arith.constant 25 : index
    %551 = vector.load %arg1[%c0_205, %c0_206, %c25] : memref<1x32x64xf32, #tpu.memory_space<vmem>>, vector<1x32x1xf32>
    %552 = vector.shape_cast %551 : vector<1x32x1xf32> to vector<32x1xf32>
    %c0_207 = arith.constant 0 : index
    %c0_208 = arith.constant 0 : index
    %c57 = arith.constant 57 : index
    %553 = vector.load %arg1[%c0_207, %c0_208, %c57] : memref<1x32x64xf32, #tpu.memory_space<vmem>>, vector<1x32x1xf32>
    %554 = vector.shape_cast %553 : vector<1x32x1xf32> to vector<32x1xf32>
    %555 = vector.shape_cast %552 : vector<32x1xf32> to vector<32x1xf32>
    %556 = vector.broadcast %555 : vector<32x1xf32> to vector<32x128xf32>
    %557 = vector.shape_cast %554 : vector<32x1xf32> to vector<32x1xf32>
    %558 = vector.broadcast %557 : vector<32x1xf32> to vector<32x128xf32>
    %c64_i32_209 = arith.constant 64 : i32
    %559 = tpu.dynamic_rotate %542 by %c64_i32_209 dim 1 : vector<32x128xf32>, i32 -> vector<32x128xf32>
    %c64_i32_210 = arith.constant 64 : i32
    %560 = tpu.dynamic_rotate %542 by %c64_i32_210 dim 1 : vector<32x128xf32>, i32 -> vector<32x128xf32>
    %cst_211 = arith.constant 0.000000e+00 : f32
    %561 = vector.broadcast %cst_211 : f32 to vector<32x128xf32>
    %562 = arith.subf %561, %559 : vector<32x128xf32>
    %563 = arith.select %56, %560, %562 : vector<32x128xi1>, vector<32x128xf32>
    %564 = arith.mulf %556, %542 : vector<32x128xf32>
    %565 = arith.mulf %558, %563 : vector<32x128xf32>
    %566 = arith.addf %564, %565 : vector<32x128xf32>
    %c64_i32_212 = arith.constant 64 : i32
    %567 = tpu.dynamic_rotate %550 by %c64_i32_212 dim 1 : vector<32x128xf32>, i32 -> vector<32x128xf32>
    %c64_i32_213 = arith.constant 64 : i32
    %568 = tpu.dynamic_rotate %550 by %c64_i32_213 dim 1 : vector<32x128xf32>, i32 -> vector<32x128xf32>
    %cst_214 = arith.constant 0.000000e+00 : f32
    %569 = vector.broadcast %cst_214 : f32 to vector<32x128xf32>
    %570 = arith.subf %569, %567 : vector<32x128xf32>
    %571 = arith.select %56, %568, %570 : vector<32x128xi1>, vector<32x128xf32>
    %572 = arith.mulf %556, %550 : vector<32x128xf32>
    %573 = arith.mulf %558, %571 : vector<32x128xf32>
    %574 = arith.addf %572, %573 : vector<32x128xf32>
    %c0_215 = arith.constant 0 : index
    %c0_216 = arith.constant 0 : index
    %c29 = arith.constant 29 : index
    %575 = vector.load %arg1[%c0_215, %c0_216, %c29] : memref<1x32x64xf32, #tpu.memory_space<vmem>>, vector<1x32x1xf32>
    %576 = vector.shape_cast %575 : vector<1x32x1xf32> to vector<32x1xf32>
    %c0_217 = arith.constant 0 : index
    %c0_218 = arith.constant 0 : index
    %c61 = arith.constant 61 : index
    %577 = vector.load %arg1[%c0_217, %c0_218, %c61] : memref<1x32x64xf32, #tpu.memory_space<vmem>>, vector<1x32x1xf32>
    %578 = vector.shape_cast %577 : vector<1x32x1xf32> to vector<32x1xf32>
    %579 = vector.shape_cast %576 : vector<32x1xf32> to vector<32x1xf32>
    %580 = vector.broadcast %579 : vector<32x1xf32> to vector<32x128xf32>
    %581 = vector.shape_cast %578 : vector<32x1xf32> to vector<32x1xf32>
    %582 = vector.broadcast %581 : vector<32x1xf32> to vector<32x128xf32>
    %583 = arith.mulf %580, %566 : vector<32x128xf32>
    %584 = arith.mulf %582, %574 : vector<32x128xf32>
    %585 = arith.subf %583, %584 : vector<32x128xf32>
    %586 = arith.mulf %580, %574 : vector<32x128xf32>
    %587 = arith.mulf %582, %566 : vector<32x128xf32>
    %588 = arith.addf %586, %587 : vector<32x128xf32>
    %589 = arith.mulf %585, %138 : vector<32x128xf32>
    %590 = arith.mulf %588, %220 : vector<32x128xf32>
    %c0_219 = arith.constant 0 : index
    %c0_220 = arith.constant 0 : index
    %c2 = arith.constant 2 : index
    %591 = vector.load %arg1[%c0_219, %c0_220, %c2] : memref<1x32x64xf32, #tpu.memory_space<vmem>>, vector<1x32x1xf32>
    %592 = vector.shape_cast %591 : vector<1x32x1xf32> to vector<32x1xf32>
    %c0_221 = arith.constant 0 : index
    %c0_222 = arith.constant 0 : index
    %c34 = arith.constant 34 : index
    %593 = vector.load %arg1[%c0_221, %c0_222, %c34] : memref<1x32x64xf32, #tpu.memory_space<vmem>>, vector<1x32x1xf32>
    %594 = vector.shape_cast %593 : vector<1x32x1xf32> to vector<32x1xf32>
    %595 = vector.shape_cast %592 : vector<32x1xf32> to vector<32x1xf32>
    %596 = vector.broadcast %595 : vector<32x1xf32> to vector<32x128xf32>
    %597 = vector.shape_cast %594 : vector<32x1xf32> to vector<32x1xf32>
    %598 = vector.broadcast %597 : vector<32x1xf32> to vector<32x128xf32>
    %c127_i32_223 = arith.constant 127 : i32
    %599 = tpu.dynamic_rotate %589 by %c127_i32_223 dim 1 : vector<32x128xf32>, i32 -> vector<32x128xf32>
    %c1_i32_224 = arith.constant 1 : i32
    %600 = tpu.dynamic_rotate %589 by %c1_i32_224 dim 1 : vector<32x128xf32>, i32 -> vector<32x128xf32>
    %cst_225 = arith.constant 0.000000e+00 : f32
    %601 = vector.broadcast %cst_225 : f32 to vector<32x128xf32>
    %602 = arith.subf %601, %599 : vector<32x128xf32>
    %603 = arith.select %8, %600, %602 : vector<32x128xi1>, vector<32x128xf32>
    %604 = arith.mulf %596, %589 : vector<32x128xf32>
    %605 = arith.mulf %598, %603 : vector<32x128xf32>
    %606 = arith.addf %604, %605 : vector<32x128xf32>
    %c127_i32_226 = arith.constant 127 : i32
    %607 = tpu.dynamic_rotate %590 by %c127_i32_226 dim 1 : vector<32x128xf32>, i32 -> vector<32x128xf32>
    %c1_i32_227 = arith.constant 1 : i32
    %608 = tpu.dynamic_rotate %590 by %c1_i32_227 dim 1 : vector<32x128xf32>, i32 -> vector<32x128xf32>
    %cst_228 = arith.constant 0.000000e+00 : f32
    %609 = vector.broadcast %cst_228 : f32 to vector<32x128xf32>
    %610 = arith.subf %609, %607 : vector<32x128xf32>
    %611 = arith.select %8, %608, %610 : vector<32x128xi1>, vector<32x128xf32>
    %612 = arith.mulf %596, %590 : vector<32x128xf32>
    %613 = arith.mulf %598, %611 : vector<32x128xf32>
    %614 = arith.addf %612, %613 : vector<32x128xf32>
    %c0_229 = arith.constant 0 : index
    %c0_230 = arith.constant 0 : index
    %c6 = arith.constant 6 : index
    %615 = vector.load %arg1[%c0_229, %c0_230, %c6] : memref<1x32x64xf32, #tpu.memory_space<vmem>>, vector<1x32x1xf32>
    %616 = vector.shape_cast %615 : vector<1x32x1xf32> to vector<32x1xf32>
    %c0_231 = arith.constant 0 : index
    %c0_232 = arith.constant 0 : index
    %c38 = arith.constant 38 : index
    %617 = vector.load %arg1[%c0_231, %c0_232, %c38] : memref<1x32x64xf32, #tpu.memory_space<vmem>>, vector<1x32x1xf32>
    %618 = vector.shape_cast %617 : vector<1x32x1xf32> to vector<32x1xf32>
    %619 = vector.shape_cast %616 : vector<32x1xf32> to vector<32x1xf32>
    %620 = vector.broadcast %619 : vector<32x1xf32> to vector<32x128xf32>
    %621 = vector.shape_cast %618 : vector<32x1xf32> to vector<32x1xf32>
    %622 = vector.broadcast %621 : vector<32x1xf32> to vector<32x128xf32>
    %c126_i32_233 = arith.constant 126 : i32
    %623 = tpu.dynamic_rotate %606 by %c126_i32_233 dim 1 : vector<32x128xf32>, i32 -> vector<32x128xf32>
    %c2_i32_234 = arith.constant 2 : i32
    %624 = tpu.dynamic_rotate %606 by %c2_i32_234 dim 1 : vector<32x128xf32>, i32 -> vector<32x128xf32>
    %cst_235 = arith.constant 0.000000e+00 : f32
    %625 = vector.broadcast %cst_235 : f32 to vector<32x128xf32>
    %626 = arith.subf %625, %623 : vector<32x128xf32>
    %627 = arith.select %16, %624, %626 : vector<32x128xi1>, vector<32x128xf32>
    %628 = arith.mulf %620, %606 : vector<32x128xf32>
    %629 = arith.mulf %622, %627 : vector<32x128xf32>
    %630 = arith.addf %628, %629 : vector<32x128xf32>
    %c126_i32_236 = arith.constant 126 : i32
    %631 = tpu.dynamic_rotate %614 by %c126_i32_236 dim 1 : vector<32x128xf32>, i32 -> vector<32x128xf32>
    %c2_i32_237 = arith.constant 2 : i32
    %632 = tpu.dynamic_rotate %614 by %c2_i32_237 dim 1 : vector<32x128xf32>, i32 -> vector<32x128xf32>
    %cst_238 = arith.constant 0.000000e+00 : f32
    %633 = vector.broadcast %cst_238 : f32 to vector<32x128xf32>
    %634 = arith.subf %633, %631 : vector<32x128xf32>
    %635 = arith.select %16, %632, %634 : vector<32x128xi1>, vector<32x128xf32>
    %636 = arith.mulf %620, %614 : vector<32x128xf32>
    %637 = arith.mulf %622, %635 : vector<32x128xf32>
    %638 = arith.addf %636, %637 : vector<32x128xf32>
    %c0_239 = arith.constant 0 : index
    %c0_240 = arith.constant 0 : index
    %c10 = arith.constant 10 : index
    %639 = vector.load %arg1[%c0_239, %c0_240, %c10] : memref<1x32x64xf32, #tpu.memory_space<vmem>>, vector<1x32x1xf32>
    %640 = vector.shape_cast %639 : vector<1x32x1xf32> to vector<32x1xf32>
    %c0_241 = arith.constant 0 : index
    %c0_242 = arith.constant 0 : index
    %c42 = arith.constant 42 : index
    %641 = vector.load %arg1[%c0_241, %c0_242, %c42] : memref<1x32x64xf32, #tpu.memory_space<vmem>>, vector<1x32x1xf32>
    %642 = vector.shape_cast %641 : vector<1x32x1xf32> to vector<32x1xf32>
    %643 = vector.shape_cast %640 : vector<32x1xf32> to vector<32x1xf32>
    %644 = vector.broadcast %643 : vector<32x1xf32> to vector<32x128xf32>
    %645 = vector.shape_cast %642 : vector<32x1xf32> to vector<32x1xf32>
    %646 = vector.broadcast %645 : vector<32x1xf32> to vector<32x128xf32>
    %c124_i32_243 = arith.constant 124 : i32
    %647 = tpu.dynamic_rotate %630 by %c124_i32_243 dim 1 : vector<32x128xf32>, i32 -> vector<32x128xf32>
    %c4_i32_244 = arith.constant 4 : i32
    %648 = tpu.dynamic_rotate %630 by %c4_i32_244 dim 1 : vector<32x128xf32>, i32 -> vector<32x128xf32>
    %cst_245 = arith.constant 0.000000e+00 : f32
    %649 = vector.broadcast %cst_245 : f32 to vector<32x128xf32>
    %650 = arith.subf %649, %647 : vector<32x128xf32>
    %651 = arith.select %24, %648, %650 : vector<32x128xi1>, vector<32x128xf32>
    %652 = arith.mulf %644, %630 : vector<32x128xf32>
    %653 = arith.mulf %646, %651 : vector<32x128xf32>
    %654 = arith.addf %652, %653 : vector<32x128xf32>
    %c124_i32_246 = arith.constant 124 : i32
    %655 = tpu.dynamic_rotate %638 by %c124_i32_246 dim 1 : vector<32x128xf32>, i32 -> vector<32x128xf32>
    %c4_i32_247 = arith.constant 4 : i32
    %656 = tpu.dynamic_rotate %638 by %c4_i32_247 dim 1 : vector<32x128xf32>, i32 -> vector<32x128xf32>
    %cst_248 = arith.constant 0.000000e+00 : f32
    %657 = vector.broadcast %cst_248 : f32 to vector<32x128xf32>
    %658 = arith.subf %657, %655 : vector<32x128xf32>
    %659 = arith.select %24, %656, %658 : vector<32x128xi1>, vector<32x128xf32>
    %660 = arith.mulf %644, %638 : vector<32x128xf32>
    %661 = arith.mulf %646, %659 : vector<32x128xf32>
    %662 = arith.addf %660, %661 : vector<32x128xf32>
    %c0_249 = arith.constant 0 : index
    %c0_250 = arith.constant 0 : index
    %c14 = arith.constant 14 : index
    %663 = vector.load %arg1[%c0_249, %c0_250, %c14] : memref<1x32x64xf32, #tpu.memory_space<vmem>>, vector<1x32x1xf32>
    %664 = vector.shape_cast %663 : vector<1x32x1xf32> to vector<32x1xf32>
    %c0_251 = arith.constant 0 : index
    %c0_252 = arith.constant 0 : index
    %c46 = arith.constant 46 : index
    %665 = vector.load %arg1[%c0_251, %c0_252, %c46] : memref<1x32x64xf32, #tpu.memory_space<vmem>>, vector<1x32x1xf32>
    %666 = vector.shape_cast %665 : vector<1x32x1xf32> to vector<32x1xf32>
    %667 = vector.shape_cast %664 : vector<32x1xf32> to vector<32x1xf32>
    %668 = vector.broadcast %667 : vector<32x1xf32> to vector<32x128xf32>
    %669 = vector.shape_cast %666 : vector<32x1xf32> to vector<32x1xf32>
    %670 = vector.broadcast %669 : vector<32x1xf32> to vector<32x128xf32>
    %c120_i32_253 = arith.constant 120 : i32
    %671 = tpu.dynamic_rotate %654 by %c120_i32_253 dim 1 : vector<32x128xf32>, i32 -> vector<32x128xf32>
    %c8_i32_254 = arith.constant 8 : i32
    %672 = tpu.dynamic_rotate %654 by %c8_i32_254 dim 1 : vector<32x128xf32>, i32 -> vector<32x128xf32>
    %cst_255 = arith.constant 0.000000e+00 : f32
    %673 = vector.broadcast %cst_255 : f32 to vector<32x128xf32>
    %674 = arith.subf %673, %671 : vector<32x128xf32>
    %675 = arith.select %32, %672, %674 : vector<32x128xi1>, vector<32x128xf32>
    %676 = arith.mulf %668, %654 : vector<32x128xf32>
    %677 = arith.mulf %670, %675 : vector<32x128xf32>
    %678 = arith.addf %676, %677 : vector<32x128xf32>
    %c120_i32_256 = arith.constant 120 : i32
    %679 = tpu.dynamic_rotate %662 by %c120_i32_256 dim 1 : vector<32x128xf32>, i32 -> vector<32x128xf32>
    %c8_i32_257 = arith.constant 8 : i32
    %680 = tpu.dynamic_rotate %662 by %c8_i32_257 dim 1 : vector<32x128xf32>, i32 -> vector<32x128xf32>
    %cst_258 = arith.constant 0.000000e+00 : f32
    %681 = vector.broadcast %cst_258 : f32 to vector<32x128xf32>
    %682 = arith.subf %681, %679 : vector<32x128xf32>
    %683 = arith.select %32, %680, %682 : vector<32x128xi1>, vector<32x128xf32>
    %684 = arith.mulf %668, %662 : vector<32x128xf32>
    %685 = arith.mulf %670, %683 : vector<32x128xf32>
    %686 = arith.addf %684, %685 : vector<32x128xf32>
    %c0_259 = arith.constant 0 : index
    %c0_260 = arith.constant 0 : index
    %c18 = arith.constant 18 : index
    %687 = vector.load %arg1[%c0_259, %c0_260, %c18] : memref<1x32x64xf32, #tpu.memory_space<vmem>>, vector<1x32x1xf32>
    %688 = vector.shape_cast %687 : vector<1x32x1xf32> to vector<32x1xf32>
    %c0_261 = arith.constant 0 : index
    %c0_262 = arith.constant 0 : index
    %c50 = arith.constant 50 : index
    %689 = vector.load %arg1[%c0_261, %c0_262, %c50] : memref<1x32x64xf32, #tpu.memory_space<vmem>>, vector<1x32x1xf32>
    %690 = vector.shape_cast %689 : vector<1x32x1xf32> to vector<32x1xf32>
    %691 = vector.shape_cast %688 : vector<32x1xf32> to vector<32x1xf32>
    %692 = vector.broadcast %691 : vector<32x1xf32> to vector<32x128xf32>
    %693 = vector.shape_cast %690 : vector<32x1xf32> to vector<32x1xf32>
    %694 = vector.broadcast %693 : vector<32x1xf32> to vector<32x128xf32>
    %c112_i32_263 = arith.constant 112 : i32
    %695 = tpu.dynamic_rotate %678 by %c112_i32_263 dim 1 : vector<32x128xf32>, i32 -> vector<32x128xf32>
    %c16_i32_264 = arith.constant 16 : i32
    %696 = tpu.dynamic_rotate %678 by %c16_i32_264 dim 1 : vector<32x128xf32>, i32 -> vector<32x128xf32>
    %cst_265 = arith.constant 0.000000e+00 : f32
    %697 = vector.broadcast %cst_265 : f32 to vector<32x128xf32>
    %698 = arith.subf %697, %695 : vector<32x128xf32>
    %699 = arith.select %40, %696, %698 : vector<32x128xi1>, vector<32x128xf32>
    %700 = arith.mulf %692, %678 : vector<32x128xf32>
    %701 = arith.mulf %694, %699 : vector<32x128xf32>
    %702 = arith.addf %700, %701 : vector<32x128xf32>
    %c112_i32_266 = arith.constant 112 : i32
    %703 = tpu.dynamic_rotate %686 by %c112_i32_266 dim 1 : vector<32x128xf32>, i32 -> vector<32x128xf32>
    %c16_i32_267 = arith.constant 16 : i32
    %704 = tpu.dynamic_rotate %686 by %c16_i32_267 dim 1 : vector<32x128xf32>, i32 -> vector<32x128xf32>
    %cst_268 = arith.constant 0.000000e+00 : f32
    %705 = vector.broadcast %cst_268 : f32 to vector<32x128xf32>
    %706 = arith.subf %705, %703 : vector<32x128xf32>
    %707 = arith.select %40, %704, %706 : vector<32x128xi1>, vector<32x128xf32>
    %708 = arith.mulf %692, %686 : vector<32x128xf32>
    %709 = arith.mulf %694, %707 : vector<32x128xf32>
    %710 = arith.addf %708, %709 : vector<32x128xf32>
    %c0_269 = arith.constant 0 : index
    %c0_270 = arith.constant 0 : index
    %c22 = arith.constant 22 : index
    %711 = vector.load %arg1[%c0_269, %c0_270, %c22] : memref<1x32x64xf32, #tpu.memory_space<vmem>>, vector<1x32x1xf32>
    %712 = vector.shape_cast %711 : vector<1x32x1xf32> to vector<32x1xf32>
    %c0_271 = arith.constant 0 : index
    %c0_272 = arith.constant 0 : index
    %c54 = arith.constant 54 : index
    %713 = vector.load %arg1[%c0_271, %c0_272, %c54] : memref<1x32x64xf32, #tpu.memory_space<vmem>>, vector<1x32x1xf32>
    %714 = vector.shape_cast %713 : vector<1x32x1xf32> to vector<32x1xf32>
    %715 = vector.shape_cast %712 : vector<32x1xf32> to vector<32x1xf32>
    %716 = vector.broadcast %715 : vector<32x1xf32> to vector<32x128xf32>
    %717 = vector.shape_cast %714 : vector<32x1xf32> to vector<32x1xf32>
    %718 = vector.broadcast %717 : vector<32x1xf32> to vector<32x128xf32>
    %c96_i32_273 = arith.constant 96 : i32
    %719 = tpu.dynamic_rotate %702 by %c96_i32_273 dim 1 : vector<32x128xf32>, i32 -> vector<32x128xf32>
    %c32_i32_274 = arith.constant 32 : i32
    %720 = tpu.dynamic_rotate %702 by %c32_i32_274 dim 1 : vector<32x128xf32>, i32 -> vector<32x128xf32>
    %cst_275 = arith.constant 0.000000e+00 : f32
    %721 = vector.broadcast %cst_275 : f32 to vector<32x128xf32>
    %722 = arith.subf %721, %719 : vector<32x128xf32>
    %723 = arith.select %48, %720, %722 : vector<32x128xi1>, vector<32x128xf32>
    %724 = arith.mulf %716, %702 : vector<32x128xf32>
    %725 = arith.mulf %718, %723 : vector<32x128xf32>
    %726 = arith.addf %724, %725 : vector<32x128xf32>
    %c96_i32_276 = arith.constant 96 : i32
    %727 = tpu.dynamic_rotate %710 by %c96_i32_276 dim 1 : vector<32x128xf32>, i32 -> vector<32x128xf32>
    %c32_i32_277 = arith.constant 32 : i32
    %728 = tpu.dynamic_rotate %710 by %c32_i32_277 dim 1 : vector<32x128xf32>, i32 -> vector<32x128xf32>
    %cst_278 = arith.constant 0.000000e+00 : f32
    %729 = vector.broadcast %cst_278 : f32 to vector<32x128xf32>
    %730 = arith.subf %729, %727 : vector<32x128xf32>
    %731 = arith.select %48, %728, %730 : vector<32x128xi1>, vector<32x128xf32>
    %732 = arith.mulf %716, %710 : vector<32x128xf32>
    %733 = arith.mulf %718, %731 : vector<32x128xf32>
    %734 = arith.addf %732, %733 : vector<32x128xf32>
    %c0_279 = arith.constant 0 : index
    %c0_280 = arith.constant 0 : index
    %c26 = arith.constant 26 : index
    %735 = vector.load %arg1[%c0_279, %c0_280, %c26] : memref<1x32x64xf32, #tpu.memory_space<vmem>>, vector<1x32x1xf32>
    %736 = vector.shape_cast %735 : vector<1x32x1xf32> to vector<32x1xf32>
    %c0_281 = arith.constant 0 : index
    %c0_282 = arith.constant 0 : index
    %c58 = arith.constant 58 : index
    %737 = vector.load %arg1[%c0_281, %c0_282, %c58] : memref<1x32x64xf32, #tpu.memory_space<vmem>>, vector<1x32x1xf32>
    %738 = vector.shape_cast %737 : vector<1x32x1xf32> to vector<32x1xf32>
    %739 = vector.shape_cast %736 : vector<32x1xf32> to vector<32x1xf32>
    %740 = vector.broadcast %739 : vector<32x1xf32> to vector<32x128xf32>
    %741 = vector.shape_cast %738 : vector<32x1xf32> to vector<32x1xf32>
    %742 = vector.broadcast %741 : vector<32x1xf32> to vector<32x128xf32>
    %c64_i32_283 = arith.constant 64 : i32
    %743 = tpu.dynamic_rotate %726 by %c64_i32_283 dim 1 : vector<32x128xf32>, i32 -> vector<32x128xf32>
    %c64_i32_284 = arith.constant 64 : i32
    %744 = tpu.dynamic_rotate %726 by %c64_i32_284 dim 1 : vector<32x128xf32>, i32 -> vector<32x128xf32>
    %cst_285 = arith.constant 0.000000e+00 : f32
    %745 = vector.broadcast %cst_285 : f32 to vector<32x128xf32>
    %746 = arith.subf %745, %743 : vector<32x128xf32>
    %747 = arith.select %56, %744, %746 : vector<32x128xi1>, vector<32x128xf32>
    %748 = arith.mulf %740, %726 : vector<32x128xf32>
    %749 = arith.mulf %742, %747 : vector<32x128xf32>
    %750 = arith.addf %748, %749 : vector<32x128xf32>
    %c64_i32_286 = arith.constant 64 : i32
    %751 = tpu.dynamic_rotate %734 by %c64_i32_286 dim 1 : vector<32x128xf32>, i32 -> vector<32x128xf32>
    %c64_i32_287 = arith.constant 64 : i32
    %752 = tpu.dynamic_rotate %734 by %c64_i32_287 dim 1 : vector<32x128xf32>, i32 -> vector<32x128xf32>
    %cst_288 = arith.constant 0.000000e+00 : f32
    %753 = vector.broadcast %cst_288 : f32 to vector<32x128xf32>
    %754 = arith.subf %753, %751 : vector<32x128xf32>
    %755 = arith.select %56, %752, %754 : vector<32x128xi1>, vector<32x128xf32>
    %756 = arith.mulf %740, %734 : vector<32x128xf32>
    %757 = arith.mulf %742, %755 : vector<32x128xf32>
    %758 = arith.addf %756, %757 : vector<32x128xf32>
    %c0_289 = arith.constant 0 : index
    %c0_290 = arith.constant 0 : index
    %c30 = arith.constant 30 : index
    %759 = vector.load %arg1[%c0_289, %c0_290, %c30] : memref<1x32x64xf32, #tpu.memory_space<vmem>>, vector<1x32x1xf32>
    %760 = vector.shape_cast %759 : vector<1x32x1xf32> to vector<32x1xf32>
    %c0_291 = arith.constant 0 : index
    %c0_292 = arith.constant 0 : index
    %c62 = arith.constant 62 : index
    %761 = vector.load %arg1[%c0_291, %c0_292, %c62] : memref<1x32x64xf32, #tpu.memory_space<vmem>>, vector<1x32x1xf32>
    %762 = vector.shape_cast %761 : vector<1x32x1xf32> to vector<32x1xf32>
    %763 = vector.shape_cast %760 : vector<32x1xf32> to vector<32x1xf32>
    %764 = vector.broadcast %763 : vector<32x1xf32> to vector<32x128xf32>
    %765 = vector.shape_cast %762 : vector<32x1xf32> to vector<32x1xf32>
    %766 = vector.broadcast %765 : vector<32x1xf32> to vector<32x128xf32>
    %767 = arith.mulf %764, %750 : vector<32x128xf32>
    %768 = arith.mulf %766, %758 : vector<32x128xf32>
    %769 = arith.subf %767, %768 : vector<32x128xf32>
    %770 = arith.mulf %764, %758 : vector<32x128xf32>
    %771 = arith.mulf %766, %750 : vector<32x128xf32>
    %772 = arith.addf %770, %771 : vector<32x128xf32>
    %773 = arith.mulf %769, %138 : vector<32x128xf32>
    %774 = arith.mulf %772, %220 : vector<32x128xf32>
    %c0_293 = arith.constant 0 : index
    %c0_294 = arith.constant 0 : index
    %c3 = arith.constant 3 : index
    %775 = vector.load %arg1[%c0_293, %c0_294, %c3] : memref<1x32x64xf32, #tpu.memory_space<vmem>>, vector<1x32x1xf32>
    %776 = vector.shape_cast %775 : vector<1x32x1xf32> to vector<32x1xf32>
    %c0_295 = arith.constant 0 : index
    %c0_296 = arith.constant 0 : index
    %c35 = arith.constant 35 : index
    %777 = vector.load %arg1[%c0_295, %c0_296, %c35] : memref<1x32x64xf32, #tpu.memory_space<vmem>>, vector<1x32x1xf32>
    %778 = vector.shape_cast %777 : vector<1x32x1xf32> to vector<32x1xf32>
    %779 = vector.shape_cast %776 : vector<32x1xf32> to vector<32x1xf32>
    %780 = vector.broadcast %779 : vector<32x1xf32> to vector<32x128xf32>
    %781 = vector.shape_cast %778 : vector<32x1xf32> to vector<32x1xf32>
    %782 = vector.broadcast %781 : vector<32x1xf32> to vector<32x128xf32>
    %c127_i32_297 = arith.constant 127 : i32
    %783 = tpu.dynamic_rotate %773 by %c127_i32_297 dim 1 : vector<32x128xf32>, i32 -> vector<32x128xf32>
    %c1_i32_298 = arith.constant 1 : i32
    %784 = tpu.dynamic_rotate %773 by %c1_i32_298 dim 1 : vector<32x128xf32>, i32 -> vector<32x128xf32>
    %cst_299 = arith.constant 0.000000e+00 : f32
    %785 = vector.broadcast %cst_299 : f32 to vector<32x128xf32>
    %786 = arith.subf %785, %783 : vector<32x128xf32>
    %787 = arith.select %8, %784, %786 : vector<32x128xi1>, vector<32x128xf32>
    %788 = arith.mulf %780, %773 : vector<32x128xf32>
    %789 = arith.mulf %782, %787 : vector<32x128xf32>
    %790 = arith.addf %788, %789 : vector<32x128xf32>
    %c127_i32_300 = arith.constant 127 : i32
    %791 = tpu.dynamic_rotate %774 by %c127_i32_300 dim 1 : vector<32x128xf32>, i32 -> vector<32x128xf32>
    %c1_i32_301 = arith.constant 1 : i32
    %792 = tpu.dynamic_rotate %774 by %c1_i32_301 dim 1 : vector<32x128xf32>, i32 -> vector<32x128xf32>
    %cst_302 = arith.constant 0.000000e+00 : f32
    %793 = vector.broadcast %cst_302 : f32 to vector<32x128xf32>
    %794 = arith.subf %793, %791 : vector<32x128xf32>
    %795 = arith.select %8, %792, %794 : vector<32x128xi1>, vector<32x128xf32>
    %796 = arith.mulf %780, %774 : vector<32x128xf32>
    %797 = arith.mulf %782, %795 : vector<32x128xf32>
    %798 = arith.addf %796, %797 : vector<32x128xf32>
    %c0_303 = arith.constant 0 : index
    %c0_304 = arith.constant 0 : index
    %c7 = arith.constant 7 : index
    %799 = vector.load %arg1[%c0_303, %c0_304, %c7] : memref<1x32x64xf32, #tpu.memory_space<vmem>>, vector<1x32x1xf32>
    %800 = vector.shape_cast %799 : vector<1x32x1xf32> to vector<32x1xf32>
    %c0_305 = arith.constant 0 : index
    %c0_306 = arith.constant 0 : index
    %c39 = arith.constant 39 : index
    %801 = vector.load %arg1[%c0_305, %c0_306, %c39] : memref<1x32x64xf32, #tpu.memory_space<vmem>>, vector<1x32x1xf32>
    %802 = vector.shape_cast %801 : vector<1x32x1xf32> to vector<32x1xf32>
    %803 = vector.shape_cast %800 : vector<32x1xf32> to vector<32x1xf32>
    %804 = vector.broadcast %803 : vector<32x1xf32> to vector<32x128xf32>
    %805 = vector.shape_cast %802 : vector<32x1xf32> to vector<32x1xf32>
    %806 = vector.broadcast %805 : vector<32x1xf32> to vector<32x128xf32>
    %c126_i32_307 = arith.constant 126 : i32
    %807 = tpu.dynamic_rotate %790 by %c126_i32_307 dim 1 : vector<32x128xf32>, i32 -> vector<32x128xf32>
    %c2_i32_308 = arith.constant 2 : i32
    %808 = tpu.dynamic_rotate %790 by %c2_i32_308 dim 1 : vector<32x128xf32>, i32 -> vector<32x128xf32>
    %cst_309 = arith.constant 0.000000e+00 : f32
    %809 = vector.broadcast %cst_309 : f32 to vector<32x128xf32>
    %810 = arith.subf %809, %807 : vector<32x128xf32>
    %811 = arith.select %16, %808, %810 : vector<32x128xi1>, vector<32x128xf32>
    %812 = arith.mulf %804, %790 : vector<32x128xf32>
    %813 = arith.mulf %806, %811 : vector<32x128xf32>
    %814 = arith.addf %812, %813 : vector<32x128xf32>
    %c126_i32_310 = arith.constant 126 : i32
    %815 = tpu.dynamic_rotate %798 by %c126_i32_310 dim 1 : vector<32x128xf32>, i32 -> vector<32x128xf32>
    %c2_i32_311 = arith.constant 2 : i32
    %816 = tpu.dynamic_rotate %798 by %c2_i32_311 dim 1 : vector<32x128xf32>, i32 -> vector<32x128xf32>
    %cst_312 = arith.constant 0.000000e+00 : f32
    %817 = vector.broadcast %cst_312 : f32 to vector<32x128xf32>
    %818 = arith.subf %817, %815 : vector<32x128xf32>
    %819 = arith.select %16, %816, %818 : vector<32x128xi1>, vector<32x128xf32>
    %820 = arith.mulf %804, %798 : vector<32x128xf32>
    %821 = arith.mulf %806, %819 : vector<32x128xf32>
    %822 = arith.addf %820, %821 : vector<32x128xf32>
    %c0_313 = arith.constant 0 : index
    %c0_314 = arith.constant 0 : index
    %c11 = arith.constant 11 : index
    %823 = vector.load %arg1[%c0_313, %c0_314, %c11] : memref<1x32x64xf32, #tpu.memory_space<vmem>>, vector<1x32x1xf32>
    %824 = vector.shape_cast %823 : vector<1x32x1xf32> to vector<32x1xf32>
    %c0_315 = arith.constant 0 : index
    %c0_316 = arith.constant 0 : index
    %c43 = arith.constant 43 : index
    %825 = vector.load %arg1[%c0_315, %c0_316, %c43] : memref<1x32x64xf32, #tpu.memory_space<vmem>>, vector<1x32x1xf32>
    %826 = vector.shape_cast %825 : vector<1x32x1xf32> to vector<32x1xf32>
    %827 = vector.shape_cast %824 : vector<32x1xf32> to vector<32x1xf32>
    %828 = vector.broadcast %827 : vector<32x1xf32> to vector<32x128xf32>
    %829 = vector.shape_cast %826 : vector<32x1xf32> to vector<32x1xf32>
    %830 = vector.broadcast %829 : vector<32x1xf32> to vector<32x128xf32>
    %c124_i32_317 = arith.constant 124 : i32
    %831 = tpu.dynamic_rotate %814 by %c124_i32_317 dim 1 : vector<32x128xf32>, i32 -> vector<32x128xf32>
    %c4_i32_318 = arith.constant 4 : i32
    %832 = tpu.dynamic_rotate %814 by %c4_i32_318 dim 1 : vector<32x128xf32>, i32 -> vector<32x128xf32>
    %cst_319 = arith.constant 0.000000e+00 : f32
    %833 = vector.broadcast %cst_319 : f32 to vector<32x128xf32>
    %834 = arith.subf %833, %831 : vector<32x128xf32>
    %835 = arith.select %24, %832, %834 : vector<32x128xi1>, vector<32x128xf32>
    %836 = arith.mulf %828, %814 : vector<32x128xf32>
    %837 = arith.mulf %830, %835 : vector<32x128xf32>
    %838 = arith.addf %836, %837 : vector<32x128xf32>
    %c124_i32_320 = arith.constant 124 : i32
    %839 = tpu.dynamic_rotate %822 by %c124_i32_320 dim 1 : vector<32x128xf32>, i32 -> vector<32x128xf32>
    %c4_i32_321 = arith.constant 4 : i32
    %840 = tpu.dynamic_rotate %822 by %c4_i32_321 dim 1 : vector<32x128xf32>, i32 -> vector<32x128xf32>
    %cst_322 = arith.constant 0.000000e+00 : f32
    %841 = vector.broadcast %cst_322 : f32 to vector<32x128xf32>
    %842 = arith.subf %841, %839 : vector<32x128xf32>
    %843 = arith.select %24, %840, %842 : vector<32x128xi1>, vector<32x128xf32>
    %844 = arith.mulf %828, %822 : vector<32x128xf32>
    %845 = arith.mulf %830, %843 : vector<32x128xf32>
    %846 = arith.addf %844, %845 : vector<32x128xf32>
    %c0_323 = arith.constant 0 : index
    %c0_324 = arith.constant 0 : index
    %c15 = arith.constant 15 : index
    %847 = vector.load %arg1[%c0_323, %c0_324, %c15] : memref<1x32x64xf32, #tpu.memory_space<vmem>>, vector<1x32x1xf32>
    %848 = vector.shape_cast %847 : vector<1x32x1xf32> to vector<32x1xf32>
    %c0_325 = arith.constant 0 : index
    %c0_326 = arith.constant 0 : index
    %c47 = arith.constant 47 : index
    %849 = vector.load %arg1[%c0_325, %c0_326, %c47] : memref<1x32x64xf32, #tpu.memory_space<vmem>>, vector<1x32x1xf32>
    %850 = vector.shape_cast %849 : vector<1x32x1xf32> to vector<32x1xf32>
    %851 = vector.shape_cast %848 : vector<32x1xf32> to vector<32x1xf32>
    %852 = vector.broadcast %851 : vector<32x1xf32> to vector<32x128xf32>
    %853 = vector.shape_cast %850 : vector<32x1xf32> to vector<32x1xf32>
    %854 = vector.broadcast %853 : vector<32x1xf32> to vector<32x128xf32>
    %c120_i32_327 = arith.constant 120 : i32
    %855 = tpu.dynamic_rotate %838 by %c120_i32_327 dim 1 : vector<32x128xf32>, i32 -> vector<32x128xf32>
    %c8_i32_328 = arith.constant 8 : i32
    %856 = tpu.dynamic_rotate %838 by %c8_i32_328 dim 1 : vector<32x128xf32>, i32 -> vector<32x128xf32>
    %cst_329 = arith.constant 0.000000e+00 : f32
    %857 = vector.broadcast %cst_329 : f32 to vector<32x128xf32>
    %858 = arith.subf %857, %855 : vector<32x128xf32>
    %859 = arith.select %32, %856, %858 : vector<32x128xi1>, vector<32x128xf32>
    %860 = arith.mulf %852, %838 : vector<32x128xf32>
    %861 = arith.mulf %854, %859 : vector<32x128xf32>
    %862 = arith.addf %860, %861 : vector<32x128xf32>
    %c120_i32_330 = arith.constant 120 : i32
    %863 = tpu.dynamic_rotate %846 by %c120_i32_330 dim 1 : vector<32x128xf32>, i32 -> vector<32x128xf32>
    %c8_i32_331 = arith.constant 8 : i32
    %864 = tpu.dynamic_rotate %846 by %c8_i32_331 dim 1 : vector<32x128xf32>, i32 -> vector<32x128xf32>
    %cst_332 = arith.constant 0.000000e+00 : f32
    %865 = vector.broadcast %cst_332 : f32 to vector<32x128xf32>
    %866 = arith.subf %865, %863 : vector<32x128xf32>
    %867 = arith.select %32, %864, %866 : vector<32x128xi1>, vector<32x128xf32>
    %868 = arith.mulf %852, %846 : vector<32x128xf32>
    %869 = arith.mulf %854, %867 : vector<32x128xf32>
    %870 = arith.addf %868, %869 : vector<32x128xf32>
    %c0_333 = arith.constant 0 : index
    %c0_334 = arith.constant 0 : index
    %c19 = arith.constant 19 : index
    %871 = vector.load %arg1[%c0_333, %c0_334, %c19] : memref<1x32x64xf32, #tpu.memory_space<vmem>>, vector<1x32x1xf32>
    %872 = vector.shape_cast %871 : vector<1x32x1xf32> to vector<32x1xf32>
    %c0_335 = arith.constant 0 : index
    %c0_336 = arith.constant 0 : index
    %c51 = arith.constant 51 : index
    %873 = vector.load %arg1[%c0_335, %c0_336, %c51] : memref<1x32x64xf32, #tpu.memory_space<vmem>>, vector<1x32x1xf32>
    %874 = vector.shape_cast %873 : vector<1x32x1xf32> to vector<32x1xf32>
    %875 = vector.shape_cast %872 : vector<32x1xf32> to vector<32x1xf32>
    %876 = vector.broadcast %875 : vector<32x1xf32> to vector<32x128xf32>
    %877 = vector.shape_cast %874 : vector<32x1xf32> to vector<32x1xf32>
    %878 = vector.broadcast %877 : vector<32x1xf32> to vector<32x128xf32>
    %c112_i32_337 = arith.constant 112 : i32
    %879 = tpu.dynamic_rotate %862 by %c112_i32_337 dim 1 : vector<32x128xf32>, i32 -> vector<32x128xf32>
    %c16_i32_338 = arith.constant 16 : i32
    %880 = tpu.dynamic_rotate %862 by %c16_i32_338 dim 1 : vector<32x128xf32>, i32 -> vector<32x128xf32>
    %cst_339 = arith.constant 0.000000e+00 : f32
    %881 = vector.broadcast %cst_339 : f32 to vector<32x128xf32>
    %882 = arith.subf %881, %879 : vector<32x128xf32>
    %883 = arith.select %40, %880, %882 : vector<32x128xi1>, vector<32x128xf32>
    %884 = arith.mulf %876, %862 : vector<32x128xf32>
    %885 = arith.mulf %878, %883 : vector<32x128xf32>
    %886 = arith.addf %884, %885 : vector<32x128xf32>
    %c112_i32_340 = arith.constant 112 : i32
    %887 = tpu.dynamic_rotate %870 by %c112_i32_340 dim 1 : vector<32x128xf32>, i32 -> vector<32x128xf32>
    %c16_i32_341 = arith.constant 16 : i32
    %888 = tpu.dynamic_rotate %870 by %c16_i32_341 dim 1 : vector<32x128xf32>, i32 -> vector<32x128xf32>
    %cst_342 = arith.constant 0.000000e+00 : f32
    %889 = vector.broadcast %cst_342 : f32 to vector<32x128xf32>
    %890 = arith.subf %889, %887 : vector<32x128xf32>
    %891 = arith.select %40, %888, %890 : vector<32x128xi1>, vector<32x128xf32>
    %892 = arith.mulf %876, %870 : vector<32x128xf32>
    %893 = arith.mulf %878, %891 : vector<32x128xf32>
    %894 = arith.addf %892, %893 : vector<32x128xf32>
    %c0_343 = arith.constant 0 : index
    %c0_344 = arith.constant 0 : index
    %c23 = arith.constant 23 : index
    %895 = vector.load %arg1[%c0_343, %c0_344, %c23] : memref<1x32x64xf32, #tpu.memory_space<vmem>>, vector<1x32x1xf32>
    %896 = vector.shape_cast %895 : vector<1x32x1xf32> to vector<32x1xf32>
    %c0_345 = arith.constant 0 : index
    %c0_346 = arith.constant 0 : index
    %c55 = arith.constant 55 : index
    %897 = vector.load %arg1[%c0_345, %c0_346, %c55] : memref<1x32x64xf32, #tpu.memory_space<vmem>>, vector<1x32x1xf32>
    %898 = vector.shape_cast %897 : vector<1x32x1xf32> to vector<32x1xf32>
    %899 = vector.shape_cast %896 : vector<32x1xf32> to vector<32x1xf32>
    %900 = vector.broadcast %899 : vector<32x1xf32> to vector<32x128xf32>
    %901 = vector.shape_cast %898 : vector<32x1xf32> to vector<32x1xf32>
    %902 = vector.broadcast %901 : vector<32x1xf32> to vector<32x128xf32>
    %c96_i32_347 = arith.constant 96 : i32
    %903 = tpu.dynamic_rotate %886 by %c96_i32_347 dim 1 : vector<32x128xf32>, i32 -> vector<32x128xf32>
    %c32_i32_348 = arith.constant 32 : i32
    %904 = tpu.dynamic_rotate %886 by %c32_i32_348 dim 1 : vector<32x128xf32>, i32 -> vector<32x128xf32>
    %cst_349 = arith.constant 0.000000e+00 : f32
    %905 = vector.broadcast %cst_349 : f32 to vector<32x128xf32>
    %906 = arith.subf %905, %903 : vector<32x128xf32>
    %907 = arith.select %48, %904, %906 : vector<32x128xi1>, vector<32x128xf32>
    %908 = arith.mulf %900, %886 : vector<32x128xf32>
    %909 = arith.mulf %902, %907 : vector<32x128xf32>
    %910 = arith.addf %908, %909 : vector<32x128xf32>
    %c96_i32_350 = arith.constant 96 : i32
    %911 = tpu.dynamic_rotate %894 by %c96_i32_350 dim 1 : vector<32x128xf32>, i32 -> vector<32x128xf32>
    %c32_i32_351 = arith.constant 32 : i32
    %912 = tpu.dynamic_rotate %894 by %c32_i32_351 dim 1 : vector<32x128xf32>, i32 -> vector<32x128xf32>
    %cst_352 = arith.constant 0.000000e+00 : f32
    %913 = vector.broadcast %cst_352 : f32 to vector<32x128xf32>
    %914 = arith.subf %913, %911 : vector<32x128xf32>
    %915 = arith.select %48, %912, %914 : vector<32x128xi1>, vector<32x128xf32>
    %916 = arith.mulf %900, %894 : vector<32x128xf32>
    %917 = arith.mulf %902, %915 : vector<32x128xf32>
    %918 = arith.addf %916, %917 : vector<32x128xf32>
    %c0_353 = arith.constant 0 : index
    %c0_354 = arith.constant 0 : index
    %c27 = arith.constant 27 : index
    %919 = vector.load %arg1[%c0_353, %c0_354, %c27] : memref<1x32x64xf32, #tpu.memory_space<vmem>>, vector<1x32x1xf32>
    %920 = vector.shape_cast %919 : vector<1x32x1xf32> to vector<32x1xf32>
    %c0_355 = arith.constant 0 : index
    %c0_356 = arith.constant 0 : index
    %c59 = arith.constant 59 : index
    %921 = vector.load %arg1[%c0_355, %c0_356, %c59] : memref<1x32x64xf32, #tpu.memory_space<vmem>>, vector<1x32x1xf32>
    %922 = vector.shape_cast %921 : vector<1x32x1xf32> to vector<32x1xf32>
    %923 = vector.shape_cast %920 : vector<32x1xf32> to vector<32x1xf32>
    %924 = vector.broadcast %923 : vector<32x1xf32> to vector<32x128xf32>
    %925 = vector.shape_cast %922 : vector<32x1xf32> to vector<32x1xf32>
    %926 = vector.broadcast %925 : vector<32x1xf32> to vector<32x128xf32>
    %c64_i32_357 = arith.constant 64 : i32
    %927 = tpu.dynamic_rotate %910 by %c64_i32_357 dim 1 : vector<32x128xf32>, i32 -> vector<32x128xf32>
    %c64_i32_358 = arith.constant 64 : i32
    %928 = tpu.dynamic_rotate %910 by %c64_i32_358 dim 1 : vector<32x128xf32>, i32 -> vector<32x128xf32>
    %cst_359 = arith.constant 0.000000e+00 : f32
    %929 = vector.broadcast %cst_359 : f32 to vector<32x128xf32>
    %930 = arith.subf %929, %927 : vector<32x128xf32>
    %931 = arith.select %56, %928, %930 : vector<32x128xi1>, vector<32x128xf32>
    %932 = arith.mulf %924, %910 : vector<32x128xf32>
    %933 = arith.mulf %926, %931 : vector<32x128xf32>
    %934 = arith.addf %932, %933 : vector<32x128xf32>
    %c64_i32_360 = arith.constant 64 : i32
    %935 = tpu.dynamic_rotate %918 by %c64_i32_360 dim 1 : vector<32x128xf32>, i32 -> vector<32x128xf32>
    %c64_i32_361 = arith.constant 64 : i32
    %936 = tpu.dynamic_rotate %918 by %c64_i32_361 dim 1 : vector<32x128xf32>, i32 -> vector<32x128xf32>
    %cst_362 = arith.constant 0.000000e+00 : f32
    %937 = vector.broadcast %cst_362 : f32 to vector<32x128xf32>
    %938 = arith.subf %937, %935 : vector<32x128xf32>
    %939 = arith.select %56, %936, %938 : vector<32x128xi1>, vector<32x128xf32>
    %940 = arith.mulf %924, %918 : vector<32x128xf32>
    %941 = arith.mulf %926, %939 : vector<32x128xf32>
    %942 = arith.addf %940, %941 : vector<32x128xf32>
    %c0_363 = arith.constant 0 : index
    %c0_364 = arith.constant 0 : index
    %c31 = arith.constant 31 : index
    %943 = vector.load %arg1[%c0_363, %c0_364, %c31] : memref<1x32x64xf32, #tpu.memory_space<vmem>>, vector<1x32x1xf32>
    %944 = vector.shape_cast %943 : vector<1x32x1xf32> to vector<32x1xf32>
    %c0_365 = arith.constant 0 : index
    %c0_366 = arith.constant 0 : index
    %c63 = arith.constant 63 : index
    %945 = vector.load %arg1[%c0_365, %c0_366, %c63] : memref<1x32x64xf32, #tpu.memory_space<vmem>>, vector<1x32x1xf32>
    %946 = vector.shape_cast %945 : vector<1x32x1xf32> to vector<32x1xf32>
    %947 = vector.shape_cast %944 : vector<32x1xf32> to vector<32x1xf32>
    %948 = vector.broadcast %947 : vector<32x1xf32> to vector<32x128xf32>
    %949 = vector.shape_cast %946 : vector<32x1xf32> to vector<32x1xf32>
    %950 = vector.broadcast %949 : vector<32x1xf32> to vector<32x128xf32>
    %951 = arith.mulf %948, %934 : vector<32x128xf32>
    %952 = arith.mulf %950, %942 : vector<32x128xf32>
    %953 = arith.subf %951, %952 : vector<32x128xf32>
    %954 = arith.mulf %948, %942 : vector<32x128xf32>
    %955 = arith.mulf %950, %934 : vector<32x128xf32>
    %956 = arith.addf %954, %955 : vector<32x128xf32>
    %957 = arith.mulf %953, %138 : vector<32x128xf32>
    %958 = arith.mulf %956, %220 : vector<32x128xf32>
    %959 = vector.extract_strided_slice %957 {offsets = [0, 0], sizes = [16, 128], strides = [1, 1]} : vector<32x128xf32> to vector<16x128xf32>
    %960 = vector.extract_strided_slice %957 {offsets = [16, 0], sizes = [16, 128], strides = [1, 1]} : vector<32x128xf32> to vector<16x128xf32>
    %961 = arith.mulf %959, %960 : vector<16x128xf32>
    %962 = vector.extract_strided_slice %958 {offsets = [0, 0], sizes = [16, 128], strides = [1, 1]} : vector<32x128xf32> to vector<16x128xf32>
    %963 = vector.extract_strided_slice %958 {offsets = [16, 0], sizes = [16, 128], strides = [1, 1]} : vector<32x128xf32> to vector<16x128xf32>
    %964 = arith.mulf %962, %963 : vector<16x128xf32>
    %965 = arith.addf %961, %964 : vector<16x128xf32>
    %cst_367 = arith.constant 1.000000e+00 : f32
    %966 = vector.broadcast %cst_367 : f32 to vector<1x128xf32>
    %cst_368 = arith.constant dense<0.000000e+00> : vector<1x16xf32>
    %967 = tpu.matmul %966, %965, %cst_368 {dimension_numbers = #tpu.dot_dimension_numbers<[1], [1], [0], [0], [0, 0, 1, 0], [], []>} : vector<1x128xf32>, vector<16x128xf32>, vector<1x16xf32> -> vector<1x16xf32>
    %c0_369 = arith.constant 0 : index
    %c0_370 = arith.constant 0 : index
    %c0_371 = arith.constant 0 : index
    %968 = vector.load %arg2[%c0_369, %c0_370, %c0_371] : memref<1x1x16xf32, #tpu.memory_space<vmem>>, vector<1x1x16xf32>
    %969 = vector.shape_cast %968 : vector<1x1x16xf32> to vector<1x16xf32>
    %970 = vector.shape_cast %967 : vector<1x16xf32> to vector<1x1x16xf32>
    tpu.vector_store %arg2[%c0_369, %c0_370, %c0_371], %970 {strides = array<i32>} : memref<1x1x16xf32, #tpu.memory_space<vmem>>, vector<1x1x16xf32>,
    return
  }
  func.func @transform_0(%arg0: i32) -> (i32, i32, i32) {
    %c0_i32 = arith.constant 0 : i32
    %c0_i32_0 = arith.constant 0 : i32
    %c0_i32_1 = arith.constant 0 : i32
    return %arg0, %c0_i32, %c0_i32_0 : i32, i32, i32
  }
  func.func @transform_1(%arg0: i32) -> (i32, i32, i32) {
    %c0_i32 = arith.constant 0 : i32
    %c0_i32_0 = arith.constant 0 : i32
    %c0_i32_1 = arith.constant 0 : i32
    return %arg0, %c0_i32, %c0_i32_0 : i32, i32, i32
  }
}

</mosaic_0001>

<bundles_post_ra>
// kernel: tpu_custom_call.1
= control target key start
LH: loop header
LB: loop body
LE: loop exit
PB: predicated region body
PF: predicated region fallthrough
CT: control target
= control target key end

     0   :  { %6 = vsyncpa [#allocation3], 0  ;;  %s5740_s0 = inlined_call_operand.hbm [shape: f32[1,32,64], index: 0, kind: input, shape index: {}]   ;;  %s5741_s1 = inlined_call_operand.hbm [shape: f32[1,1,16], index: 1, kind: output, shape index: {}]  }
   0x1   :  { %7 = vsyncpa [#allocation4], 0  ;;  %s3389_s6 = smov [#allocation2]  }
   0x2   :  { %s13_s7 = sshll.u32 %s3389_s6, 4  ;;  %s14_s7 = int_to_ptr.vmem [resolvable:$true] %s13_s7 }
   0x3   :  { %s3353_s8 = scalar_lea.vmem %s14_s7, 512  ;;  %p3358_p1 = scmp.lt.s32.totalorder %s14_s7, %s14_s7 }
   0x4   :  { %p3354_p0 = scmp.ne.s32.totalorder %s14_s7, %s3353_s8  ;;  %p3359_p2 = scmp.lt.s32.totalorder %s3353_s8, %s3353_s8 }
   0x6   :  { %p3360_p3 = por %p3359_p2, %p3358_p1 }
   0x8   :  { %p3361_p4 = pnand %p3360_p3, %p3354_p0 }
   0xa   :  { %3364 = shalt.err (!%p3361_p4)
}
   0xb   :  { %s3390_s9 = smov 128   ;;  %s3391_s10 = smov 8  }
   0xc   :  { %19 = dma.hbm_to_vmem [thread:$0]  %s5740_s0, 512, %s14_s7, [#allocation3], %s3390_s9, %s3390_s9, %s3391_s10  }
   0xd   :  { %3385 = dma.done.wait [#allocation3], 512  }
   0xe   :  { %3386 = vsyncadd [#allocation3], 4294966784  ;;  %v3392_v0 = vmov 0.0625   ;;  %s3393_s13 = smov 127   ;;  %v3394_v1 = vmov 32   ;;  %v3395_v2 = vmov 0   ;;  %v23_v13 = vlaneseq }
   0xf   :  { %149 = vrot.lane.b32.xlu0 %v3392_v0, %s3393_s13  ;;  %3139 = vset.pattern.permute.xlu1 %v3394_v1  ;;  %v3488_v3 = vld [vmem:[#allocation2 + $0x8] sm:$0xff]  ;;  %v3492_v4 = vld [vmem:[#allocation2 + $0x18] sm:$0xff]  ;;  %v3496_v5 = vld [vmem:[#allocation2 + $0x10] sm:$0xff]  ;;  %v3396_v7 = vmov 4   ;;  %s3397_s0 = smov 1   ;;  %v3398_v8 = vmov 36  }
  0x10   :  { %3138 = vset.pattern.permute.xlu0 %v3395_v2  ;;  %138 = vperm.xlu1 %3139, %v3488_v3   ;;  %v3498_v6 = vld [vmem:[#allocation2] sm:$0xff]  ;;  %v3399_v9 = vmov 8   ;;  %v3513_v15 = vand.u32 127, %v23_v13  ;;  %s3400_s14 = smov 126   ;;  %s3401_s15 = smov 2   ;;  %v3402_v38 = vmov 40  }
  0x11   :  { %v3403_v39 = vmov 12   ;;  %s3404_s16 = smov 124   ;;  %s3405_s17 = smov 4   ;;  %v3459_v20 = vmov 43   ;;  %vm3471_vm9 = vmmov 0   ;;  %vm3027_vm10 = vcmask 122880  }
  0x12   :  { %v25_v17 = vand.u32 1, %v3513_v15  ;;  %v29_v48 = vshra.s32 %v3513_v15, 1  ;;  %s3408_s18 = smov 120   ;;  %s3411_s19 = smov 112  }
  0x13   :  { %120 = vperm.xlu0 %3138, %v3488_v3   ;;  %s3412_s20 = smov 16   ;;  %s3415_s21 = smov 96  }
  0x14   :  { %146 = vperm.xlu1 %3139, %v3492_v4   ;;  %vm3518_vm0 = vcmp.eq.s32.totalorder %v25_v17, 1  ;;  %v3543_v49 = vand.u32 1, %v29_v48  ;;  %s3416_s22 = smov 32   ;;  %s3420_s23 = smov 64  }
  0x15   :  { %s3472_s24 = smov [#allocation5]  }
  0x16   :  { %vm31_vm1 = vcmp.eq.s32.totalorder %v3543_v49, 1  ;;  %s3035_s25 = sshll.u32 %s3472_s24, 4  ;;  %s3036_s25 = int_to_ptr.vmem [resolvable:$true] %s3035_s25 }
  0x17   :  { %130 = vperm.xlu0 %3138, %v3492_v4   ;;  %s3365_s26 = scalar_lea.vmem %s3036_s25, 16  ;;  %s3369_s27 = scalar_lea.vmem %s3036_s25, 32 }
  0x18   :  { %3140 = vset.pattern.permute.xlu1 %v3395_v2  ;;  %p3366_p5 = scmp.ne.s32.totalorder %s3036_s25, %s3365_s26  ;;  %p3370_p6 = scmp.lt.s32.totalorder %s3036_s25, %s3036_s25 }
  0x19   :  { %115 = vperm.xlu1 %3140, %v3498_v6   ;;  %p3371_p7 = scmp.lt.s32.totalorder %s3369_s27, %s3365_s26 }
  0x1b   :  { %125 = vperm.xlu0 %3138, %v3496_v5   ;;  %p3372_p8 = por %p3371_p7, %p3370_p6 }
  0x1d   :  { %3141 = vset.pattern.permute.xlu1 %v3394_v1  ;;  %p3373_p9 = pnand %p3372_p8, %p3366_p5 }
  0x1e   :  { %134 = vperm.xlu1 %3141, %v3498_v6  }
  0x1f   :  { %3142 = vset.pattern.permute.xlu0 %v3394_v1 }
  0x20   :  { %142 = vperm.xlu0 %3142, %v3496_v5  }
  0x22   :  { %151 = vrot.lane.b32.xlu1 %v3392_v0, %s3397_s0 }
  0x23   :  { %3143 = vset.pattern.permute.xlu1 %v3396_v7 }
  0x24   :  { %3144 = vset.pattern.permute.xlu0 %v3396_v7 }
  0x25   :  { %180 = vperm.xlu0 %3144, %v3492_v4  }
  0x26   :  { %172 = vperm.xlu1 %3143, %v3488_v3  }
  0x29   :  { %168 = vperm.xlu0 %3144, %v3498_v6  }
  0x2a   :  { %3145 = vset.pattern.permute.xlu1 %v3398_v8 }
  0x2b   :  { %188 = vperm.xlu1 %3145, %v3488_v3  }
  0x2d   :  { %3147 = vset.pattern.permute.xlu0 %v3398_v8 }
  0x2e   :  { %184 = vperm.xlu0 %3147, %v3498_v6  }
  0x2f   :  { %196 = vperm.xlu1 %3145, %v3492_v4  }
  0x32   :  { %3150 = vset.pattern.permute.xlu0 %v3399_v9 }
  0x33   :  { %3146 = vset.pattern.permute.xlu1 %v3396_v7 }
  0x34   :  { %176 = vperm.xlu1 %3146, %v3496_v5  }
  0x38   :  { %3148 = vset.pattern.permute.xlu1 %v3398_v8 }
  0x39   :  { %192 = vperm.xlu1 %3148, %v3496_v5  }
  0x3d   :  { %3149 = vset.pattern.permute.xlu1 %v3399_v9 }
  0x81   :  { %v150_v11 = vpop.permute.xlu0 %149 }
  0x82   :  { %v153_v21 = vsub.f32 0.0, %v150_v11 }
  0x8b   :  { %v139_v10 = vpop.permute.xlu1 %138 }
  0x8e   :  { %v121_v14 = vpop.permute.xlu0 %120 }
  0x8f   :  { %v147_v12 = vpop.permute.xlu1 %146  ;;  %v156_v25 = vmul.f32 0.0625, %v121_v14 }
  0x92   :  { %v131_v18 = vpop.permute.xlu0 %130 }
  0x93   :  { %v158_v26 = vmul.f32 0.0625, %v131_v18 }
  0x94   :  { %v116_v16 = vpop.permute.xlu1 %115 }
  0x95   :  { %v155_v34 = vmul.f32 0.0625, %v116_v16 }
  0x96   :  { %v126_v23 = vpop.permute.xlu0 %125 }
  0x97   :  { %v157_v35 = vmul.f32 0.0625, %v126_v23 }
  0x99   :  { %v135_v19 = vpop.permute.xlu1 %134 }
  0x9b   :  { %v143_v31 = vpop.permute.xlu0 %142 }
  0x9d   :  { %v152_v22 = vpop.permute.xlu1 %151 }
  0x9e   :  { %v154_v24 = vsel %vm3518_vm0, %v152_v22, %v153_v21  ;;  %v3406_v21 = vmov 44   ;;  %v3407_v22 = vmov 16  }
  0x9f   :  { %v160_v27 = vmul.f32 %v154_v24, %v139_v10  ;;  %v162_v28 = vmul.f32 %v154_v24, %v147_v12  ;;  %v159_v32 = vmul.f32 %v154_v24, %v135_v19  ;;  %v161_v33 = vmul.f32 %v154_v24, %v143_v31 }
  0xa0   :  { %v181_v42 = vpop.permute.xlu0 %180  ;;  %v34_v31 = vshra.s32 %v3513_v15, 2 }
  0xa1   :  { %v166_v29 = vadd.f32 %v162_v28, %v158_v26  ;;  %v164_v30 = vadd.f32 %v160_v27, %v156_v25  ;;  %v163_v36 = vadd.f32 %v159_v32, %v155_v34  ;;  %v165_v37 = vadd.f32 %v161_v33, %v157_v35  ;;  %v173_v40 = vpop.permute.xlu1 %172 }
  0xa2   :  { %v3572_v32 = vand.u32 1, %v34_v31 }
  0xa3   :  { %205 = vrot.lane.b32.xlu1 %v166_v29, %s3400_s14  ;;  %201 = vrot.lane.b32.xlu0 %v164_v30, %s3400_s14  ;;  %v226_v58 = vmul.f32 %v181_v42, %v166_v29  ;;  %v224_v59 = vmul.f32 %v173_v40, %v164_v30 }
  0xa4   :  { %v169_v44 = vpop.permute.xlu0 %168  ;;  %vm36_vm2 = vcmp.eq.s32.totalorder %v3572_v32, 1 }
  0xa5   :  { %v223_v10 = vmul.f32 %v169_v44, %v163_v36 }
  0xa6   :  { %v189_v41 = vpop.permute.xlu1 %188 }
  0xa7   :  { %209 = vrot.lane.b32.xlu1 %v164_v30, %s3401_s15  ;;  %213 = vrot.lane.b32.xlu0 %v166_v29, %s3401_s15 }
  0xa9   :  { %v185_v46 = vpop.permute.xlu0 %184 }
  0xaa   :  { %v197_v43 = vpop.permute.xlu1 %196 }
  0xab   :  { %203 = vrot.lane.b32.xlu0 %v165_v37, %s3400_s14  ;;  %199 = vrot.lane.b32.xlu1 %v163_v36, %s3400_s14 }
  0xaf   :  { %211 = vrot.lane.b32.xlu0 %v165_v37, %s3401_s15  ;;  %207 = vrot.lane.b32.xlu1 %v163_v36, %s3401_s15  ;;  %v177_v45 = vpop.permute.xlu1 %176 }
  0xb0   :  { %v225_v13 = vmul.f32 %v177_v45, %v165_v37 }
  0xb3   :  { %248 = vperm.xlu0 %3150, %v3492_v4   ;;  %240 = vperm.xlu1 %3149, %v3488_v3  }
  0xb4   :  { %v193_v47 = vpop.permute.xlu1 %192 }
  0xb7   :  { %236 = vperm.xlu0 %3150, %v3498_v6   ;;  %3151 = vset.pattern.permute.xlu1 %v3402_v38 }
  0xb8   :  { %256 = vperm.xlu1 %3151, %v3488_v3  }
  0xbb   :  { %3153 = vset.pattern.permute.xlu0 %v3402_v38 }
  0xbc   :  { %264 = vperm.xlu1 %3151, %v3492_v4   ;;  %252 = vperm.xlu0 %3153, %v3498_v6  }
  0xc0   :  { %3152 = vset.pattern.permute.xlu1 %v3399_v9  ;;  %3156 = vset.pattern.permute.xlu0 %v3403_v39 }
  0xc1   :  { %244 = vperm.xlu1 %3152, %v3496_v5  }
  0xc5   :  { %3154 = vset.pattern.permute.xlu1 %v3402_v38 }
  0xc6   :  { %260 = vperm.xlu1 %3154, %v3496_v5  }
  0xca   :  { %3155 = vset.pattern.permute.xlu1 %v3403_v39 }
 0x115   :  { %v202_v50 = vpop.permute.xlu0 %201  ;;  %v206_v51 = vpop.permute.xlu1 %205 }
 0x116   :  { %v216_v52 = vsub.f32 0.0, %v202_v50  ;;  %v218_v53 = vsub.f32 0.0, %v206_v51 }
 0x119   :  { %v214_v54 = vpop.permute.xlu0 %213  ;;  %v210_v55 = vpop.permute.xlu1 %209 }
 0x11a   :  { %v222_v56 = vsel %vm31_vm1, %v214_v54, %v218_v53  ;;  %v220_v57 = vsel %vm31_vm1, %v210_v55, %v216_v52 }
 0x11b   :  { %v230_v60 = vmul.f32 %v222_v56, %v197_v43  ;;  %v228_v61 = vmul.f32 %v220_v57, %v189_v41 }
 0x11d   :  { %v204_v62 = vpop.permute.xlu0 %203  ;;  %v200_v63 = vpop.permute.xlu1 %199  ;;  %v234_v0 = vadd.f32 %v230_v60, %v226_v58  ;;  %v232_v1 = vadd.f32 %v228_v61, %v224_v59 }
 0x11e   :  { %v217_v2 = vsub.f32 0.0, %v204_v62  ;;  %v215_v7 = vsub.f32 0.0, %v200_v63  ;;  %v3409_v62 = vmov 48   ;;  %v3410_v63 = vmov 20  }
 0x11f   :  { %273 = vrot.lane.b32.xlu1 %v234_v0, %s3404_s16  ;;  %269 = vrot.lane.b32.xlu0 %v232_v1, %s3404_s16 }
 0x121   :  { %v212_v8 = vpop.permute.xlu0 %211  ;;  %v208_v9 = vpop.permute.xlu1 %207 }
 0x122   :  { %v221_v11 = vsel %vm31_vm1, %v212_v8, %v217_v2  ;;  %v219_v12 = vsel %vm31_vm1, %v208_v9, %v215_v7 }
 0x123   :  { %v229_v14 = vmul.f32 %v221_v11, %v193_v47  ;;  %v227_v16 = vmul.f32 %v219_v12, %v185_v46  ;;  %277 = vrot.lane.b32.xlu1 %v232_v1, %s3405_s17  ;;  %281 = vrot.lane.b32.xlu0 %v234_v0, %s3405_s17  ;;  %v39_v12 = vshra.s32 %v3513_v15, 3 }
 0x125   :  { %v233_v18 = vadd.f32 %v229_v14, %v225_v13  ;;  %v231_v19 = vadd.f32 %v227_v16, %v223_v10  ;;  %v3602_v13 = vand.u32 1, %v39_v12 }
 0x127   :  { %271 = vrot.lane.b32.xlu0 %v233_v18, %s3404_s16  ;;  %267 = vrot.lane.b32.xlu1 %v231_v19, %s3404_s16  ;;  %vm41_vm3 = vcmp.eq.s32.totalorder %v3602_v13, 1 }
 0x12b   :  { %279 = vrot.lane.b32.xlu0 %v233_v18, %s3405_s17  ;;  %275 = vrot.lane.b32.xlu1 %v231_v19, %s3405_s17 }
 0x12e   :  { %v241_v23 = vpop.permute.xlu1 %240  ;;  %v249_v25 = vpop.permute.xlu0 %248 }
 0x12f   :  { %316 = vperm.xlu0 %3156, %v3492_v4   ;;  %308 = vperm.xlu1 %3155, %v3488_v3   ;;  %v294_v41 = vmul.f32 %v249_v25, %v234_v0  ;;  %v292_v42 = vmul.f32 %v241_v23, %v232_v1 }
 0x132   :  { %v237_v27 = vpop.permute.xlu0 %236 }
 0x133   :  { %304 = vperm.xlu0 %3156, %v3498_v6   ;;  %3157 = vset.pattern.permute.xlu1 %v3406_v21  ;;  %v257_v24 = vpop.permute.xlu1 %256  ;;  %v291_v54 = vmul.f32 %v237_v27, %v231_v19 }
 0x134   :  { %324 = vperm.xlu1 %3157, %v3488_v3  }
 0x137   :  { %3159 = vset.pattern.permute.xlu0 %v3406_v21  ;;  %v265_v26 = vpop.permute.xlu1 %264  ;;  %v253_v29 = vpop.permute.xlu0 %252 }
 0x138   :  { %332 = vperm.xlu1 %3157, %v3492_v4   ;;  %320 = vperm.xlu0 %3159, %v3498_v6  }
 0x13c   :  { %3158 = vset.pattern.permute.xlu1 %v3403_v39  ;;  %3162 = vset.pattern.permute.xlu0 %v3407_v22  ;;  %v245_v28 = vpop.permute.xlu1 %244 }
 0x13d   :  { %312 = vperm.xlu1 %3158, %v3496_v5   ;;  %v293_v57 = vmul.f32 %v245_v28, %v233_v18 }
 0x141   :  { %3160 = vset.pattern.permute.xlu1 %v3406_v21  ;;  %v261_v30 = vpop.permute.xlu1 %260 }
 0x142   :  { %328 = vperm.xlu1 %3160, %v3496_v5  }
 0x146   :  { %3161 = vset.pattern.permute.xlu1 %v3407_v22 }
 0x191   :  { %v270_v33 = vpop.permute.xlu0 %269  ;;  %v274_v34 = vpop.permute.xlu1 %273 }
 0x192   :  { %v284_v35 = vsub.f32 0.0, %v270_v33  ;;  %v286_v36 = vsub.f32 0.0, %v274_v34 }
 0x195   :  { %v282_v37 = vpop.permute.xlu0 %281  ;;  %v278_v38 = vpop.permute.xlu1 %277 }
 0x196   :  { %v290_v39 = vsel %vm36_vm2, %v282_v37, %v286_v36  ;;  %v288_v40 = vsel %vm36_vm2, %v278_v38, %v284_v35 }
 0x197   :  { %v298_v43 = vmul.f32 %v290_v39, %v265_v26  ;;  %v296_v44 = vmul.f32 %v288_v40, %v257_v24 }
 0x199   :  { %v272_v45 = vpop.permute.xlu0 %271  ;;  %v268_v46 = vpop.permute.xlu1 %267  ;;  %v302_v47 = vadd.f32 %v298_v43, %v294_v41  ;;  %v300_v48 = vadd.f32 %v296_v44, %v292_v42 }
 0x19a   :  { %v285_v50 = vsub.f32 0.0, %v272_v45  ;;  %v283_v51 = vsub.f32 0.0, %v268_v46  ;;  %v3413_v46 = vmov 52  }
 0x19b   :  { %341 = vrot.lane.b32.xlu1 %v302_v47, %s3408_s18  ;;  %337 = vrot.lane.b32.xlu0 %v300_v48, %s3408_s18 }
 0x19d   :  { %v280_v52 = vpop.permute.xlu0 %279  ;;  %v276_v53 = vpop.permute.xlu1 %275 }
 0x19e   :  { %v289_v55 = vsel %vm36_vm2, %v280_v52, %v285_v50  ;;  %v287_v56 = vsel %vm36_vm2, %v276_v53, %v283_v51 }
 0x19f   :  { %v297_v58 = vmul.f32 %v289_v55, %v261_v30  ;;  %v295_v59 = vmul.f32 %v287_v56, %v253_v29  ;;  %345 = vrot.lane.b32.xlu1 %v300_v48, %s3391_s10  ;;  %349 = vrot.lane.b32.xlu0 %v302_v47, %s3391_s10 }
 0x1a1   :  { %v301_v60 = vadd.f32 %v297_v58, %v293_v57  ;;  %v299_v61 = vadd.f32 %v295_v59, %v291_v54  ;;  %v44_v57 = vshra.s32 %v3513_v15, 4 }
 0x1a3   :  { %339 = vrot.lane.b32.xlu0 %v301_v60, %s3408_s18  ;;  %335 = vrot.lane.b32.xlu1 %v299_v61, %s3408_s18  ;;  %v3633_v58 = vand.u32 1, %v44_v57 }
 0x1a5   :  { %vm46_vm4 = vcmp.eq.s32.totalorder %v3633_v58, 1 }
 0x1a7   :  { %347 = vrot.lane.b32.xlu0 %v301_v60, %s3391_s10  ;;  %343 = vrot.lane.b32.xlu1 %v299_v61, %s3391_s10 }
 0x1aa   :  { %v309_v0 = vpop.permute.xlu1 %308  ;;  %v317_v2 = vpop.permute.xlu0 %316 }
 0x1ab   :  { %384 = vperm.xlu0 %3162, %v3492_v4   ;;  %376 = vperm.xlu1 %3161, %v3488_v3   ;;  %v362_v25 = vmul.f32 %v317_v2, %v302_v47  ;;  %v360_v26 = vmul.f32 %v309_v0, %v300_v48  ;;  %v3414_v47 = vmov 24  }
 0x1ae   :  { %v305_v8 = vpop.permute.xlu0 %304 }
 0x1af   :  { %372 = vperm.xlu0 %3162, %v3498_v6   ;;  %3163 = vset.pattern.permute.xlu1 %v3409_v62  ;;  %v325_v1 = vpop.permute.xlu1 %324  ;;  %v359_v38 = vmul.f32 %v305_v8, %v299_v61 }
 0x1b0   :  { %392 = vperm.xlu1 %3163, %v3488_v3  }
 0x1b3   :  { %3165 = vset.pattern.permute.xlu0 %v3409_v62  ;;  %v333_v7 = vpop.permute.xlu1 %332  ;;  %v321_v10 = vpop.permute.xlu0 %320 }
 0x1b4   :  { %400 = vperm.xlu1 %3163, %v3492_v4   ;;  %388 = vperm.xlu0 %3165, %v3498_v6  }
 0x1b8   :  { %3164 = vset.pattern.permute.xlu1 %v3407_v22  ;;  %3168 = vset.pattern.permute.xlu0 %v3410_v63  ;;  %v313_v9 = vpop.permute.xlu1 %312 }
 0x1b9   :  { %380 = vperm.xlu1 %3164, %v3496_v5   ;;  %v361_v41 = vmul.f32 %v313_v9, %v301_v60 }
 0x1bd   :  { %3166 = vset.pattern.permute.xlu1 %v3409_v62  ;;  %v329_v11 = vpop.permute.xlu1 %328 }
 0x1be   :  { %396 = vperm.xlu1 %3166, %v3496_v5  }
 0x1c2   :  { %3167 = vset.pattern.permute.xlu1 %v3410_v63 }
 0x20d   :  { %v338_v14 = vpop.permute.xlu0 %337  ;;  %v342_v16 = vpop.permute.xlu1 %341 }
 0x20e   :  { %v352_v18 = vsub.f32 0.0, %v338_v14  ;;  %v354_v19 = vsub.f32 0.0, %v342_v16 }
 0x211   :  { %v350_v21 = vpop.permute.xlu0 %349  ;;  %v346_v22 = vpop.permute.xlu1 %345 }
 0x212   :  { %v358_v23 = vsel %vm41_vm3, %v350_v21, %v354_v19  ;;  %v356_v24 = vsel %vm41_vm3, %v346_v22, %v352_v18 }
 0x213   :  { %v366_v27 = vmul.f32 %v358_v23, %v333_v7  ;;  %v364_v28 = vmul.f32 %v356_v24, %v325_v1 }
 0x215   :  { %v340_v29 = vpop.permute.xlu0 %339  ;;  %v336_v30 = vpop.permute.xlu1 %335  ;;  %v370_v31 = vadd.f32 %v366_v27, %v362_v25  ;;  %v368_v33 = vadd.f32 %v364_v28, %v360_v26 }
 0x216   :  { %v353_v34 = vsub.f32 0.0, %v340_v29  ;;  %v351_v35 = vsub.f32 0.0, %v336_v30 }
 0x217   :  { %409 = vrot.lane.b32.xlu1 %v370_v31, %s3411_s19  ;;  %405 = vrot.lane.b32.xlu0 %v368_v33, %s3411_s19 }
 0x219   :  { %v348_v36 = vpop.permute.xlu0 %347  ;;  %v344_v37 = vpop.permute.xlu1 %343 }
 0x21a   :  { %v357_v39 = vsel %vm41_vm3, %v348_v36, %v353_v34  ;;  %v355_v40 = vsel %vm41_vm3, %v344_v37, %v351_v35  ;;  %v3419_v34 = vmov 60  }
 0x21b   :  { %v365_v42 = vmul.f32 %v357_v39, %v329_v11  ;;  %v363_v43 = vmul.f32 %v355_v40, %v321_v10  ;;  %413 = vrot.lane.b32.xlu1 %v368_v33, %s3412_s20  ;;  %417 = vrot.lane.b32.xlu0 %v370_v31, %s3412_s20 }
 0x21d   :  { %v369_v44 = vadd.f32 %v365_v42, %v361_v41  ;;  %v367_v45 = vadd.f32 %v363_v43, %v359_v38  ;;  %v49_v43 = vshra.s32 %v3513_v15, 5 }
 0x21f   :  { %407 = vrot.lane.b32.xlu0 %v369_v44, %s3411_s19  ;;  %403 = vrot.lane.b32.xlu1 %v367_v45, %s3411_s19 }
 0x223   :  { %415 = vrot.lane.b32.xlu0 %v369_v44, %s3412_s20  ;;  %411 = vrot.lane.b32.xlu1 %v367_v45, %s3412_s20 }
 0x226   :  { %v377_v48 = vpop.permute.xlu1 %376  ;;  %v385_v51 = vpop.permute.xlu0 %384 }
 0x227   :  { %452 = vperm.xlu0 %3168, %v3492_v4   ;;  %444 = vperm.xlu1 %3167, %v3488_v3   ;;  %v430_v7 = vmul.f32 %v385_v51, %v370_v31  ;;  %v428_v8 = vmul.f32 %v377_v48, %v368_v33  ;;  %v3417_v31 = vmov 56   ;;  %v3418_v33 = vmov 28  }
 0x22a   :  { %v373_v53 = vpop.permute.xlu0 %372 }
 0x22b   :  { %440 = vperm.xlu0 %3168, %v3498_v6   ;;  %3169 = vset.pattern.permute.xlu1 %v3413_v46  ;;  %v393_v50 = vpop.permute.xlu1 %392  ;;  %v427_v23 = vmul.f32 %v373_v53, %v367_v45 }
 0x22c   :  { %460 = vperm.xlu1 %3169, %v3488_v3  }
 0x22f   :  { %3171 = vset.pattern.permute.xlu0 %v3413_v46  ;;  %v401_v52 = vpop.permute.xlu1 %400  ;;  %v389_v55 = vpop.permute.xlu0 %388 }
 0x230   :  { %468 = vperm.xlu1 %3169, %v3492_v4   ;;  %456 = vperm.xlu0 %3171, %v3498_v6  }
 0x234   :  { %3170 = vset.pattern.permute.xlu1 %v3410_v63  ;;  %3174 = vset.pattern.permute.xlu0 %v3414_v47  ;;  %v381_v54 = vpop.permute.xlu1 %380 }
 0x235   :  { %448 = vperm.xlu1 %3170, %v3496_v5   ;;  %v429_v26 = vmul.f32 %v381_v54, %v369_v44  ;;  %v3684_v44 = vand.u32 1, %v49_v43 }
 0x237   :  { %vm51_vm5 = vcmp.eq.s32.totalorder %v3684_v44, 1 }
 0x239   :  { %3172 = vset.pattern.permute.xlu1 %v3413_v46  ;;  %v397_v56 = vpop.permute.xlu1 %396 }
 0x23a   :  { %464 = vperm.xlu1 %3172, %v3496_v5  }
 0x23e   :  { %3173 = vset.pattern.permute.xlu1 %v3414_v47 }
 0x289   :  { %v406_v59 = vpop.permute.xlu0 %405  ;;  %v410_v60 = vpop.permute.xlu1 %409 }
 0x28a   :  { %v420_v61 = vsub.f32 0.0, %v406_v59  ;;  %v422_v62 = vsub.f32 0.0, %v410_v60 }
 0x28d   :  { %v418_v63 = vpop.permute.xlu0 %417  ;;  %v414_v0 = vpop.permute.xlu1 %413 }
 0x28e   :  { %v426_v1 = vsel %vm46_vm4, %v418_v63, %v422_v62  ;;  %v424_v2 = vsel %vm46_vm4, %v414_v0, %v420_v61 }
 0x28f   :  { %v434_v9 = vmul.f32 %v426_v1, %v401_v52  ;;  %v432_v10 = vmul.f32 %v424_v2, %v393_v50 }
 0x291   :  { %v408_v11 = vpop.permute.xlu0 %407  ;;  %v404_v12 = vpop.permute.xlu1 %403  ;;  %v3640_v14 = vadd.f32 %v434_v9, %v430_v7  ;;  %v3642_v16 = vadd.f32 %v432_v10, %v428_v8 }
 0x292   :  { %v421_v18 = vsub.f32 0.0, %v408_v11  ;;  %v419_v19 = vsub.f32 0.0, %v404_v12 }
 0x293   :  { %477 = vrot.lane.b32.xlu1 %v3640_v14, %s3415_s21  ;;  %473 = vrot.lane.b32.xlu0 %v3642_v16, %s3415_s21 }
 0x295   :  { %v416_v21 = vpop.permute.xlu0 %415  ;;  %v412_v22 = vpop.permute.xlu1 %411 }
 0x296   :  { %v425_v24 = vsel %vm46_vm4, %v416_v21, %v421_v18  ;;  %v423_v25 = vsel %vm46_vm4, %v412_v22, %v419_v19  ;;  %v3421_v18 = vmov 1   ;;  %v3422_v19 = vmov 33  }
 0x297   :  { %v433_v27 = vmul.f32 %v425_v24, %v397_v56  ;;  %v431_v28 = vmul.f32 %v423_v25, %v389_v55  ;;  %481 = vrot.lane.b32.xlu1 %v3642_v16, %s3416_s22  ;;  %485 = vrot.lane.b32.xlu0 %v3640_v14, %s3416_s22  ;;  %v3423_v21 = vmov 5  }
 0x299   :  { %v3656_v29 = vadd.f32 %v433_v27, %v429_v26  ;;  %v3658_v30 = vadd.f32 %v431_v28, %v427_v23  ;;  %v54_v28 = vshra.s32 %v3513_v15, 6 }
 0x29b   :  { %475 = vrot.lane.b32.xlu0 %v3656_v29, %s3415_s21  ;;  %471 = vrot.lane.b32.xlu1 %v3658_v30, %s3415_s21 }
 0x29f   :  { %483 = vrot.lane.b32.xlu0 %v3656_v29, %s3416_s22  ;;  %479 = vrot.lane.b32.xlu1 %v3658_v30, %s3416_s22 }
 0x2a2   :  { %v445_v35 = vpop.permute.xlu1 %444  ;;  %v453_v37 = vpop.permute.xlu0 %452 }
 0x2a3   :  { %520 = vperm.xlu0 %3174, %v3492_v4   ;;  %512 = vperm.xlu1 %3173, %v3488_v3   ;;  %v498_v54 = vmul.f32 %v453_v37, %v3640_v14  ;;  %v496_v55 = vmul.f32 %v445_v35, %v3642_v16 }
 0x2a6   :  { %v441_v39 = vpop.permute.xlu0 %440 }
 0x2a7   :  { %508 = vperm.xlu0 %3174, %v3498_v6   ;;  %3175 = vset.pattern.permute.xlu1 %v3417_v31  ;;  %v461_v36 = vpop.permute.xlu1 %460  ;;  %v495_v9 = vmul.f32 %v441_v39, %v3658_v30  ;;  %v60_v30 = vmul.u32 %v3602_v13, %v3572_v32  ;;  %v3745_v39 = vand.u32 1, %v54_v28 }
 0x2a8   :  { %528 = vperm.xlu1 %3175, %v3488_v3  }
 0x2a9   :  { %vm56_vm6 = vcmp.eq.s32.totalorder %v3745_v39, 1 }
 0x2ab   :  { %3177 = vset.pattern.permute.xlu0 %v3417_v31  ;;  %v469_v38 = vpop.permute.xlu1 %468  ;;  %v457_v41 = vpop.permute.xlu0 %456 }
 0x2ac   :  { %536 = vperm.xlu1 %3175, %v3492_v4   ;;  %524 = vperm.xlu0 %3177, %v3498_v6  }
 0x2b0   :  { %3176 = vset.pattern.permute.xlu1 %v3414_v47  ;;  %3180 = vset.pattern.permute.xlu0 %v3418_v33  ;;  %v449_v40 = vpop.permute.xlu1 %448 }
 0x2b1   :  { %516 = vperm.xlu1 %3176, %v3496_v5   ;;  %580 = vperm.xlu0 %3180, %v3492_v4   ;;  %v497_v10 = vmul.f32 %v449_v40, %v3656_v29  ;;  %v59_v29 = vmul.u32 %v3543_v49, %v25_v17 }
 0x2b5   :  { %3178 = vset.pattern.permute.xlu1 %v3417_v31  ;;  %568 = vperm.xlu0 %3180, %v3498_v6   ;;  %v465_v42 = vpop.permute.xlu1 %464  ;;  %v64_v31 = vshra.s32 %v3513_v15, 7 }
 0x2b6   :  { %532 = vperm.xlu1 %3178, %v3496_v5  }
 0x2b7   :  { %v65_v43 = vand.u32 1, %v64_v31 }
 0x2b9   :  { %3183 = vset.pattern.permute.xlu0 %v3419_v34 }
 0x2ba   :  { %3179 = vset.pattern.permute.xlu1 %v3418_v33 }
 0x2bb   :  { %572 = vperm.xlu1 %3179, %v3488_v3  }
 0x2bf   :  { %3181 = vset.pattern.permute.xlu1 %v3419_v34 }
 0x2c0   :  { %588 = vperm.xlu1 %3181, %v3488_v3  }
 0x2c4   :  { %596 = vperm.xlu1 %3181, %v3492_v4  }
 0x2c8   :  { %3182 = vset.pattern.permute.xlu1 %v3418_v33 }
 0x2c9   :  { %576 = vperm.xlu1 %3182, %v3496_v5  }
 0x2cd   :  { %3184 = vset.pattern.permute.xlu1 %v3419_v34 }
 0x305   :  { %v474_v45 = vpop.permute.xlu0 %473  ;;  %v478_v46 = vpop.permute.xlu1 %477 }
 0x306   :  { %v488_v47 = vsub.f32 0.0, %v474_v45  ;;  %v490_v48 = vsub.f32 0.0, %v478_v46 }
 0x309   :  { %v486_v50 = vpop.permute.xlu0 %485  ;;  %v482_v51 = vpop.permute.xlu1 %481 }
 0x30a   :  { %v494_v52 = vsel %vm51_vm5, %v486_v50, %v490_v48  ;;  %v492_v53 = vsel %vm51_vm5, %v482_v51, %v488_v47 }
 0x30b   :  { %v502_v56 = vmul.f32 %v494_v52, %v469_v38  ;;  %v500_v57 = vmul.f32 %v492_v53, %v461_v36  ;;  %v66_v52 = vmul.u32 %v65_v43, %v3745_v39 }
 0x30d   :  { %v3693_v59 = vadd.f32 %v502_v56, %v498_v54  ;;  %v476_v60 = vpop.permute.xlu0 %475  ;;  %v472_v61 = vpop.permute.xlu1 %471  ;;  %v3695_v62 = vadd.f32 %v500_v57, %v496_v55 }
 0x30e   :  { %v489_v63 = vsub.f32 0.0, %v476_v60  ;;  %v487_v0 = vsub.f32 0.0, %v472_v61 }
 0x30f   :  { %545 = vrot.lane.b32.xlu1 %v3693_v59, %s3420_s23  ;;  %541 = vrot.lane.b32.xlu0 %v3695_v62, %s3420_s23 }
 0x311   :  { %v484_v1 = vpop.permute.xlu0 %483  ;;  %v480_v2 = vpop.permute.xlu1 %479 }
 0x312   :  { %v493_v7 = vsel %vm51_vm5, %v484_v1, %v489_v63  ;;  %v491_v8 = vsel %vm51_vm5, %v480_v2, %v487_v0  ;;  %v68_v63 = vmul.u32 %v3572_v32, %v3543_v49  ;;  %v5329_v49 = vld [vmem:[#allocation2 + $0x18] sm:$0xff]  ;;  %v3463_v32 = vmov 51  }
 0x313   :  { %v501_v11 = vmul.f32 %v493_v7, %v465_v42  ;;  %v499_v12 = vmul.f32 %v491_v8, %v457_v41  ;;  %v61_v41 = vadd.s32 %v60_v30, %v59_v29  ;;  %v62_v42 = vmul.u32 %v3684_v44, %v3633_v58 }
 0x314   :  { %v70_v7 = vmul.u32 %v3633_v58, %v3602_v13  ;;  %v3465_v13 = vmov 55   ;;  %v3467_v58 = vmov 59  }
 0x315   :  { %v3707_v14 = vadd.f32 %v501_v11, %v497_v10  ;;  %v3709_v16 = vadd.f32 %v499_v12, %v495_v9  ;;  %v63_v51 = vadd.s32 %v62_v42, %v61_v41 }
 0x317   :  { %543 = vrot.lane.b32.xlu1 %v3707_v14, %s3420_s23  ;;  %539 = vrot.lane.b32.xlu0 %v3709_v16, %s3420_s23  ;;  %v67_v61 = vadd.s32 %v66_v52, %v63_v51 }
 0x319   :  { %v69_v2 = vadd.s32 %v68_v63, %v67_v61 }
 0x31b   :  { %592 = vperm.xlu1 %3184, %v3496_v5   ;;  %584 = vperm.xlu0 %3183, %v3498_v6   ;;  %v71_v12 = vadd.s32 %v70_v7, %v69_v2 }
 0x31e   :  { %v3727_v22 = vpop.permute.xlu1 %512  ;;  %v521_v34 = vpop.permute.xlu0 %520 }
 0x31f   :  { %3185 = vset.pattern.permute.xlu1 %v3421_v18  ;;  %3186 = vset.pattern.permute.xlu0 %v3421_v18  ;;  %v556_v41 = vmul.f32 %v3727_v22, %v3695_v62 }
 0x320   :  { %628 = vperm.xlu1 %3185, %v3488_v3   ;;  %636 = vperm.xlu0 %3186, %v3492_v4  }
 0x322   :  { %v3749_v50 = vpop.permute.xlu0 %508 }
 0x323   :  { %v3729_v23 = vpop.permute.xlu1 %528 }
 0x324   :  { %3187 = vset.pattern.permute.xlu1 %v3422_v19  ;;  %624 = vperm.xlu0 %3186, %v3498_v6  }
 0x325   :  { %644 = vperm.xlu1 %3187, %v3488_v3  }
 0x327   :  { %v3731_v3 = vpop.permute.xlu1 %536  ;;  %v525_v60 = vpop.permute.xlu0 %524 }
 0x328   :  { %3189 = vset.pattern.permute.xlu0 %v3422_v19 }
 0x329   :  { %652 = vperm.xlu1 %3187, %v3492_v4   ;;  %640 = vperm.xlu0 %3189, %v3498_v6   ;;  %v77_v4 = vadd.s32 128, %v3513_v15 }
 0x32b   :  { %v79_v24 = vshra.s32 %v77_v4, 1  ;;  %v82_v25 = vshra.s32 %v77_v4, 2  ;;  %v84_v26 = vshra.s32 %v77_v4, 3  ;;  %v88_v37 = vshra.s32 %v77_v4, 4 }
 0x32c   :  { %v3734_v6 = vpop.permute.xlu1 %516  ;;  %v90_v38 = vshra.s32 %v77_v4, 5  ;;  %v94_v40 = vshra.s32 %v77_v4, 6  ;;  %v96_v15 = vshra.s32 %v77_v4, 7  ;;  %v581_v9 = vpop.permute.xlu0 %580 }
 0x32d   :  { %3188 = vset.pattern.permute.xlu1 %v3421_v18  ;;  %3192 = vset.pattern.permute.xlu0 %v3423_v21  ;;  %v80_v33 = vand.u32 1, %v79_v24  ;;  %v83_v35 = vand.u32 1, %v82_v25  ;;  %v85_v36 = vand.u32 1, %v84_v26  ;;  %v89_v47 = vand.u32 1, %v88_v37 }
 0x32e   :  { %632 = vperm.xlu1 %3188, %v3496_v5   ;;  %v91_v48 = vand.u32 1, %v90_v38  ;;  %v95_v55 = vand.u32 1, %v94_v40  ;;  %v97_v56 = vand.u32 1, %v96_v15  ;;  %v72_v18 = vmul.u32 %v3745_v39, %v3684_v44 }
 0x32f   :  { %v86_v46 = vmul.u32 %v85_v36, %v83_v35  ;;  %v100_v11 = vmul.u32 %v83_v35, %v80_v33  ;;  %v557_v7 = vmul.f32 %v3734_v6, %v3707_v14 }
 0x330   :  { %v92_v54 = vmul.u32 %v91_v48, %v89_v47  ;;  %v98_v1 = vmul.u32 %v97_v56, %v95_v55  ;;  %v569_v25 = vpop.permute.xlu0 %568  ;;  %v73_v26 = vadd.s32 %v72_v18, %v71_v12 }
 0x331   :  { %v3736_v27 = vpop.permute.xlu1 %532  ;;  %v102_v24 = vmul.u32 %v89_v47, %v85_v36  ;;  %v558_v36 = vmul.f32 %v521_v34, %v3693_v59  ;;  %v3424_v59 = vmov 1.0  }
 0x332   :  { %3190 = vset.pattern.permute.xlu1 %v3422_v19  ;;  %v74_v38 = vand.u32 1, %v73_v26 }
 0x333   :  { %648 = vperm.xlu1 %3190, %v3496_v5   ;;  %v78_v5 = vand.u32 1, %v77_v4 }
 0x334   :  { %vm75_vm7 = vcmp.eq.s32.totalorder %v74_v38, 1  ;;  %v3426_v38 = vmov 9  }
 0x335   :  { %v81_v17 = vmul.u32 %v80_v33, %v78_v5  ;;  %v104_v5 = vmul.u32 %v95_v55, %v91_v48  ;;  %v3769_v34 = vsel %vm75_vm7, -1.0, %v3424_v59 }
 0x336   :  { %v573_v45 = vpop.permute.xlu1 %572 }
 0x337   :  { %3191 = vset.pattern.permute.xlu1 %v3423_v21  ;;  %v87_v53 = vadd.s32 %v86_v46, %v81_v17 }
 0x339   :  { %v93_v0 = vadd.s32 %v92_v54, %v87_v53 }
 0x33b   :  { %v589_v57 = vpop.permute.xlu1 %588  ;;  %v99_v10 = vadd.s32 %v98_v1, %v93_v0 }
 0x33d   :  { %v101_v4 = vadd.s32 %v100_v11, %v99_v10  ;;  %v555_v10 = vmul.f32 %v3749_v50, %v3709_v16 }
 0x33f   :  { %v597_v8 = vpop.permute.xlu1 %596  ;;  %v103_v28 = vadd.s32 %v102_v24, %v101_v4 }
 0x341   :  { %v105_v40 = vadd.s32 %v104_v5, %v103_v28 }
 0x343   :  { %v106_v47 = vand.u32 1, %v105_v40  ;;  %v3853_v40 = vld [vmem:[#allocation2 + $0x10] sm:$0xff] }
 0x344   :  { %v577_v19 = vpop.permute.xlu1 %576 }
 0x345   :  { %vm107_vm8 = vcmp.eq.s32.totalorder %v106_v47, 1 }
 0x346   :  { %v3782_v0 = vsel %vm107_vm8, -1.0, %v3424_v59 }
 0x381   :  { %v542_v29 = vpop.permute.xlu0 %541  ;;  %v546_v30 = vpop.permute.xlu1 %545 }
 0x382   :  { %v548_v31 = vsub.f32 0.0, %v542_v29  ;;  %v550_v37 = vsub.f32 0.0, %v546_v30 }
 0x384   :  { %v552_v33 = vsel %vm56_vm6, %v542_v29, %v548_v31  ;;  %v554_v35 = vsel %vm56_vm6, %v546_v30, %v550_v37  ;;  %v3839_v29 = vld [vmem:[#allocation2 + $0x18] sm:$0xff]  ;;  %v3842_v30 = vld [vmem:[#allocation2 + $0x8] sm:$0xff]  ;;  %v3845_v31 = vld [vmem:[#allocation2] sm:$0xff]  ;;  %v3425_v37 = vmov 37  }
 0x385   :  { %v560_v42 = vmul.f32 %v552_v33, %v3729_v23  ;;  %v562_v43 = vmul.f32 %v554_v35, %v3731_v3 }
 0x387   :  { %v564_v17 = vadd.f32 %v560_v42, %v556_v41  ;;  %v566_v46 = vadd.f32 %v562_v43, %v558_v36 }
 0x389   :  { %v600_v48 = vmul.f32 %v573_v45, %v564_v17  ;;  %v604_v15 = vmul.f32 %v589_v57, %v564_v17  ;;  %v602_v51 = vmul.f32 %v581_v9, %v566_v46  ;;  %v606_v52 = vmul.f32 %v597_v8, %v566_v46  ;;  %v540_v53 = vpop.permute.xlu0 %539  ;;  %v544_v54 = vpop.permute.xlu1 %543 }
 0x38a   :  { %v547_v55 = vsub.f32 0.0, %v540_v53  ;;  %v549_v56 = vsub.f32 0.0, %v544_v54 }
 0x38b   :  { %v608_v62 = vsub.f32 %v600_v48, %v604_v15  ;;  %v610_v22 = vsub.f32 %v602_v51, %v606_v52  ;;  %v612_v3 = vadd.f32 %v604_v15, %v600_v48  ;;  %v614_v63 = vadd.f32 %v606_v52, %v602_v51 }
 0x38c   :  { %v553_v23 = vsel %vm56_vm6, %v544_v54, %v549_v56  ;;  %v551_v45 = vsel %vm56_vm6, %v540_v53, %v547_v55 }
 0x38d   :  { %v3776_v57 = vmul.f32 %v608_v62, %v3769_v34  ;;  %v3779_v61 = vmul.f32 %v610_v22, %v3769_v34  ;;  %v561_v1 = vmul.f32 %v553_v23, %v3736_v27  ;;  %v559_v2 = vmul.f32 %v551_v45, %v525_v60 }
 0x38e   :  { %v3792_v8 = vmul.f32 %v612_v3, %v3782_v0  ;;  %v3795_v9 = vmul.f32 %v614_v63, %v3782_v0 }
 0x38f   :  { %657 = vrot.lane.b32.xlu0 %v3776_v57, %s3393_s13  ;;  %661 = vrot.lane.b32.xlu1 %v3779_v61, %s3393_s13  ;;  %v565_v27 = vadd.f32 %v561_v1, %v557_v7  ;;  %v563_v60 = vadd.f32 %v559_v2, %v555_v10 }
 0x391   :  { %v601_v6 = vmul.f32 %v577_v19, %v565_v27  ;;  %v599_v16 = vmul.f32 %v569_v25, %v563_v60 }
 0x393   :  { %693 = vrot.lane.b32.xlu0 %v3792_v8, %s3393_s13  ;;  %697 = vrot.lane.b32.xlu1 %v3795_v9, %s3393_s13 }
 0x396   :  { %v585_v11 = vpop.permute.xlu0 %584  ;;  %v593_v12 = vpop.permute.xlu1 %592 }
 0x397   :  { %v603_v14 = vmul.f32 %v585_v11, %v563_v60  ;;  %v605_v18 = vmul.f32 %v593_v12, %v565_v27  ;;  %669 = vrot.lane.b32.xlu0 %v3779_v61, %s3397_s0  ;;  %665 = vrot.lane.b32.xlu1 %v3776_v57, %s3397_s0 }
 0x399   :  { %v609_v50 = vsub.f32 %v601_v6, %v605_v18  ;;  %v607_v4 = vsub.f32 %v599_v16, %v603_v14  ;;  %v613_v24 = vadd.f32 %v605_v18, %v601_v6  ;;  %v611_v19 = vadd.f32 %v603_v14, %v599_v16 }
 0x39b   :  { %705 = vrot.lane.b32.xlu0 %v3795_v9, %s3397_s0  ;;  %701 = vrot.lane.b32.xlu1 %v3792_v8, %s3397_s0  ;;  %v3812_v26 = vmul.f32 %v609_v50, %v3769_v34  ;;  %v3815_v28 = vmul.f32 %v607_v4, %v3769_v34  ;;  %v3822_v25 = vmul.f32 %v613_v24, %v3782_v0  ;;  %v629_v33 = vpop.permute.xlu1 %628  ;;  %v637_v36 = vpop.permute.xlu0 %636 }
 0x39c   :  { %v3825_v5 = vmul.f32 %v611_v19, %v3782_v0  ;;  %v682_v62 = vmul.f32 %v637_v36, %v3779_v61  ;;  %v680_v22 = vmul.f32 %v629_v33, %v3776_v57  ;;  %v718_v60 = vmul.f32 %v637_v36, %v3795_v9 }
 0x39d   :  { %v716_v57 = vmul.f32 %v629_v33, %v3792_v8 }
 0x39f   :  { %659 = vrot.lane.b32.xlu0 %v3812_v26, %s3393_s13  ;;  %655 = vrot.lane.b32.xlu1 %v3815_v28, %s3393_s13  ;;  %v3858_v42 = vpop.permute.xlu0 %624 }
 0x3a0   :  { %v645_v35 = vpop.permute.xlu1 %644 }
 0x3a3   :  { %695 = vrot.lane.b32.xlu0 %v3822_v25, %s3393_s13  ;;  %691 = vrot.lane.b32.xlu1 %v3825_v5, %s3393_s13 }
 0x3a4   :  { %v653_v41 = vpop.permute.xlu1 %652  ;;  %v3860_v17 = vpop.permute.xlu0 %640 }
 0x3a7   :  { %667 = vrot.lane.b32.xlu0 %v3812_v26, %s3397_s0  ;;  %663 = vrot.lane.b32.xlu1 %v3815_v28, %s3397_s0 }
 0x3a9   :  { %v633_v43 = vpop.permute.xlu1 %632 }
 0x3aa   :  { %v681_v33 = vmul.f32 %v633_v43, %v3812_v26 }
 0x3ab   :  { %703 = vrot.lane.b32.xlu0 %v3822_v25, %s3397_s0  ;;  %699 = vrot.lane.b32.xlu1 %v3825_v5, %s3397_s0 }
 0x3ae   :  { %v649_v46 = vpop.permute.xlu1 %648 }
 0x3af   :  { %740 = vperm.xlu0 %3192, %v3839_v29   ;;  %732 = vperm.xlu1 %3191, %v3842_v30  }
 0x3b3   :  { %728 = vperm.xlu0 %3192, %v3845_v31   ;;  %3193 = vset.pattern.permute.xlu1 %v3425_v37 }
 0x3b4   :  { %748 = vperm.xlu1 %3193, %v3842_v30  }
 0x3b7   :  { %3195 = vset.pattern.permute.xlu0 %v3425_v37 }
 0x3b8   :  { %744 = vperm.xlu0 %3195, %v3845_v31   ;;  %756 = vperm.xlu1 %3193, %v3839_v29  }
 0x3bc   :  { %3198 = vset.pattern.permute.xlu0 %v3426_v38  ;;  %3194 = vset.pattern.permute.xlu1 %v3423_v21 }
 0x3bd   :  { %736 = vperm.xlu1 %3194, %v3853_v40  }
 0x3c1   :  { %3196 = vset.pattern.permute.xlu1 %v3425_v37 }
 0x3c2   :  { %752 = vperm.xlu1 %3196, %v3853_v40  }
 0x3c6   :  { %3197 = vset.pattern.permute.xlu1 %v3426_v38 }
 0x401   :  { %v658_v21 = vpop.permute.xlu0 %657  ;;  %v662_v47 = vpop.permute.xlu1 %661 }
 0x402   :  { %v672_v51 = vsub.f32 0.0, %v658_v21  ;;  %v674_v52 = vsub.f32 0.0, %v662_v47 }
 0x405   :  { %v694_v48 = vpop.permute.xlu0 %693  ;;  %v698_v15 = vpop.permute.xlu1 %697 }
 0x406   :  { %v710_v45 = vsub.f32 0.0, %v698_v15  ;;  %v708_v63 = vsub.f32 0.0, %v694_v48 }
 0x409   :  { %v670_v53 = vpop.permute.xlu0 %669  ;;  %v666_v54 = vpop.permute.xlu1 %665 }
 0x40a   :  { %v678_v55 = vsel %vm3518_vm0, %v670_v53, %v674_v52  ;;  %v676_v56 = vsel %vm3518_vm0, %v666_v54, %v672_v51  ;;  %v717_v54 = vmul.f32 %v633_v43, %v3822_v25  ;;  %v3427_v25 = vmov 41  }
 0x40b   :  { %v686_v23 = vmul.f32 %v678_v55, %v653_v41  ;;  %v684_v3 = vmul.f32 %v676_v56, %v645_v35  ;;  %v715_v56 = vmul.f32 %v3858_v42, %v3825_v5  ;;  %v3428_v5 = vmov 13  }
 0x40d   :  { %v3868_v1 = vadd.f32 %v686_v23, %v682_v62  ;;  %v3870_v2 = vadd.f32 %v684_v3, %v680_v22  ;;  %v706_v7 = vpop.permute.xlu0 %705  ;;  %v702_v27 = vpop.permute.xlu1 %701 }
 0x40e   :  { %v714_v10 = vsel %vm3518_vm0, %v706_v7, %v710_v45  ;;  %v712_v61 = vsel %vm3518_vm0, %v702_v27, %v708_v63 }
 0x40f   :  { %v722_v11 = vmul.f32 %v714_v10, %v653_v41  ;;  %765 = vrot.lane.b32.xlu1 %v3868_v1, %s3400_s14  ;;  %761 = vrot.lane.b32.xlu0 %v3870_v2, %s3400_s14  ;;  %v720_v12 = vmul.f32 %v712_v61, %v645_v35  ;;  %v679_v41 = vmul.f32 %v3858_v42, %v3815_v28 }
 0x411   :  { %v3882_v14 = vadd.f32 %v722_v11, %v718_v60  ;;  %v660_v6 = vpop.permute.xlu0 %659  ;;  %v3884_v18 = vadd.f32 %v720_v12, %v716_v57  ;;  %v656_v16 = vpop.permute.xlu1 %655 }
 0x412   :  { %v673_v4 = vsub.f32 0.0, %v660_v6  ;;  %v671_v8 = vsub.f32 0.0, %v656_v16 }
 0x413   :  { %801 = vrot.lane.b32.xlu1 %v3882_v14, %s3400_s14  ;;  %797 = vrot.lane.b32.xlu0 %v3884_v18, %s3400_s14 }
 0x415   :  { %v696_v9 = vpop.permute.xlu0 %695  ;;  %v692_v50 = vpop.permute.xlu1 %691 }
 0x416   :  { %v709_v21 = vsub.f32 0.0, %v696_v9  ;;  %v707_v48 = vsub.f32 0.0, %v692_v50 }
 0x417   :  { %769 = vrot.lane.b32.xlu1 %v3870_v2, %s3401_s15  ;;  %773 = vrot.lane.b32.xlu0 %v3868_v1, %s3401_s15 }
 0x419   :  { %v668_v24 = vpop.permute.xlu0 %667  ;;  %v664_v37 = vpop.permute.xlu1 %663 }
 0x41a   :  { %v677_v19 = vsel %vm3518_vm0, %v668_v24, %v673_v4  ;;  %v675_v36 = vsel %vm3518_vm0, %v664_v37, %v671_v8 }
 0x41b   :  { %v685_v35 = vmul.f32 %v677_v19, %v649_v46  ;;  %805 = vrot.lane.b32.xlu1 %v3884_v18, %s3401_s15  ;;  %v683_v47 = vmul.f32 %v675_v36, %v3860_v17  ;;  %809 = vrot.lane.b32.xlu0 %v3882_v14, %s3401_s15 }
 0x41d   :  { %v3906_v15 = vadd.f32 %v685_v35, %v681_v33  ;;  %v704_v26 = vpop.permute.xlu0 %703  ;;  %v3908_v51 = vadd.f32 %v683_v47, %v679_v41  ;;  %v700_v53 = vpop.permute.xlu1 %699 }
 0x41e   :  { %v713_v52 = vsel %vm3518_vm0, %v704_v26, %v709_v21  ;;  %v711_v28 = vsel %vm3518_vm0, %v700_v53, %v707_v48 }
 0x41f   :  { %v721_v55 = vmul.f32 %v713_v52, %v649_v46  ;;  %v719_v62 = vmul.f32 %v711_v28, %v3860_v17  ;;  %763 = vrot.lane.b32.xlu0 %v3906_v15, %s3400_s14  ;;  %759 = vrot.lane.b32.xlu1 %v3908_v51, %s3400_s14 }
 0x421   :  { %v3922_v22 = vadd.f32 %v721_v55, %v717_v54  ;;  %v3924_v23 = vadd.f32 %v719_v62, %v715_v56 }
 0x423   :  { %799 = vrot.lane.b32.xlu0 %v3922_v22, %s3400_s14  ;;  %795 = vrot.lane.b32.xlu1 %v3924_v23, %s3400_s14 }
 0x427   :  { %771 = vrot.lane.b32.xlu0 %v3906_v15, %s3401_s15  ;;  %767 = vrot.lane.b32.xlu1 %v3908_v51, %s3401_s15 }
 0x42a   :  { %v733_v42 = vpop.permute.xlu1 %732  ;;  %v741_v17 = vpop.permute.xlu0 %740 }
 0x42b   :  { %807 = vrot.lane.b32.xlu0 %v3922_v22, %s3401_s15  ;;  %803 = vrot.lane.b32.xlu1 %v3924_v23, %s3401_s15  ;;  %v784_v16 = vmul.f32 %v733_v42, %v3870_v2  ;;  %v786_v4 = vmul.f32 %v741_v17, %v3868_v1  ;;  %v820_v2 = vmul.f32 %v733_v42, %v3884_v18 }
 0x42c   :  { %v822_v1 = vmul.f32 %v741_v17, %v3882_v14 }
 0x42e   :  { %v729_v3 = vpop.permute.xlu0 %728 }
 0x42f   :  { %844 = vperm.xlu0 %3198, %v3839_v29   ;;  %836 = vperm.xlu1 %3197, %v3842_v30   ;;  %v749_v43 = vpop.permute.xlu1 %748 }
 0x433   :  { %832 = vperm.xlu0 %3198, %v3845_v31   ;;  %3199 = vset.pattern.permute.xlu1 %v3427_v25  ;;  %v757_v46 = vpop.permute.xlu1 %756  ;;  %v3951_v63 = vpop.permute.xlu0 %744 }
 0x434   :  { %852 = vperm.xlu1 %3199, %v3842_v30  }
 0x437   :  { %3201 = vset.pattern.permute.xlu0 %v3427_v25 }
 0x438   :  { %860 = vperm.xlu1 %3199, %v3839_v29   ;;  %848 = vperm.xlu0 %3201, %v3845_v31   ;;  %v3949_v45 = vpop.permute.xlu1 %736 }
 0x439   :  { %v785_v17 = vmul.f32 %v3949_v45, %v3906_v15 }
 0x43c   :  { %3200 = vset.pattern.permute.xlu1 %v3426_v38  ;;  %3204 = vset.pattern.permute.xlu0 %v3428_v5 }
 0x43d   :  { %840 = vperm.xlu1 %3200, %v3853_v40   ;;  %v753_v38 = vpop.permute.xlu1 %752 }
 0x441   :  { %3202 = vset.pattern.permute.xlu1 %v3427_v25 }
 0x442   :  { %856 = vperm.xlu1 %3202, %v3853_v40  }
 0x446   :  { %3203 = vset.pattern.permute.xlu1 %v3428_v5 }
 0x481   :  { %v762_v7 = vpop.permute.xlu0 %761  ;;  %v766_v10 = vpop.permute.xlu1 %765 }
 0x482   :  { %v776_v11 = vsub.f32 0.0, %v762_v7  ;;  %v778_v61 = vsub.f32 0.0, %v766_v10 }
 0x485   :  { %v802_v27 = vpop.permute.xlu1 %801  ;;  %v798_v60 = vpop.permute.xlu0 %797 }
 0x486   :  { %v812_v8 = vsub.f32 0.0, %v798_v60  ;;  %v814_v19 = vsub.f32 0.0, %v802_v27 }
 0x489   :  { %v770_v57 = vpop.permute.xlu1 %769  ;;  %v774_v12 = vpop.permute.xlu0 %773 }
 0x48a   :  { %v780_v6 = vsel %vm31_vm1, %v770_v57, %v776_v11  ;;  %v782_v9 = vsel %vm31_vm1, %v774_v12, %v778_v61  ;;  %v819_v12 = vmul.f32 %v729_v3, %v3924_v23 }
 0x48b   :  { %v788_v50 = vmul.f32 %v780_v6, %v749_v43  ;;  %v790_v24 = vmul.f32 %v782_v9, %v757_v46  ;;  %v821_v6 = vmul.f32 %v3949_v45, %v3922_v22  ;;  %v3429_v22 = vmov 45  }
 0x48d   :  { %v3959_v37 = vadd.f32 %v788_v50, %v784_v16  ;;  %v806_v33 = vpop.permute.xlu1 %805  ;;  %v3961_v35 = vadd.f32 %v790_v24, %v786_v4  ;;  %v810_v36 = vpop.permute.xlu0 %809 }
 0x48e   :  { %v816_v41 = vsel %vm31_vm1, %v806_v33, %v812_v8  ;;  %v818_v21 = vsel %vm31_vm1, %v810_v36, %v814_v19 }
 0x48f   :  { %v824_v47 = vmul.f32 %v816_v41, %v749_v43  ;;  %865 = vrot.lane.b32.xlu0 %v3959_v37, %s3404_s16  ;;  %v826_v48 = vmul.f32 %v818_v21, %v757_v46  ;;  %869 = vrot.lane.b32.xlu1 %v3961_v35, %s3404_s16  ;;  %v783_v43 = vmul.f32 %v729_v3, %v3908_v51  ;;  %v3430_v3 = vmov 17  }
 0x491   :  { %v3973_v26 = vadd.f32 %v824_v47, %v820_v2  ;;  %v3975_v52 = vadd.f32 %v826_v48, %v822_v1  ;;  %v764_v53 = vpop.permute.xlu0 %763  ;;  %v760_v54 = vpop.permute.xlu1 %759 }
 0x492   :  { %v777_v14 = vsub.f32 0.0, %v764_v53  ;;  %v775_v28 = vsub.f32 0.0, %v760_v54 }
 0x493   :  { %901 = vrot.lane.b32.xlu0 %v3973_v26, %s3404_s16  ;;  %905 = vrot.lane.b32.xlu1 %v3975_v52, %s3404_s16 }
 0x495   :  { %v800_v18 = vpop.permute.xlu0 %799  ;;  %v796_v55 = vpop.permute.xlu1 %795 }
 0x496   :  { %v813_v10 = vsub.f32 0.0, %v800_v18  ;;  %v811_v27 = vsub.f32 0.0, %v796_v55 }
 0x497   :  { %877 = vrot.lane.b32.xlu0 %v3961_v35, %s3405_s17  ;;  %873 = vrot.lane.b32.xlu1 %v3959_v37, %s3405_s17 }
 0x499   :  { %v772_v56 = vpop.permute.xlu0 %771  ;;  %v768_v62 = vpop.permute.xlu1 %767 }
 0x49a   :  { %v781_v25 = vsel %vm31_vm1, %v772_v56, %v777_v14  ;;  %v779_v42 = vsel %vm31_vm1, %v768_v62, %v775_v28 }
 0x49b   :  { %913 = vrot.lane.b32.xlu0 %v3975_v52, %s3405_s17  ;;  %v789_v46 = vmul.f32 %v781_v25, %v753_v38  ;;  %v787_v7 = vmul.f32 %v779_v42, %v3951_v63  ;;  %909 = vrot.lane.b32.xlu1 %v3973_v26, %s3405_s17 }
 0x49d   :  { %v3997_v60 = vadd.f32 %v789_v46, %v785_v17  ;;  %v3999_v11 = vadd.f32 %v787_v7, %v783_v43  ;;  %v808_v61 = vpop.permute.xlu0 %807  ;;  %v804_v57 = vpop.permute.xlu1 %803 }
 0x49e   :  { %v817_v51 = vsel %vm31_vm1, %v808_v61, %v813_v10  ;;  %v815_v15 = vsel %vm31_vm1, %v804_v57, %v811_v27 }
 0x49f   :  { %v825_v16 = vmul.f32 %v817_v51, %v753_v38  ;;  %v823_v9 = vmul.f32 %v815_v15, %v3951_v63  ;;  %867 = vrot.lane.b32.xlu0 %v3997_v60, %s3404_s16  ;;  %863 = vrot.lane.b32.xlu1 %v3999_v11, %s3404_s16 }
 0x4a1   :  { %v4013_v50 = vadd.f32 %v825_v16, %v821_v6  ;;  %v4015_v23 = vadd.f32 %v823_v9, %v819_v12 }
 0x4a3   :  { %903 = vrot.lane.b32.xlu0 %v4013_v50, %s3404_s16  ;;  %899 = vrot.lane.b32.xlu1 %v4015_v23, %s3404_s16 }
 0x4a7   :  { %875 = vrot.lane.b32.xlu0 %v3997_v60, %s3405_s17  ;;  %871 = vrot.lane.b32.xlu1 %v3999_v11, %s3405_s17 }
 0x4aa   :  { %v837_v45 = vpop.permute.xlu1 %836  ;;  %v845_v38 = vpop.permute.xlu0 %844 }
 0x4ab   :  { %911 = vrot.lane.b32.xlu0 %v4013_v50, %s3405_s17  ;;  %907 = vrot.lane.b32.xlu1 %v4015_v23, %s3405_s17  ;;  %v890_v54 = vmul.f32 %v845_v38, %v3961_v35  ;;  %v888_v14 = vmul.f32 %v837_v45, %v3959_v37  ;;  %v926_v35 = vmul.f32 %v845_v38, %v3975_v52 }
 0x4ac   :  { %v924_v37 = vmul.f32 %v837_v45, %v3973_v26 }
 0x4ae   :  { %v4040_v8 = vpop.permute.xlu0 %832 }
 0x4af   :  { %948 = vperm.xlu0 %3204, %v3839_v29   ;;  %940 = vperm.xlu1 %3203, %v3842_v30   ;;  %v853_v63 = vpop.permute.xlu1 %852 }
 0x4b3   :  { %936 = vperm.xlu0 %3204, %v3845_v31   ;;  %3205 = vset.pattern.permute.xlu1 %v3429_v22  ;;  %v861_v4 = vpop.permute.xlu1 %860  ;;  %v4042_v19 = vpop.permute.xlu0 %848 }
 0x4b4   :  { %956 = vperm.xlu1 %3205, %v3842_v30  }
 0x4b7   :  { %3207 = vset.pattern.permute.xlu0 %v3429_v22 }
 0x4b8   :  { %952 = vperm.xlu0 %3207, %v3845_v31   ;;  %964 = vperm.xlu1 %3205, %v3839_v29   ;;  %v841_v24 = vpop.permute.xlu1 %840 }
 0x4b9   :  { %v889_v38 = vmul.f32 %v841_v24, %v3997_v60 }
 0x4bc   :  { %3210 = vset.pattern.permute.xlu0 %v3430_v3  ;;  %3206 = vset.pattern.permute.xlu1 %v3428_v5 }
 0x4bd   :  { %944 = vperm.xlu1 %3206, %v3853_v40   ;;  %v857_v33 = vpop.permute.xlu1 %856 }
 0x4c1   :  { %3208 = vset.pattern.permute.xlu1 %v3429_v22 }
 0x4c2   :  { %960 = vperm.xlu1 %3208, %v3853_v40  }
 0x4c6   :  { %3209 = vset.pattern.permute.xlu1 %v3430_v3 }
 0x501   :  { %v866_v36 = vpop.permute.xlu0 %865  ;;  %v870_v41 = vpop.permute.xlu1 %869 }
 0x502   :  { %v882_v21 = vsub.f32 0.0, %v870_v41  ;;  %v880_v47 = vsub.f32 0.0, %v866_v36 }
 0x505   :  { %v902_v5 = vpop.permute.xlu0 %901  ;;  %v906_v2 = vpop.permute.xlu1 %905 }
 0x506   :  { %v918_v28 = vsub.f32 0.0, %v906_v2  ;;  %v916_v62 = vsub.f32 0.0, %v902_v5 }
 0x509   :  { %v878_v1 = vpop.permute.xlu0 %877  ;;  %v874_v53 = vpop.permute.xlu1 %873 }
 0x50a   :  { %v886_v48 = vsel %vm36_vm2, %v878_v1, %v882_v21  ;;  %v884_v55 = vsel %vm36_vm2, %v874_v53, %v880_v47 }
 0x50b   :  { %v894_v18 = vmul.f32 %v886_v48, %v861_v4  ;;  %v892_v56 = vmul.f32 %v884_v55, %v853_v63 }
 0x50d   :  { %v4050_v25 = vadd.f32 %v894_v18, %v890_v54  ;;  %v914_v42 = vpop.permute.xlu0 %913  ;;  %v4052_v43 = vadd.f32 %v892_v56, %v888_v14  ;;  %v910_v46 = vpop.permute.xlu1 %909  ;;  %v923_v54 = vmul.f32 %v4040_v8, %v4015_v23  ;;  %v3432_v23 = vmov 21  }
 0x50e   :  { %v922_v17 = vsel %vm36_vm2, %v914_v42, %v918_v28  ;;  %v920_v10 = vsel %vm36_vm2, %v910_v46, %v916_v62 }
 0x50f   :  { %v930_v7 = vmul.f32 %v922_v17, %v861_v4  ;;  %973 = vrot.lane.b32.xlu1 %v4050_v25, %s3408_s18  ;;  %v928_v27 = vmul.f32 %v920_v10, %v853_v63  ;;  %969 = vrot.lane.b32.xlu0 %v4052_v43, %s3408_s18  ;;  %v887_v63 = vmul.f32 %v4040_v8, %v3999_v11 }
 0x510   :  { %v925_v11 = vmul.f32 %v841_v24, %v4013_v50  ;;  %v3431_v50 = vmov 49  }
 0x511   :  { %v4064_v61 = vadd.f32 %v930_v7, %v926_v35  ;;  %v4066_v57 = vadd.f32 %v928_v27, %v924_v37  ;;  %v868_v12 = vpop.permute.xlu0 %867  ;;  %v864_v51 = vpop.permute.xlu1 %863 }
 0x512   :  { %v881_v26 = vsub.f32 0.0, %v868_v12  ;;  %v879_v6 = vsub.f32 0.0, %v864_v51 }
 0x513   :  { %1009 = vrot.lane.b32.xlu1 %v4064_v61, %s3408_s18  ;;  %1005 = vrot.lane.b32.xlu0 %v4066_v57, %s3408_s18 }
 0x515   :  { %v904_v52 = vpop.permute.xlu0 %903  ;;  %v900_v15 = vpop.permute.xlu1 %899 }
 0x516   :  { %v917_v41 = vsub.f32 0.0, %v904_v52  ;;  %v915_v5 = vsub.f32 0.0, %v900_v15 }
 0x517   :  { %977 = vrot.lane.b32.xlu1 %v4052_v43, %s3391_s10  ;;  %981 = vrot.lane.b32.xlu0 %v4050_v25, %s3391_s10 }
 0x519   :  { %v876_v16 = vpop.permute.xlu0 %875  ;;  %v872_v9 = vpop.permute.xlu1 %871 }
 0x51a   :  { %v885_v22 = vsel %vm36_vm2, %v876_v16, %v881_v26  ;;  %v883_v45 = vsel %vm36_vm2, %v872_v9, %v879_v6 }
 0x51b   :  { %1013 = vrot.lane.b32.xlu1 %v4066_v57, %s3391_s10  ;;  %v893_v4 = vmul.f32 %v885_v22, %v857_v33  ;;  %v891_v36 = vmul.f32 %v883_v45, %v4042_v19  ;;  %1017 = vrot.lane.b32.xlu0 %v4064_v61, %s3391_s10 }
 0x51d   :  { %v4088_v2 = vadd.f32 %v893_v4, %v889_v38  ;;  %v4090_v21 = vadd.f32 %v891_v36, %v887_v63  ;;  %v912_v47 = vpop.permute.xlu0 %911  ;;  %v908_v48 = vpop.permute.xlu1 %907 }
 0x51e   :  { %v921_v1 = vsel %vm36_vm2, %v912_v47, %v917_v41  ;;  %v919_v53 = vsel %vm36_vm2, %v908_v48, %v915_v5 }
 0x51f   :  { %v929_v60 = vmul.f32 %v921_v1, %v857_v33  ;;  %971 = vrot.lane.b32.xlu0 %v4088_v2, %s3408_s18  ;;  %967 = vrot.lane.b32.xlu1 %v4090_v21, %s3408_s18  ;;  %v927_v18 = vmul.f32 %v919_v53, %v4042_v19 }
 0x521   :  { %v4104_v55 = vadd.f32 %v929_v60, %v925_v11  ;;  %v4106_v14 = vadd.f32 %v927_v18, %v923_v54 }
 0x523   :  { %1007 = vrot.lane.b32.xlu0 %v4104_v55, %s3408_s18  ;;  %1003 = vrot.lane.b32.xlu1 %v4106_v14, %s3408_s18 }
 0x527   :  { %979 = vrot.lane.b32.xlu0 %v4088_v2, %s3391_s10  ;;  %975 = vrot.lane.b32.xlu1 %v4090_v21, %s3391_s10 }
 0x52a   :  { %v941_v8 = vpop.permute.xlu1 %940  ;;  %v949_v33 = vpop.permute.xlu0 %948 }
 0x52b   :  { %1015 = vrot.lane.b32.xlu0 %v4104_v55, %s3391_s10  ;;  %1011 = vrot.lane.b32.xlu1 %v4106_v14, %s3391_s10  ;;  %v992_v51 = vmul.f32 %v941_v8, %v4052_v43  ;;  %v994_v26 = vmul.f32 %v949_v33, %v4050_v25  ;;  %v1028_v43 = vmul.f32 %v941_v8, %v4066_v57 }
 0x52c   :  { %v1030_v25 = vmul.f32 %v949_v33, %v4064_v61 }
 0x52e   :  { %v4131_v56 = vpop.permute.xlu0 %936 }
 0x52f   :  { %1052 = vperm.xlu0 %3210, %v3839_v29   ;;  %1044 = vperm.xlu1 %3209, %v3842_v30   ;;  %v957_v24 = vpop.permute.xlu1 %956  ;;  %v991_v33 = vmul.f32 %v4131_v56, %v4090_v21  ;;  %v1027_v21 = vmul.f32 %v4131_v56, %v4106_v14  ;;  %v3434_v14 = vmov 25  }
 0x533   :  { %1040 = vperm.xlu0 %3210, %v3845_v31   ;;  %3211 = vset.pattern.permute.xlu1 %v3431_v50  ;;  %v965_v19 = vpop.permute.xlu1 %964  ;;  %v4133_v42 = vpop.permute.xlu0 %952 }
 0x534   :  { %1060 = vperm.xlu1 %3211, %v3842_v30  }
 0x537   :  { %3213 = vset.pattern.permute.xlu0 %v3431_v50 }
 0x538   :  { %1056 = vperm.xlu0 %3213, %v3845_v31   ;;  %1068 = vperm.xlu1 %3211, %v3839_v29   ;;  %v945_v28 = vpop.permute.xlu1 %944 }
 0x539   :  { %v993_v8 = vmul.f32 %v945_v28, %v4088_v2 }
 0x53c   :  { %3216 = vset.pattern.permute.xlu0 %v3432_v23  ;;  %3212 = vset.pattern.permute.xlu1 %v3430_v3 }
 0x53d   :  { %1048 = vperm.xlu1 %3212, %v3853_v40   ;;  %v961_v62 = vpop.permute.xlu1 %960 }
 0x541   :  { %3214 = vset.pattern.permute.xlu1 %v3431_v50 }
 0x542   :  { %1064 = vperm.xlu1 %3214, %v3853_v40  }
 0x546   :  { %3215 = vset.pattern.permute.xlu1 %v3432_v23 }
 0x581   :  { %v974_v17 = vpop.permute.xlu1 %973  ;;  %v970_v46 = vpop.permute.xlu0 %969 }
 0x582   :  { %v984_v7 = vsub.f32 0.0, %v970_v46  ;;  %v986_v10 = vsub.f32 0.0, %v974_v17 }
 0x585   :  { %v1010_v3 = vpop.permute.xlu1 %1009  ;;  %v1006_v35 = vpop.permute.xlu0 %1005 }
 0x586   :  { %v1020_v6 = vsub.f32 0.0, %v1006_v35  ;;  %v1022_v9 = vsub.f32 0.0, %v1010_v3 }
 0x589   :  { %v978_v37 = vpop.permute.xlu1 %977  ;;  %v982_v27 = vpop.permute.xlu0 %981 }
 0x58a   :  { %v988_v12 = vsel %vm41_vm3, %v978_v37, %v984_v7  ;;  %v990_v52 = vsel %vm41_vm3, %v982_v27, %v986_v10  ;;  %v1029_v27 = vmul.f32 %v945_v28, %v4104_v55  ;;  %v3433_v55 = vmov 53  }
 0x58b   :  { %v996_v15 = vmul.f32 %v988_v12, %v957_v24  ;;  %v998_v16 = vmul.f32 %v990_v52, %v965_v19 }
 0x58d   :  { %v4141_v22 = vadd.f32 %v996_v15, %v992_v51  ;;  %v1014_v45 = vpop.permute.xlu1 %1013  ;;  %v4143_v63 = vadd.f32 %v998_v16, %v994_v26  ;;  %v1018_v38 = vpop.permute.xlu0 %1017 }
 0x58e   :  { %v1024_v4 = vsel %vm41_vm3, %v1014_v45, %v1020_v6  ;;  %v1026_v36 = vsel %vm41_vm3, %v1018_v38, %v1022_v9 }
 0x58f   :  { %v1032_v41 = vmul.f32 %v1024_v4, %v957_v24  ;;  %1073 = vrot.lane.b32.xlu0 %v4141_v22, %s3411_s19  ;;  %v1034_v5 = vmul.f32 %v1026_v36, %v965_v19  ;;  %1077 = vrot.lane.b32.xlu1 %v4143_v63, %s3411_s19 }
 0x591   :  { %v4155_v47 = vadd.f32 %v1032_v41, %v1028_v43  ;;  %v4157_v1 = vadd.f32 %v1034_v5, %v1030_v25  ;;  %v972_v48 = vpop.permute.xlu0 %971  ;;  %v968_v11 = vpop.permute.xlu1 %967 }
 0x592   :  { %v985_v61 = vsub.f32 0.0, %v972_v48  ;;  %v983_v53 = vsub.f32 0.0, %v968_v11 }
 0x593   :  { %1109 = vrot.lane.b32.xlu0 %v4155_v47, %s3411_s19  ;;  %1113 = vrot.lane.b32.xlu1 %v4157_v1, %s3411_s19 }
 0x595   :  { %v1008_v57 = vpop.permute.xlu0 %1007  ;;  %v1004_v60 = vpop.permute.xlu1 %1003 }
 0x596   :  { %v1021_v17 = vsub.f32 0.0, %v1008_v57  ;;  %v1019_v3 = vsub.f32 0.0, %v1004_v60 }
 0x597   :  { %1085 = vrot.lane.b32.xlu0 %v4143_v63, %s3412_s20  ;;  %1081 = vrot.lane.b32.xlu1 %v4141_v22, %s3412_s20 }
 0x599   :  { %v980_v54 = vpop.permute.xlu0 %979  ;;  %v976_v50 = vpop.permute.xlu1 %975 }
 0x59a   :  { %v989_v18 = vsel %vm41_vm3, %v980_v54, %v985_v61  ;;  %v987_v19 = vsel %vm41_vm3, %v976_v50, %v983_v53 }
 0x59b   :  { %1121 = vrot.lane.b32.xlu0 %v4157_v1, %s3412_s20  ;;  %v997_v24 = vmul.f32 %v989_v18, %v961_v62  ;;  %1117 = vrot.lane.b32.xlu1 %v4155_v47, %s3412_s20  ;;  %v995_v46 = vmul.f32 %v987_v19, %v4133_v42 }
 0x59d   :  { %v4179_v35 = vadd.f32 %v997_v24, %v993_v8  ;;  %v1016_v7 = vpop.permute.xlu0 %1015  ;;  %v4181_v10 = vadd.f32 %v995_v46, %v991_v33  ;;  %v1012_v37 = vpop.permute.xlu1 %1011 }
 0x59e   :  { %v1025_v2 = vsel %vm41_vm3, %v1016_v7, %v1021_v17  ;;  %v1023_v51 = vsel %vm41_vm3, %v1012_v37, %v1019_v3 }
 0x59f   :  { %v1033_v12 = vmul.f32 %v1025_v2, %v961_v62  ;;  %1075 = vrot.lane.b32.xlu0 %v4179_v35, %s3411_s19  ;;  %v1031_v52 = vmul.f32 %v1023_v51, %v4133_v42  ;;  %1071 = vrot.lane.b32.xlu1 %v4181_v10, %s3411_s19 }
 0x5a1   :  { %v4195_v15 = vadd.f32 %v1033_v12, %v1029_v27  ;;  %v4197_v26 = vadd.f32 %v1031_v52, %v1027_v21 }
 0x5a3   :  { %1111 = vrot.lane.b32.xlu0 %v4195_v15, %s3411_s19  ;;  %1107 = vrot.lane.b32.xlu1 %v4197_v26, %s3411_s19 }
 0x5a7   :  { %1083 = vrot.lane.b32.xlu0 %v4179_v35, %s3412_s20  ;;  %1079 = vrot.lane.b32.xlu1 %v4181_v10, %s3412_s20 }
 0x5aa   :  { %v1045_v28 = vpop.permute.xlu1 %1044  ;;  %v1053_v62 = vpop.permute.xlu0 %1052 }
 0x5ab   :  { %1119 = vrot.lane.b32.xlu0 %v4195_v15, %s3412_s20  ;;  %1115 = vrot.lane.b32.xlu1 %v4197_v26, %s3412_s20  ;;  %v1098_v11 = vmul.f32 %v1053_v62, %v4143_v63  ;;  %v1096_v61 = vmul.f32 %v1045_v28, %v4141_v22  ;;  %v1134_v63 = vmul.f32 %v1053_v62, %v4157_v1 }
 0x5ac   :  { %v1132_v22 = vmul.f32 %v1045_v28, %v4155_v47 }
 0x5ae   :  { %v4222_v6 = vpop.permute.xlu0 %1040 }
 0x5af   :  { %1156 = vperm.xlu0 %3216, %v3839_v29   ;;  %1148 = vperm.xlu1 %3215, %v3842_v30   ;;  %v1061_v56 = vpop.permute.xlu1 %1060 }
 0x5b3   :  { %1144 = vperm.xlu0 %3216, %v3845_v31   ;;  %3217 = vset.pattern.permute.xlu1 %v3433_v55  ;;  %v1069_v42 = vpop.permute.xlu1 %1068  ;;  %v4224_v9 = vpop.permute.xlu0 %1056 }
 0x5b4   :  { %1164 = vperm.xlu1 %3217, %v3842_v30  }
 0x5b7   :  { %3219 = vset.pattern.permute.xlu0 %v3433_v55 }
 0x5b8   :  { %1160 = vperm.xlu0 %3219, %v3845_v31   ;;  %1172 = vperm.xlu1 %3217, %v3839_v29   ;;  %v1049_v16 = vpop.permute.xlu1 %1048 }
 0x5b9   :  { %v1097_v28 = vmul.f32 %v1049_v16, %v4179_v35 }
 0x5bc   :  { %3222 = vset.pattern.permute.xlu0 %v3434_v14  ;;  %3218 = vset.pattern.permute.xlu1 %v3432_v23 }
 0x5bd   :  { %1152 = vperm.xlu1 %3218, %v3853_v40   ;;  %v1065_v45 = vpop.permute.xlu1 %1064 }
 0x5c1   :  { %3220 = vset.pattern.permute.xlu1 %v3433_v55 }
 0x5c2   :  { %1168 = vperm.xlu1 %3220, %v3853_v40  }
 0x5c6   :  { %3221 = vset.pattern.permute.xlu1 %v3434_v14 }
 0x601   :  { %v1074_v38 = vpop.permute.xlu0 %1073  ;;  %v1078_v4 = vpop.permute.xlu1 %1077 }
 0x602   :  { %v1090_v36 = vsub.f32 0.0, %v1078_v4  ;;  %v1088_v41 = vsub.f32 0.0, %v1074_v38 }
 0x605   :  { %v1110_v23 = vpop.permute.xlu0 %1109  ;;  %v1114_v43 = vpop.permute.xlu1 %1113 }
 0x606   :  { %v1126_v53 = vsub.f32 0.0, %v1114_v43  ;;  %v1124_v18 = vsub.f32 0.0, %v1110_v23 }
 0x609   :  { %v1086_v25 = vpop.permute.xlu0 %1085  ;;  %v1082_v48 = vpop.permute.xlu1 %1081 }
 0x60a   :  { %v1094_v5 = vsel %vm46_vm4, %v1086_v25, %v1090_v36  ;;  %v1092_v60 = vsel %vm46_vm4, %v1082_v48, %v1088_v41 }
 0x60b   :  { %v1102_v57 = vmul.f32 %v1094_v5, %v1069_v42  ;;  %v1100_v54 = vmul.f32 %v1092_v60, %v1061_v56  ;;  %v1133_v5 = vmul.f32 %v1049_v16, %v4195_v15  ;;  %v3435_v15 = vmov 57  }
 0x60d   :  { %v4232_v50 = vadd.f32 %v1102_v57, %v1098_v11  ;;  %v1122_v8 = vpop.permute.xlu0 %1121  ;;  %v4234_v24 = vadd.f32 %v1100_v54, %v1096_v61  ;;  %v1118_v33 = vpop.permute.xlu1 %1117 }
 0x60e   :  { %v1130_v19 = vsel %vm46_vm4, %v1122_v8, %v1126_v53  ;;  %v1128_v46 = vsel %vm46_vm4, %v1118_v33, %v1124_v18 }
 0x60f   :  { %v1138_v17 = vmul.f32 %v1130_v19, %v1069_v42  ;;  %1181 = vrot.lane.b32.xlu1 %v4232_v50, %s3415_s21  ;;  %v1136_v3 = vmul.f32 %v1128_v46, %v1061_v56  ;;  %1177 = vrot.lane.b32.xlu0 %v4234_v24, %s3415_s21  ;;  %v1095_v42 = vmul.f32 %v4222_v6, %v4181_v10 }
 0x610   :  { %v1131_v10 = vmul.f32 %v4222_v6, %v4197_v26  ;;  %v3436_v26 = vmov 29   ;;  %v3437_v6 = vmov 61  }
 0x611   :  { %v4246_v7 = vadd.f32 %v1138_v17, %v1134_v63  ;;  %v4248_v2 = vadd.f32 %v1136_v3, %v1132_v22  ;;  %v1076_v37 = vpop.permute.xlu0 %1075  ;;  %v1072_v27 = vpop.permute.xlu1 %1071 }
 0x612   :  { %v1089_v47 = vsub.f32 0.0, %v1076_v37  ;;  %v1087_v51 = vsub.f32 0.0, %v1072_v27 }
 0x613   :  { %1217 = vrot.lane.b32.xlu1 %v4246_v7, %s3415_s21  ;;  %1213 = vrot.lane.b32.xlu0 %v4248_v2, %s3415_s21 }
 0x615   :  { %v1112_v1 = vpop.permute.xlu0 %1111  ;;  %v1108_v12 = vpop.permute.xlu1 %1107 }
 0x616   :  { %v1125_v38 = vsub.f32 0.0, %v1112_v1  ;;  %v1123_v23 = vsub.f32 0.0, %v1108_v12 }
 0x617   :  { %1185 = vrot.lane.b32.xlu1 %v4234_v24, %s3416_s22  ;;  %1189 = vrot.lane.b32.xlu0 %v4232_v50, %s3416_s22 }
 0x619   :  { %v1084_v21 = vpop.permute.xlu0 %1083  ;;  %v1080_v55 = vpop.permute.xlu1 %1079 }
 0x61a   :  { %v1093_v52 = vsel %vm46_vm4, %v1084_v21, %v1089_v47  ;;  %v1091_v62 = vsel %vm46_vm4, %v1080_v55, %v1087_v51 }
 0x61b   :  { %1221 = vrot.lane.b32.xlu1 %v4248_v2, %s3416_s22  ;;  %v1101_v56 = vmul.f32 %v1093_v52, %v1065_v45  ;;  %1225 = vrot.lane.b32.xlu0 %v4246_v7, %s3416_s22  ;;  %v1099_v4 = vmul.f32 %v1091_v62, %v4224_v9 }
 0x61d   :  { %v4270_v43 = vadd.f32 %v1101_v56, %v1097_v28  ;;  %v1120_v36 = vpop.permute.xlu0 %1119  ;;  %v4272_v41 = vadd.f32 %v1099_v4, %v1095_v42  ;;  %v1116_v25 = vpop.permute.xlu1 %1115 }
 0x61e   :  { %v1129_v35 = vsel %vm46_vm4, %v1120_v36, %v1125_v38  ;;  %v1127_v11 = vsel %vm46_vm4, %v1116_v25, %v1123_v23 }
 0x61f   :  { %v1137_v48 = vmul.f32 %v1129_v35, %v1065_v45  ;;  %1179 = vrot.lane.b32.xlu0 %v4270_v43, %s3415_s21  ;;  %v1135_v57 = vmul.f32 %v1127_v11, %v4224_v9  ;;  %1175 = vrot.lane.b32.xlu1 %v4272_v41, %s3415_s21 }
 0x621   :  { %v4286_v60 = vadd.f32 %v1137_v48, %v1133_v5  ;;  %v4288_v61 = vadd.f32 %v1135_v57, %v1131_v10 }
 0x623   :  { %1215 = vrot.lane.b32.xlu0 %v4286_v60, %s3415_s21  ;;  %1211 = vrot.lane.b32.xlu1 %v4288_v61, %s3415_s21 }
 0x627   :  { %1187 = vrot.lane.b32.xlu0 %v4270_v43, %s3416_s22  ;;  %1183 = vrot.lane.b32.xlu1 %v4272_v41, %s3416_s22 }
 0x62a   :  { %v1157_v9 = vpop.permute.xlu0 %1156 }
 0x62b   :  { %1223 = vrot.lane.b32.xlu0 %v4286_v60, %s3416_s22  ;;  %1219 = vrot.lane.b32.xlu1 %v4288_v61, %s3416_s22  ;;  %v1202_v27 = vmul.f32 %v1157_v9, %v4232_v50  ;;  %v1238_v50 = vmul.f32 %v1157_v9, %v4246_v7 }
 0x62e   :  { %v1145_v53 = vpop.permute.xlu0 %1144 }
 0x62f   :  { %1260 = vperm.xlu0 %3222, %v3839_v29   ;;  %1252 = vperm.xlu1 %3221, %v3842_v30  }
 0x633   :  { %1248 = vperm.xlu0 %3222, %v3845_v31   ;;  %3223 = vset.pattern.permute.xlu1 %v3435_v15  ;;  %v1161_v18 = vpop.permute.xlu0 %1160 }
 0x634   :  { %1268 = vperm.xlu1 %3223, %v3842_v30  }
 0x637   :  { %3225 = vset.pattern.permute.xlu0 %v3435_v15 }
 0x638   :  { %1264 = vperm.xlu0 %3225, %v3845_v31   ;;  %1276 = vperm.xlu1 %3223, %v3839_v29  }
 0x63c   :  { %3228 = vset.pattern.permute.xlu0 %v3436_v26  ;;  %3224 = vset.pattern.permute.xlu1 %v3434_v14  ;;  %v1149_v14 = vpop.permute.xlu1 %1148 }
 0x63d   :  { %1348 = vperm.xlu0 %3228, %v3839_v29   ;;  %1256 = vperm.xlu1 %3224, %v3853_v40   ;;  %v1200_v22 = vmul.f32 %v1149_v14, %v4234_v24  ;;  %v1236_v24 = vmul.f32 %v1149_v14, %v4248_v2 }
 0x640   :  { %v1165_v16 = vpop.permute.xlu1 %1164 }
 0x641   :  { %1336 = vperm.xlu0 %3228, %v3845_v31   ;;  %3226 = vset.pattern.permute.xlu1 %v3435_v15 }
 0x642   :  { %1272 = vperm.xlu1 %3226, %v3853_v40  }
 0x644   :  { %v1173_v31 = vpop.permute.xlu1 %1172 }
 0x645   :  { %3231 = vset.pattern.permute.xlu0 %v3437_v6 }
 0x646   :  { %3227 = vset.pattern.permute.xlu1 %v3436_v26 }
 0x647   :  { %1340 = vperm.xlu1 %3227, %v3842_v30  }
 0x648   :  { %v1153_v45 = vpop.permute.xlu1 %1152 }
 0x649   :  { %v1201_v10 = vmul.f32 %v1153_v45, %v4270_v43  ;;  %v1237_v43 = vmul.f32 %v1153_v45, %v4286_v60  ;;  %v4373_v60 = vld [vmem:[#allocation2 + $0x10] sm:$0xff]  ;;  %v4376_v45 = vld [vmem:[#allocation2] sm:$0xff] }
 0x64b   :  { %3229 = vset.pattern.permute.xlu1 %v3437_v6 }
 0x64c   :  { %1356 = vperm.xlu1 %3229, %v3842_v30   ;;  %v1169_v54 = vpop.permute.xlu1 %1168 }
 0x650   :  { %1364 = vperm.xlu1 %3229, %v3839_v29  }
 0x654   :  { %3230 = vset.pattern.permute.xlu1 %v3436_v26  ;;  %v1199_v26 = vmul.f32 %v1145_v53, %v4272_v41  ;;  %v1235_v41 = vmul.f32 %v1145_v53, %v4288_v61  ;;  %v3438_v61 = vmov 2   ;;  %v4379_v53 = vld [vmem:[#allocation2 + $0x8] sm:$0xff] }
 0x655   :  { %1344 = vperm.xlu1 %3230, %v3853_v40  }
 0x659   :  { %3232 = vset.pattern.permute.xlu1 %v3437_v6 }
 0x681   :  { %v1182_v8 = vpop.permute.xlu1 %1181  ;;  %v1178_v19 = vpop.permute.xlu0 %1177 }
 0x682   :  { %v1192_v17 = vsub.f32 0.0, %v1178_v19  ;;  %v1194_v30 = vsub.f32 0.0, %v1182_v8 }
 0x685   :  { %v1218_v33 = vpop.permute.xlu1 %1217  ;;  %v1214_v63 = vpop.permute.xlu0 %1213 }
 0x686   :  { %v1228_v1 = vsub.f32 0.0, %v1214_v63  ;;  %v1230_v47 = vsub.f32 0.0, %v1218_v33 }
 0x689   :  { %v1186_v46 = vpop.permute.xlu1 %1185  ;;  %v1190_v29 = vpop.permute.xlu0 %1189 }
 0x68a   :  { %v1196_v40 = vsel %vm51_vm5, %v1186_v46, %v1192_v17  ;;  %v1198_v3 = vsel %vm51_vm5, %v1190_v29, %v1194_v30 }
 0x68b   :  { %v1204_v37 = vmul.f32 %v1196_v40, %v1165_v16  ;;  %v1206_v12 = vmul.f32 %v1198_v3, %v1173_v31  ;;  %v3440_v40 = vmov 6  }
 0x68d   :  { %v4323_v51 = vadd.f32 %v1204_v37, %v1200_v22  ;;  %v1222_v21 = vpop.permute.xlu1 %1221  ;;  %v4325_v52 = vadd.f32 %v1206_v12, %v1202_v27  ;;  %v1226_v55 = vpop.permute.xlu0 %1225 }
 0x68e   :  { %v1232_v28 = vsel %vm51_vm5, %v1222_v21, %v1228_v1  ;;  %v1234_v56 = vsel %vm51_vm5, %v1226_v55, %v1230_v47 }
 0x68f   :  { %v1240_v62 = vmul.f32 %v1232_v28, %v1165_v16  ;;  %1281 = vrot.lane.b32.xlu0 %v4323_v51, %s3420_s23  ;;  %v1242_v42 = vmul.f32 %v1234_v56, %v1173_v31  ;;  %1285 = vrot.lane.b32.xlu1 %v4325_v52, %s3420_s23 }
 0x691   :  { %v4337_v38 = vadd.f32 %v1240_v62, %v1236_v24  ;;  %v4339_v4 = vadd.f32 %v1242_v42, %v1238_v50  ;;  %v1180_v23 = vpop.permute.xlu0 %1179  ;;  %v1176_v36 = vpop.permute.xlu1 %1175 }
 0x692   :  { %v1193_v25 = vsub.f32 0.0, %v1180_v23  ;;  %v1191_v7 = vsub.f32 0.0, %v1176_v36 }
 0x693   :  { %1309 = vrot.lane.b32.xlu0 %v4337_v38, %s3420_s23  ;;  %1313 = vrot.lane.b32.xlu1 %v4339_v4, %s3420_s23 }
 0x695   :  { %v1216_v2 = vpop.permute.xlu0 %1215  ;;  %v1212_v35 = vpop.permute.xlu1 %1211 }
 0x696   :  { %v1229_v6 = vsub.f32 0.0, %v1216_v2  ;;  %v1227_v16 = vsub.f32 0.0, %v1212_v35 }
 0x699   :  { %v1188_v5 = vpop.permute.xlu0 %1187  ;;  %v1184_v11 = vpop.permute.xlu1 %1183 }
 0x69a   :  { %v1197_v48 = vsel %vm51_vm5, %v1188_v5, %v1193_v25  ;;  %v1195_v15 = vsel %vm51_vm5, %v1184_v11, %v1191_v7 }
 0x69b   :  { %v1205_v57 = vmul.f32 %v1197_v48, %v1169_v54  ;;  %v1203_v14 = vmul.f32 %v1195_v15, %v1161_v18 }
 0x69d   :  { %v4351_v31 = vadd.f32 %v1205_v57, %v1201_v10  ;;  %v1224_v9 = vpop.permute.xlu0 %1223  ;;  %v4353_v8 = vadd.f32 %v1203_v14, %v1199_v26  ;;  %v1220_v33 = vpop.permute.xlu1 %1219 }
 0x69e   :  { %v1233_v19 = vsel %vm51_vm5, %v1224_v9, %v1229_v6  ;;  %v1231_v17 = vsel %vm51_vm5, %v1220_v33, %v1227_v16 }
 0x69f   :  { %v1241_v63 = vmul.f32 %v1233_v19, %v1169_v54  ;;  %1283 = vrot.lane.b32.xlu1 %v4351_v31, %s3420_s23  ;;  %v1239_v30 = vmul.f32 %v1231_v17, %v1161_v18  ;;  %1279 = vrot.lane.b32.xlu0 %v4353_v8, %s3420_s23  ;;  %v4382_v54 = vld [vmem:[#allocation2 + $0x18] sm:$0xff]  ;;  %v3439_v18 = vmov 34  }
 0x6a1   :  { %v4365_v46 = vadd.f32 %v1241_v63, %v1237_v43  ;;  %v4367_v29 = vadd.f32 %v1239_v30, %v1235_v41 }
 0x6a3   :  { %1311 = vrot.lane.b32.xlu1 %v4365_v46, %s3420_s23  ;;  %1307 = vrot.lane.b32.xlu0 %v4367_v29, %s3420_s23 }
 0x6a7   :  { %1360 = vperm.xlu1 %3232, %v4373_v60   ;;  %1352 = vperm.xlu0 %3231, %v4376_v45  }
 0x6aa   :  { %v1253_v22 = vpop.permute.xlu1 %1252  ;;  %v1261_v12 = vpop.permute.xlu0 %1260 }
 0x6ab   :  { %3233 = vset.pattern.permute.xlu1 %v3438_v61  ;;  %3234 = vset.pattern.permute.xlu0 %v3438_v61  ;;  %v1296_v57 = vmul.f32 %v1253_v22, %v4323_v51  ;;  %v1298_v26 = vmul.f32 %v1261_v12, %v4325_v52  ;;  %v1324_v14 = vmul.f32 %v1253_v22, %v4337_v38 }
 0x6ac   :  { %1404 = vperm.xlu1 %3233, %v4379_v53   ;;  %1412 = vperm.xlu0 %3234, %v4382_v54   ;;  %v1326_v33 = vmul.f32 %v1261_v12, %v4339_v4 }
 0x6ae   :  { %v4397_v21 = vpop.permute.xlu0 %1248 }
 0x6af   :  { %v1269_v3 = vpop.permute.xlu1 %1268 }
 0x6b0   :  { %3235 = vset.pattern.permute.xlu1 %v3439_v18  ;;  %1400 = vperm.xlu0 %3234, %v4376_v45  }
 0x6b1   :  { %1420 = vperm.xlu1 %3235, %v4379_v53  }
 0x6b3   :  { %v1277_v37 = vpop.permute.xlu1 %1276  ;;  %v4399_v55 = vpop.permute.xlu0 %1264 }
 0x6b4   :  { %3237 = vset.pattern.permute.xlu0 %v3439_v18 }
 0x6b5   :  { %1428 = vperm.xlu1 %3235, %v4382_v54   ;;  %1416 = vperm.xlu0 %3237, %v4376_v45  }
 0x6b8   :  { %v4393_v27 = vpop.permute.xlu1 %1256  ;;  %v1349_v24 = vpop.permute.xlu0 %1348 }
 0x6b9   :  { %3236 = vset.pattern.permute.xlu1 %v3438_v61  ;;  %3240 = vset.pattern.permute.xlu0 %v3440_v40 }
 0x6ba   :  { %1408 = vperm.xlu1 %3236, %v4373_v60  }
 0x6bc   :  { %v4401_v62 = vpop.permute.xlu0 %1336 }
 0x6bd   :  { %v4395_v1 = vpop.permute.xlu1 %1272 }
 0x6be   :  { %3238 = vset.pattern.permute.xlu1 %v3439_v18 }
 0x6bf   :  { %1424 = vperm.xlu1 %3238, %v4373_v60  }
 0x6c2   :  { %v1341_v47 = vpop.permute.xlu1 %1340 }
 0x6c3   :  { %3239 = vset.pattern.permute.xlu1 %v3440_v40 }
 0x6c7   :  { %v1357_v28 = vpop.permute.xlu1 %1356 }
 0x6cb   :  { %v1365_v56 = vpop.permute.xlu1 %1364 }
 0x6d0   :  { %v4403_v50 = vpop.permute.xlu1 %1344 }
 0x701   :  { %v1282_v42 = vpop.permute.xlu0 %1281  ;;  %v1286_v36 = vpop.permute.xlu1 %1285 }
 0x702   :  { %v1288_v23 = vsub.f32 0.0, %v1282_v42  ;;  %v1290_v2 = vsub.f32 0.0, %v1286_v36 }
 0x704   :  { %v1292_v35 = vsel %vm56_vm6, %v1282_v42, %v1288_v23  ;;  %v1294_v7 = vsel %vm56_vm6, %v1286_v36, %v1290_v2 }
 0x705   :  { %v1300_v25 = vmul.f32 %v1292_v35, %v1269_v3  ;;  %v1310_v5 = vpop.permute.xlu0 %1309  ;;  %v1302_v48 = vmul.f32 %v1294_v7, %v1277_v37  ;;  %v1314_v10 = vpop.permute.xlu1 %1313 }
 0x706   :  { %v1316_v11 = vsub.f32 0.0, %v1310_v5  ;;  %v1318_v15 = vsub.f32 0.0, %v1314_v10 }
 0x707   :  { %v1304_v16 = vadd.f32 %v1300_v25, %v1296_v57  ;;  %v1306_v43 = vadd.f32 %v1302_v48, %v1298_v26 }
 0x708   :  { %v1320_v6 = vsel %vm56_vm6, %v1310_v5, %v1316_v11  ;;  %v1322_v19 = vsel %vm56_vm6, %v1314_v10, %v1318_v15 }
 0x709   :  { %v1328_v9 = vmul.f32 %v1320_v6, %v1269_v3  ;;  %v1330_v63 = vmul.f32 %v1322_v19, %v1277_v37  ;;  %v1368_v51 = vmul.f32 %v1341_v47, %v1304_v16  ;;  %v1384_v30 = vmul.f32 %v1357_v28, %v1304_v16 }
 0x70a   :  { %v1370_v18 = vmul.f32 %v1349_v24, %v1306_v43  ;;  %v1386_v42 = vmul.f32 %v1365_v56, %v1306_v43  ;;  %v1325_v19 = vmul.f32 %v4393_v27, %v4365_v46  ;;  %v1323_v43 = vmul.f32 %v4397_v21, %v4367_v29 }
 0x70b   :  { %v1332_v17 = vadd.f32 %v1328_v9, %v1324_v14  ;;  %v1334_v41 = vadd.f32 %v1330_v63, %v1326_v33  ;;  %v1297_v9 = vmul.f32 %v4393_v27, %v4351_v31  ;;  %v1295_v33 = vmul.f32 %v4397_v21, %v4353_v8 }
 0x70d   :  { %v1372_v61 = vmul.f32 %v1357_v28, %v1332_v17  ;;  %v1380_v52 = vmul.f32 %v1341_v47, %v1332_v17  ;;  %v1374_v23 = vmul.f32 %v1365_v56, %v1334_v41  ;;  %v1382_v36 = vmul.f32 %v1349_v24, %v1334_v41 }
 0x70f   :  { %v1376_v38 = vsub.f32 %v1368_v51, %v1372_v61  ;;  %v1388_v22 = vadd.f32 %v1384_v30, %v1380_v52  ;;  %v1378_v3 = vsub.f32 %v1370_v18, %v1374_v23  ;;  %v1390_v2 = vadd.f32 %v1386_v42, %v1382_v36 }
 0x711   :  { %v4418_v35 = vmul.f32 %v1376_v38, %v3769_v34  ;;  %v1284_v4 = vpop.permute.xlu1 %1283  ;;  %v4421_v37 = vmul.f32 %v1378_v3, %v3769_v34  ;;  %v1280_v12 = vpop.permute.xlu0 %1279  ;;  %v4428_v28 = vmul.f32 %v1388_v22, %v3782_v0  ;;  %v4431_v25 = vmul.f32 %v1390_v2, %v3782_v0 }
 0x712   :  { %v1289_v47 = vsub.f32 0.0, %v1284_v4  ;;  %v1287_v24 = vsub.f32 0.0, %v1280_v12  ;;  %v3441_v22 = vmov 38   ;;  %v3442_v3 = vmov 10  }
 0x713   :  { %1433 = vrot.lane.b32.xlu0 %v4418_v35, %s3393_s13  ;;  %1437 = vrot.lane.b32.xlu1 %v4421_v37, %s3393_s13 }
 0x714   :  { %v1293_v11 = vsel %vm56_vm6, %v1284_v4, %v1289_v47  ;;  %v1291_v57 = vsel %vm56_vm6, %v1280_v12, %v1287_v24 }
 0x715   :  { %v1312_v56 = vpop.permute.xlu1 %1311  ;;  %v1308_v7 = vpop.permute.xlu0 %1307  ;;  %v1301_v26 = vmul.f32 %v1293_v11, %v4395_v1  ;;  %v1299_v14 = vmul.f32 %v1291_v57, %v4399_v55 }
 0x716   :  { %v1317_v5 = vsub.f32 0.0, %v1312_v56  ;;  %v1315_v48 = vsub.f32 0.0, %v1308_v7 }
 0x717   :  { %1469 = vrot.lane.b32.xlu0 %v4428_v28, %s3393_s13  ;;  %1473 = vrot.lane.b32.xlu1 %v4431_v25, %s3393_s13  ;;  %v1303_v63 = vadd.f32 %v1299_v14, %v1295_v33 }
 0x718   :  { %v1321_v10 = vsel %vm56_vm6, %v1312_v56, %v1317_v5  ;;  %v1319_v15 = vsel %vm56_vm6, %v1308_v7, %v1315_v48 }
 0x719   :  { %v1329_v6 = vmul.f32 %v1321_v10, %v4395_v1  ;;  %v1327_v16 = vmul.f32 %v1319_v15, %v4399_v55  ;;  %v1305_v1 = vadd.f32 %v1301_v26, %v1297_v9  ;;  %v1367_v29 = vmul.f32 %v4401_v62, %v1303_v63 }
 0x71b   :  { %1445 = vrot.lane.b32.xlu0 %v4421_v37, %s3397_s0  ;;  %1441 = vrot.lane.b32.xlu1 %v4418_v35, %s3397_s0  ;;  %v1333_v55 = vadd.f32 %v1329_v6, %v1325_v19  ;;  %v1331_v17 = vadd.f32 %v1327_v16, %v1323_v43  ;;  %v1369_v46 = vmul.f32 %v4403_v50, %v1305_v1 }
 0x71d   :  { %v1381_v27 = vmul.f32 %v4403_v50, %v1333_v55  ;;  %v1379_v30 = vmul.f32 %v4401_v62, %v1331_v17 }
 0x71f   :  { %1481 = vrot.lane.b32.xlu0 %v4431_v25, %s3397_s0  ;;  %1477 = vrot.lane.b32.xlu1 %v4428_v28, %s3397_s0 }
 0x722   :  { %v1361_v31 = vpop.permute.xlu1 %1360  ;;  %v1353_v41 = vpop.permute.xlu0 %1352 }
 0x723   :  { %v1373_v8 = vmul.f32 %v1361_v31, %v1333_v55  ;;  %v1385_v51 = vmul.f32 %v1361_v31, %v1305_v1  ;;  %v1371_v21 = vmul.f32 %v1353_v41, %v1331_v17  ;;  %v1383_v61 = vmul.f32 %v1353_v41, %v1303_v63 }
 0x725   :  { %v1377_v52 = vsub.f32 %v1369_v46, %v1373_v8  ;;  %v1389_v18 = vadd.f32 %v1385_v51, %v1381_v27  ;;  %v1375_v42 = vsub.f32 %v1367_v29, %v1371_v21  ;;  %v1387_v23 = vadd.f32 %v1383_v61, %v1379_v30 }
 0x727   :  { %v4470_v36 = vmul.f32 %v1377_v52, %v3769_v34  ;;  %v4473_v38 = vmul.f32 %v1375_v42, %v3769_v34  ;;  %v4480_v50 = vmul.f32 %v1389_v18, %v3782_v0  ;;  %v4483_v62 = vmul.f32 %v1387_v23, %v3782_v0  ;;  %v1405_v2 = vpop.permute.xlu1 %1404  ;;  %v1413_v12 = vpop.permute.xlu0 %1412 }
 0x728   :  { %v1458_v16 = vmul.f32 %v1413_v12, %v4421_v37  ;;  %v1456_v33 = vmul.f32 %v1405_v2, %v4418_v35  ;;  %v1494_v37 = vmul.f32 %v1413_v12, %v4431_v25  ;;  %v1492_v35 = vmul.f32 %v1405_v2, %v4428_v28 }
 0x729   :  { %1435 = vrot.lane.b32.xlu0 %v4470_v36, %s3393_s13  ;;  %1431 = vrot.lane.b32.xlu1 %v4473_v38, %s3393_s13 }
 0x72b   :  { %v4508_v24 = vpop.permute.xlu0 %1400 }
 0x72c   :  { %v1421_v4 = vpop.permute.xlu1 %1420 }
 0x72d   :  { %1471 = vrot.lane.b32.xlu0 %v4480_v50, %s3393_s13  ;;  %1467 = vrot.lane.b32.xlu1 %v4483_v62, %s3393_s13 }
 0x730   :  { %v1429_v47 = vpop.permute.xlu1 %1428  ;;  %v4510_v7 = vpop.permute.xlu0 %1416 }
 0x731   :  { %1443 = vrot.lane.b32.xlu0 %v4470_v36, %s3397_s0  ;;  %1439 = vrot.lane.b32.xlu1 %v4473_v38, %s3397_s0 }
 0x735   :  { %1479 = vrot.lane.b32.xlu0 %v4480_v50, %s3397_s0  ;;  %1475 = vrot.lane.b32.xlu1 %v4483_v62, %s3397_s0  ;;  %v1409_v56 = vpop.permute.xlu1 %1408 }
 0x736   :  { %v1457_v2 = vmul.f32 %v1409_v56, %v4470_v36 }
 0x739   :  { %1516 = vperm.xlu0 %3240, %v4382_v54   ;;  %1508 = vperm.xlu1 %3239, %v4379_v53  }
 0x73a   :  { %v1425_v5 = vpop.permute.xlu1 %1424 }
 0x73d   :  { %1504 = vperm.xlu0 %3240, %v4376_v45   ;;  %3241 = vset.pattern.permute.xlu1 %v3441_v22 }
 0x73e   :  { %1524 = vperm.xlu1 %3241, %v4379_v53  }
 0x741   :  { %3243 = vset.pattern.permute.xlu0 %v3441_v22 }
 0x742   :  { %1520 = vperm.xlu0 %3243, %v4376_v45   ;;  %1532 = vperm.xlu1 %3241, %v4382_v54  }
 0x746   :  { %3246 = vset.pattern.permute.xlu0 %v3442_v3  ;;  %3242 = vset.pattern.permute.xlu1 %v3440_v40 }
 0x747   :  { %1512 = vperm.xlu1 %3242, %v4373_v60  }
 0x74b   :  { %3244 = vset.pattern.permute.xlu1 %v3441_v22 }
 0x74c   :  { %1528 = vperm.xlu1 %3244, %v4373_v60  }
 0x750   :  { %3245 = vset.pattern.permute.xlu1 %v3442_v3 }
 0x785   :  { %v1434_v48 = vpop.permute.xlu0 %1433  ;;  %v1438_v11 = vpop.permute.xlu1 %1437 }
 0x786   :  { %v1450_v57 = vsub.f32 0.0, %v1438_v11  ;;  %v1448_v15 = vsub.f32 0.0, %v1434_v48 }
 0x789   :  { %v1470_v40 = vpop.permute.xlu0 %1469  ;;  %v1474_v10 = vpop.permute.xlu1 %1473 }
 0x78a   :  { %v1486_v43 = vsub.f32 0.0, %v1474_v10  ;;  %v1484_v55 = vsub.f32 0.0, %v1470_v40 }
 0x78d   :  { %v1446_v26 = vpop.permute.xlu0 %1445  ;;  %v1442_v14 = vpop.permute.xlu1 %1441 }
 0x78e   :  { %v1454_v6 = vsel %vm3518_vm0, %v1446_v26, %v1450_v57  ;;  %v1452_v19 = vsel %vm3518_vm0, %v1442_v14, %v1448_v15 }
 0x78f   :  { %v1462_v9 = vmul.f32 %v1454_v6, %v1429_v47  ;;  %v1460_v1 = vmul.f32 %v1452_v19, %v1421_v4  ;;  %v1493_v6 = vmul.f32 %v1409_v56, %v4480_v50  ;;  %v3443_v50 = vmov 42  }
 0x791   :  { %v4518_v63 = vadd.f32 %v1462_v9, %v1458_v16  ;;  %v1482_v17 = vpop.permute.xlu0 %1481  ;;  %v4520_v31 = vadd.f32 %v1460_v1, %v1456_v33  ;;  %v1478_v46 = vpop.permute.xlu1 %1477 }
 0x792   :  { %v1490_v41 = vsel %vm3518_vm0, %v1482_v17, %v1486_v43  ;;  %v1488_v8 = vsel %vm3518_vm0, %v1478_v46, %v1484_v55 }
 0x793   :  { %v1498_v27 = vmul.f32 %v1490_v41, %v1429_v47  ;;  %1541 = vrot.lane.b32.xlu1 %v4518_v63, %s3400_s14  ;;  %v1496_v51 = vmul.f32 %v1488_v8, %v1421_v4  ;;  %1537 = vrot.lane.b32.xlu0 %v4520_v31, %s3400_s14  ;;  %v1455_v47 = vmul.f32 %v4508_v24, %v4473_v38 }
 0x794   :  { %v1491_v38 = vmul.f32 %v4508_v24, %v4483_v62  ;;  %v3444_v62 = vmov 14  }
 0x795   :  { %v4532_v29 = vadd.f32 %v1498_v27, %v1494_v37  ;;  %v4534_v21 = vadd.f32 %v1496_v51, %v1492_v35 }
 0x797   :  { %1577 = vrot.lane.b32.xlu1 %v4532_v29, %s3400_s14  ;;  %1573 = vrot.lane.b32.xlu0 %v4534_v21, %s3400_s14 }
 0x79b   :  { %1545 = vrot.lane.b32.xlu1 %v4520_v31, %s3401_s15  ;;  %v1436_v25 = vpop.permute.xlu0 %1435  ;;  %1549 = vrot.lane.b32.xlu0 %v4518_v63, %s3401_s15  ;;  %v1432_v28 = vpop.permute.xlu1 %1431 }
 0x79c   :  { %v1449_v52 = vsub.f32 0.0, %v1436_v25  ;;  %v1447_v18 = vsub.f32 0.0, %v1432_v28 }
 0x79f   :  { %1581 = vrot.lane.b32.xlu1 %v4534_v21, %s3401_s15  ;;  %v1472_v30 = vpop.permute.xlu0 %1471  ;;  %1585 = vrot.lane.b32.xlu0 %v4532_v29, %s3401_s15  ;;  %v1468_v61 = vpop.permute.xlu1 %1467 }
 0x7a0   :  { %v1485_v48 = vsub.f32 0.0, %v1472_v30  ;;  %v1483_v40 = vsub.f32 0.0, %v1468_v61 }
 0x7a3   :  { %v1444_v42 = vpop.permute.xlu0 %1443  ;;  %v1440_v22 = vpop.permute.xlu1 %1439 }
 0x7a4   :  { %v1453_v23 = vsel %vm3518_vm0, %v1444_v42, %v1449_v52  ;;  %v1451_v12 = vsel %vm3518_vm0, %v1440_v22, %v1447_v18 }
 0x7a5   :  { %v1461_v4 = vmul.f32 %v1453_v23, %v1425_v5  ;;  %v1459_v11 = vmul.f32 %v1451_v12, %v4510_v7 }
 0x7a7   :  { %v4556_v10 = vadd.f32 %v1461_v4, %v1457_v2  ;;  %v1480_v57 = vpop.permute.xlu0 %1479  ;;  %v4558_v15 = vadd.f32 %v1459_v11, %v1455_v47  ;;  %v1476_v36 = vpop.permute.xlu1 %1475 }
 0x7a8   :  { %v1489_v26 = vsel %vm3518_vm0, %v1480_v57, %v1485_v48  ;;  %v1487_v16 = vsel %vm3518_vm0, %v1476_v36, %v1483_v40 }
 0x7a9   :  { %v1497_v14 = vmul.f32 %v1489_v26, %v1425_v5  ;;  %1539 = vrot.lane.b32.xlu0 %v4556_v10, %s3400_s14  ;;  %v1495_v9 = vmul.f32 %v1487_v16, %v4510_v7  ;;  %1535 = vrot.lane.b32.xlu1 %v4558_v15, %s3400_s14 }
 0x7ab   :  { %v4572_v19 = vadd.f32 %v1497_v14, %v1493_v6  ;;  %v4574_v33 = vadd.f32 %v1495_v9, %v1491_v38 }
 0x7ad   :  { %1575 = vrot.lane.b32.xlu0 %v4572_v19, %s3400_s14  ;;  %1571 = vrot.lane.b32.xlu1 %v4574_v33, %s3400_s14 }
 0x7b1   :  { %1547 = vrot.lane.b32.xlu0 %v4556_v10, %s3401_s15  ;;  %1543 = vrot.lane.b32.xlu1 %v4558_v15, %s3401_s15 }
 0x7b4   :  { %v1509_v24 = vpop.permute.xlu1 %1508  ;;  %v1517_v5 = vpop.permute.xlu0 %1516 }
 0x7b5   :  { %1583 = vrot.lane.b32.xlu0 %v4572_v19, %s3401_s15  ;;  %1579 = vrot.lane.b32.xlu1 %v4574_v33, %s3401_s15  ;;  %v1560_v28 = vmul.f32 %v1509_v24, %v4520_v31  ;;  %v1562_v52 = vmul.f32 %v1517_v5, %v4518_v63  ;;  %v1596_v31 = vmul.f32 %v1509_v24, %v4534_v21 }
 0x7b6   :  { %v1598_v63 = vmul.f32 %v1517_v5, %v4532_v29 }
 0x7b8   :  { %v4599_v1 = vpop.permute.xlu0 %1504 }
 0x7b9   :  { %1620 = vperm.xlu0 %3246, %v4382_v54   ;;  %1612 = vperm.xlu1 %3245, %v4379_v53   ;;  %v1525_v56 = vpop.permute.xlu1 %1524  ;;  %v1559_v5 = vmul.f32 %v4599_v1, %v4558_v15  ;;  %v1595_v15 = vmul.f32 %v4599_v1, %v4574_v33  ;;  %v3446_v33 = vmov 18  }
 0x7bd   :  { %1608 = vperm.xlu0 %3246, %v4376_v45   ;;  %3247 = vset.pattern.permute.xlu1 %v3443_v50  ;;  %v1533_v7 = vpop.permute.xlu1 %1532  ;;  %v4601_v17 = vpop.permute.xlu0 %1520 }
 0x7be   :  { %1628 = vperm.xlu1 %3247, %v4379_v53  }
 0x7c1   :  { %3249 = vset.pattern.permute.xlu0 %v3443_v50 }
 0x7c2   :  { %1624 = vperm.xlu0 %3249, %v4376_v45   ;;  %1636 = vperm.xlu1 %3247, %v4382_v54   ;;  %v1513_v43 = vpop.permute.xlu1 %1512 }
 0x7c3   :  { %v1561_v24 = vmul.f32 %v1513_v43, %v4556_v10 }
 0x7c6   :  { %3252 = vset.pattern.permute.xlu0 %v3444_v62  ;;  %3248 = vset.pattern.permute.xlu1 %v3442_v3 }
 0x7c7   :  { %1616 = vperm.xlu1 %3248, %v4373_v60   ;;  %v1529_v55 = vpop.permute.xlu1 %1528 }
 0x7cb   :  { %3250 = vset.pattern.permute.xlu1 %v3443_v50 }
 0x7cc   :  { %1632 = vperm.xlu1 %3250, %v4373_v60  }
 0x7d0   :  { %3251 = vset.pattern.permute.xlu1 %v3444_v62 }
 0x805   :  { %v1542_v41 = vpop.permute.xlu1 %1541  ;;  %v1538_v46 = vpop.permute.xlu0 %1537 }
 0x806   :  { %v1552_v27 = vsub.f32 0.0, %v1538_v46  ;;  %v1554_v8 = vsub.f32 0.0, %v1542_v41 }
 0x809   :  { %v1578_v3 = vpop.permute.xlu1 %1577  ;;  %v1574_v37 = vpop.permute.xlu0 %1573 }
 0x80a   :  { %v1588_v18 = vsub.f32 0.0, %v1574_v37  ;;  %v1590_v23 = vsub.f32 0.0, %v1578_v3 }
 0x80d   :  { %v1546_v35 = vpop.permute.xlu1 %1545  ;;  %v1550_v51 = vpop.permute.xlu0 %1549 }
 0x80e   :  { %v1556_v25 = vsel %vm31_vm1, %v1546_v35, %v1552_v27  ;;  %v1558_v30 = vsel %vm31_vm1, %v1550_v51, %v1554_v8  ;;  %v1597_v51 = vmul.f32 %v1513_v43, %v4572_v19  ;;  %v3445_v19 = vmov 46  }
 0x80f   :  { %v1564_v61 = vmul.f32 %v1556_v25, %v1525_v56  ;;  %v1566_v42 = vmul.f32 %v1558_v30, %v1533_v7 }
 0x811   :  { %v4609_v22 = vadd.f32 %v1564_v61, %v1560_v28  ;;  %v1582_v2 = vpop.permute.xlu1 %1581  ;;  %v4611_v4 = vadd.f32 %v1566_v42, %v1562_v52  ;;  %v1586_v12 = vpop.permute.xlu0 %1585 }
 0x812   :  { %v1592_v47 = vsel %vm31_vm1, %v1582_v2, %v1588_v18  ;;  %v1594_v48 = vsel %vm31_vm1, %v1586_v12, %v1590_v23 }
 0x813   :  { %v1600_v11 = vmul.f32 %v1592_v47, %v1525_v56  ;;  %1641 = vrot.lane.b32.xlu0 %v4609_v22, %s3404_s16  ;;  %v1602_v40 = vmul.f32 %v1594_v48, %v1533_v7  ;;  %1645 = vrot.lane.b32.xlu1 %v4611_v4, %s3404_s16 }
 0x815   :  { %v4623_v57 = vadd.f32 %v1600_v11, %v1596_v31  ;;  %v4625_v26 = vadd.f32 %v1602_v40, %v1598_v63 }
 0x817   :  { %1677 = vrot.lane.b32.xlu0 %v4623_v57, %s3404_s16  ;;  %1681 = vrot.lane.b32.xlu1 %v4625_v26, %s3404_s16 }
 0x81b   :  { %1653 = vrot.lane.b32.xlu0 %v4611_v4, %s3405_s17  ;;  %v1540_v21 = vpop.permute.xlu0 %1539  ;;  %1649 = vrot.lane.b32.xlu1 %v4609_v22, %s3405_s17  ;;  %v1536_v29 = vpop.permute.xlu1 %1535 }
 0x81c   :  { %v1553_v14 = vsub.f32 0.0, %v1540_v21  ;;  %v1551_v16 = vsub.f32 0.0, %v1536_v29 }
 0x81f   :  { %1689 = vrot.lane.b32.xlu0 %v4625_v26, %s3405_s17  ;;  %v1576_v36 = vpop.permute.xlu0 %1575  ;;  %1685 = vrot.lane.b32.xlu1 %v4623_v57, %s3405_s17  ;;  %v1572_v6 = vpop.permute.xlu1 %1571 }
 0x820   :  { %v1589_v41 = vsub.f32 0.0, %v1576_v36  ;;  %v1587_v3 = vsub.f32 0.0, %v1572_v6 }
 0x823   :  { %v1548_v38 = vpop.permute.xlu0 %1547  ;;  %v1544_v50 = vpop.permute.xlu1 %1543 }
 0x824   :  { %v1557_v9 = vsel %vm31_vm1, %v1548_v38, %v1553_v14  ;;  %v1555_v7 = vsel %vm31_vm1, %v1544_v50, %v1551_v16 }
 0x825   :  { %v1565_v56 = vmul.f32 %v1557_v9, %v1529_v55  ;;  %v1563_v46 = vmul.f32 %v1555_v7, %v4601_v17 }
 0x827   :  { %v4647_v37 = vadd.f32 %v1565_v56, %v1561_v24  ;;  %v1584_v27 = vpop.permute.xlu0 %1583  ;;  %v4649_v8 = vadd.f32 %v1563_v46, %v1559_v5  ;;  %v1580_v10 = vpop.permute.xlu1 %1579 }
 0x828   :  { %v1593_v35 = vsel %vm31_vm1, %v1584_v27, %v1589_v41  ;;  %v1591_v28 = vsel %vm31_vm1, %v1580_v10, %v1587_v3 }
 0x829   :  { %v1601_v25 = vmul.f32 %v1593_v35, %v1529_v55  ;;  %1643 = vrot.lane.b32.xlu0 %v4647_v37, %s3404_s16  ;;  %v1599_v30 = vmul.f32 %v1591_v28, %v4601_v17  ;;  %1639 = vrot.lane.b32.xlu1 %v4649_v8, %s3404_s16 }
 0x82b   :  { %v4663_v61 = vadd.f32 %v1601_v25, %v1597_v51  ;;  %v4665_v52 = vadd.f32 %v1599_v30, %v1595_v15 }
 0x82d   :  { %1679 = vrot.lane.b32.xlu0 %v4663_v61, %s3404_s16  ;;  %1675 = vrot.lane.b32.xlu1 %v4665_v52, %s3404_s16 }
 0x831   :  { %1651 = vrot.lane.b32.xlu0 %v4647_v37, %s3405_s17  ;;  %1647 = vrot.lane.b32.xlu1 %v4649_v8, %s3405_s17 }
 0x834   :  { %v1613_v43 = vpop.permute.xlu1 %1612  ;;  %v1621_v55 = vpop.permute.xlu0 %1620 }
 0x835   :  { %1687 = vrot.lane.b32.xlu0 %v4663_v61, %s3405_s17  ;;  %1683 = vrot.lane.b32.xlu1 %v4665_v52, %s3405_s17  ;;  %v1666_v29 = vmul.f32 %v1621_v55, %v4611_v4  ;;  %v1664_v14 = vmul.f32 %v1613_v43, %v4609_v22  ;;  %v1702_v4 = vmul.f32 %v1621_v55, %v4625_v26 }
 0x836   :  { %v1700_v22 = vmul.f32 %v1613_v43, %v4623_v57 }
 0x838   :  { %v4690_v18 = vpop.permute.xlu0 %1608 }
 0x839   :  { %1724 = vperm.xlu0 %3252, %v4382_v54   ;;  %1716 = vperm.xlu1 %3251, %v4379_v53   ;;  %v1629_v1 = vpop.permute.xlu1 %1628 }
 0x83d   :  { %1712 = vperm.xlu0 %3252, %v4376_v45   ;;  %3253 = vset.pattern.permute.xlu1 %v3445_v19  ;;  %v1637_v17 = vpop.permute.xlu1 %1636  ;;  %v4692_v23 = vpop.permute.xlu0 %1624 }
 0x83e   :  { %1732 = vperm.xlu1 %3253, %v4379_v53  }
 0x841   :  { %3255 = vset.pattern.permute.xlu0 %v3445_v19 }
 0x842   :  { %1728 = vperm.xlu0 %3255, %v4376_v45   ;;  %1740 = vperm.xlu1 %3253, %v4382_v54   ;;  %v1617_v42 = vpop.permute.xlu1 %1616 }
 0x843   :  { %v1665_v43 = vmul.f32 %v1617_v42, %v4647_v37 }
 0x846   :  { %3258 = vset.pattern.permute.xlu0 %v3446_v33  ;;  %3254 = vset.pattern.permute.xlu1 %v3444_v62 }
 0x847   :  { %1720 = vperm.xlu1 %3254, %v4373_v60   ;;  %v1633_v2 = vpop.permute.xlu1 %1632 }
 0x84b   :  { %3256 = vset.pattern.permute.xlu1 %v3445_v19 }
 0x84c   :  { %1736 = vperm.xlu1 %3256, %v4373_v60  }
 0x850   :  { %3257 = vset.pattern.permute.xlu1 %v3446_v33 }
 0x885   :  { %v1642_v12 = vpop.permute.xlu0 %1641  ;;  %v1646_v47 = vpop.permute.xlu1 %1645 }
 0x886   :  { %v1658_v48 = vsub.f32 0.0, %v1646_v47  ;;  %v1656_v11 = vsub.f32 0.0, %v1642_v12 }
 0x889   :  { %v1678_v62 = vpop.permute.xlu0 %1677  ;;  %v1682_v31 = vpop.permute.xlu1 %1681 }
 0x88a   :  { %v1694_v16 = vsub.f32 0.0, %v1682_v31  ;;  %v1692_v9 = vsub.f32 0.0, %v1678_v62 }
 0x88d   :  { %v1654_v63 = vpop.permute.xlu0 %1653  ;;  %v1650_v21 = vpop.permute.xlu1 %1649 }
 0x88e   :  { %v1662_v40 = vsel %vm36_vm2, %v1654_v63, %v1658_v48  ;;  %v1660_v6 = vsel %vm36_vm2, %v1650_v21, %v1656_v11 }
 0x88f   :  { %v1670_v36 = vmul.f32 %v1662_v40, %v1637_v17  ;;  %v1668_v38 = vmul.f32 %v1660_v6, %v1629_v1  ;;  %v1701_v40 = vmul.f32 %v1617_v42, %v4663_v61  ;;  %v3447_v61 = vmov 50  }
 0x891   :  { %v4700_v50 = vadd.f32 %v1670_v36, %v1666_v29  ;;  %v1690_v24 = vpop.permute.xlu0 %1689  ;;  %v4702_v56 = vadd.f32 %v1668_v38, %v1664_v14  ;;  %v1686_v5 = vpop.permute.xlu1 %1685 }
 0x892   :  { %v1698_v7 = vsel %vm36_vm2, %v1690_v24, %v1694_v16  ;;  %v1696_v46 = vsel %vm36_vm2, %v1686_v5, %v1692_v9 }
 0x893   :  { %v1706_v41 = vmul.f32 %v1698_v7, %v1637_v17  ;;  %1749 = vrot.lane.b32.xlu1 %v4700_v50, %s3408_s18  ;;  %v1704_v3 = vmul.f32 %v1696_v46, %v1629_v1  ;;  %1745 = vrot.lane.b32.xlu0 %v4702_v56, %s3408_s18  ;;  %v1663_v17 = vmul.f32 %v4690_v18, %v4649_v8 }
 0x894   :  { %v1699_v8 = vmul.f32 %v4690_v18, %v4665_v52  ;;  %v3448_v52 = vmov 22  }
 0x895   :  { %v4714_v27 = vadd.f32 %v1706_v41, %v1702_v4  ;;  %v4716_v35 = vadd.f32 %v1704_v3, %v1700_v22 }
 0x897   :  { %1785 = vrot.lane.b32.xlu1 %v4714_v27, %s3408_s18  ;;  %1781 = vrot.lane.b32.xlu0 %v4716_v35, %s3408_s18 }
 0x89b   :  { %1753 = vrot.lane.b32.xlu1 %v4702_v56, %s3391_s10  ;;  %v1644_v26 = vpop.permute.xlu0 %1643  ;;  %1757 = vrot.lane.b32.xlu0 %v4700_v50, %s3391_s10  ;;  %v1640_v57 = vpop.permute.xlu1 %1639 }
 0x89c   :  { %v1657_v25 = vsub.f32 0.0, %v1644_v26  ;;  %v1655_v28 = vsub.f32 0.0, %v1640_v57 }
 0x89f   :  { %1789 = vrot.lane.b32.xlu1 %v4716_v35, %s3391_s10  ;;  %v1680_v10 = vpop.permute.xlu0 %1679  ;;  %1793 = vrot.lane.b32.xlu0 %v4714_v27, %s3391_s10  ;;  %v1676_v51 = vpop.permute.xlu1 %1675 }
 0x8a0   :  { %v1693_v12 = vsub.f32 0.0, %v1680_v10  ;;  %v1691_v62 = vsub.f32 0.0, %v1676_v51 }
 0x8a3   :  { %v1652_v15 = vpop.permute.xlu0 %1651  ;;  %v1648_v19 = vpop.permute.xlu1 %1647 }
 0x8a4   :  { %v1661_v30 = vsel %vm36_vm2, %v1652_v15, %v1657_v25  ;;  %v1659_v55 = vsel %vm36_vm2, %v1648_v19, %v1655_v28 }
 0x8a5   :  { %v1669_v1 = vmul.f32 %v1661_v30, %v1633_v2  ;;  %v1667_v47 = vmul.f32 %v1659_v55, %v4692_v23 }
 0x8a7   :  { %v4738_v31 = vadd.f32 %v1669_v1, %v1665_v43  ;;  %v1688_v48 = vpop.permute.xlu0 %1687  ;;  %v4740_v11 = vadd.f32 %v1667_v47, %v1663_v17  ;;  %v1684_v37 = vpop.permute.xlu1 %1683 }
 0x8a8   :  { %v1697_v63 = vsel %vm36_vm2, %v1688_v48, %v1693_v12  ;;  %v1695_v29 = vsel %vm36_vm2, %v1684_v37, %v1691_v62 }
 0x8a9   :  { %v1705_v21 = vmul.f32 %v1697_v63, %v1633_v2  ;;  %1747 = vrot.lane.b32.xlu0 %v4738_v31, %s3408_s18  ;;  %v1703_v36 = vmul.f32 %v1695_v29, %v4692_v23  ;;  %1743 = vrot.lane.b32.xlu1 %v4740_v11, %s3408_s18 }
 0x8ab   :  { %v4754_v6 = vadd.f32 %v1705_v21, %v1701_v40  ;;  %v4756_v14 = vadd.f32 %v1703_v36, %v1699_v8 }
 0x8ad   :  { %1783 = vrot.lane.b32.xlu0 %v4754_v6, %s3408_s18  ;;  %1779 = vrot.lane.b32.xlu1 %v4756_v14, %s3408_s18 }
 0x8b1   :  { %1755 = vrot.lane.b32.xlu0 %v4738_v31, %s3391_s10  ;;  %1751 = vrot.lane.b32.xlu1 %v4740_v11, %s3391_s10 }
 0x8b4   :  { %v1717_v18 = vpop.permute.xlu1 %1716  ;;  %v1725_v23 = vpop.permute.xlu0 %1724 }
 0x8b5   :  { %1791 = vrot.lane.b32.xlu0 %v4754_v6, %s3391_s10  ;;  %1787 = vrot.lane.b32.xlu1 %v4756_v14, %s3391_s10  ;;  %v1768_v22 = vmul.f32 %v1717_v18, %v4702_v56  ;;  %v1770_v57 = vmul.f32 %v1725_v23, %v4700_v50  ;;  %v1804_v56 = vmul.f32 %v1717_v18, %v4716_v35 }
 0x8b6   :  { %v1806_v50 = vmul.f32 %v1725_v23, %v4714_v27 }
 0x8b9   :  { %1828 = vperm.xlu0 %3258, %v4382_v54   ;;  %1820 = vperm.xlu1 %3257, %v4379_v53   ;;  %v1733_v42 = vpop.permute.xlu1 %1732 }
 0x8bd   :  { %1816 = vperm.xlu0 %3258, %v4376_v45   ;;  %3259 = vset.pattern.permute.xlu1 %v3447_v61 }
 0x8be   :  { %1836 = vperm.xlu1 %3259, %v4379_v53   ;;  %v1741_v53 = vpop.permute.xlu1 %1740 }
 0x8c1   :  { %3261 = vset.pattern.permute.xlu0 %v3447_v61 }
 0x8c2   :  { %1832 = vperm.xlu0 %3261, %v4376_v45   ;;  %1844 = vperm.xlu1 %3259, %v4382_v54   ;;  %v1721_v2 = vpop.permute.xlu1 %1720  ;;  %v4781_v45 = vpop.permute.xlu0 %1712 }
 0x8c3   :  { %v1769_v8 = vmul.f32 %v1721_v2, %v4738_v31  ;;  %v1767_v18 = vmul.f32 %v4781_v45, %v4740_v11  ;;  %v1803_v11 = vmul.f32 %v4781_v45, %v4756_v14  ;;  %v4865_v14 = vld [vmem:[#allocation2] sm:$0xff]  ;;  %v4870_v45 = vld [vmem:[#allocation2 + $0x18] sm:$0xff] }
 0x8c6   :  { %3264 = vset.pattern.permute.xlu0 %v3448_v52  ;;  %3260 = vset.pattern.permute.xlu1 %v3446_v33  ;;  %v4783_v38 = vpop.permute.xlu0 %1728 }
 0x8c7   :  { %1824 = vperm.xlu1 %3260, %v4373_v60   ;;  %v1737_v16 = vpop.permute.xlu1 %1736 }
 0x8cb   :  { %3262 = vset.pattern.permute.xlu1 %v3447_v61 }
 0x8cc   :  { %1840 = vperm.xlu1 %3262, %v4373_v60  }
 0x8d0   :  { %3263 = vset.pattern.permute.xlu1 %v3448_v52 }
 0x905   :  { %v1750_v9 = vpop.permute.xlu1 %1749  ;;  %v1746_v24 = vpop.permute.xlu0 %1745 }
 0x906   :  { %v1760_v5 = vsub.f32 0.0, %v1746_v24  ;;  %v1762_v4 = vsub.f32 0.0, %v1750_v9 }
 0x909   :  { %v1786_v33 = vpop.permute.xlu1 %1785  ;;  %v1782_v7 = vpop.permute.xlu0 %1781 }
 0x90a   :  { %v1796_v10 = vsub.f32 0.0, %v1782_v7  ;;  %v1798_v25 = vsub.f32 0.0, %v1786_v33 }
 0x90d   :  { %v1754_v41 = vpop.permute.xlu1 %1753  ;;  %v1758_v60 = vpop.permute.xlu0 %1757 }
 0x90e   :  { %v1764_v46 = vsel %vm41_vm3, %v1754_v41, %v1760_v5  ;;  %v1766_v3 = vsel %vm41_vm3, %v1758_v60, %v1762_v4  ;;  %v1805_v5 = vmul.f32 %v1721_v2, %v4754_v6  ;;  %v4862_v6 = vld [vmem:[#allocation2 + $0x8] sm:$0xff]  ;;  %v3449_v2 = vmov 54  }
 0x90f   :  { %v1772_v26 = vmul.f32 %v1764_v46, %v1733_v42  ;;  %v1774_v51 = vmul.f32 %v1766_v3, %v1741_v53 }
 0x911   :  { %v4791_v28 = vadd.f32 %v1772_v26, %v1768_v22  ;;  %v1790_v15 = vpop.permute.xlu1 %1789  ;;  %v4793_v30 = vadd.f32 %v1774_v51, %v1770_v57  ;;  %v1794_v19 = vpop.permute.xlu0 %1793 }
 0x912   :  { %v1800_v43 = vsel %vm41_vm3, %v1790_v15, %v1796_v10  ;;  %v1802_v1 = vsel %vm41_vm3, %v1794_v19, %v1798_v25 }
 0x913   :  { %v1808_v55 = vmul.f32 %v1800_v43, %v1733_v42  ;;  %1849 = vrot.lane.b32.xlu0 %v4791_v28, %s3411_s19  ;;  %v1810_v17 = vmul.f32 %v1802_v1, %v1741_v53  ;;  %1853 = vrot.lane.b32.xlu1 %v4793_v30, %s3411_s19 }
 0x915   :  { %v4805_v12 = vadd.f32 %v1808_v55, %v1804_v56  ;;  %v4807_v47 = vadd.f32 %v1810_v17, %v1806_v50 }
 0x917   :  { %1885 = vrot.lane.b32.xlu0 %v4805_v12, %s3411_s19  ;;  %1889 = vrot.lane.b32.xlu1 %v4807_v47, %s3411_s19 }
 0x91b   :  { %1861 = vrot.lane.b32.xlu0 %v4793_v30, %s3412_s20  ;;  %v1748_v35 = vpop.permute.xlu0 %1747  ;;  %1857 = vrot.lane.b32.xlu1 %v4791_v28, %s3412_s20  ;;  %v1744_v27 = vpop.permute.xlu1 %1743 }
 0x91c   :  { %v1761_v63 = vsub.f32 0.0, %v1748_v35  ;;  %v1759_v37 = vsub.f32 0.0, %v1744_v27 }
 0x91f   :  { %1897 = vrot.lane.b32.xlu0 %v4807_v47, %s3412_s20  ;;  %v1784_v62 = vpop.permute.xlu0 %1783  ;;  %1893 = vrot.lane.b32.xlu1 %v4805_v12, %s3412_s20  ;;  %v1780_v48 = vpop.permute.xlu1 %1779 }
 0x920   :  { %v1797_v42 = vsub.f32 0.0, %v1784_v62  ;;  %v1795_v23 = vsub.f32 0.0, %v1780_v48 }
 0x923   :  { %v1756_v40 = vpop.permute.xlu0 %1755  ;;  %v1752_v29 = vpop.permute.xlu1 %1751 }
 0x924   :  { %v1765_v21 = vsel %vm41_vm3, %v1756_v40, %v1761_v63  ;;  %v1763_v61 = vsel %vm41_vm3, %v1752_v29, %v1759_v37 }
 0x925   :  { %v1773_v36 = vmul.f32 %v1765_v21, %v1737_v16  ;;  %v1771_v53 = vmul.f32 %v1763_v61, %v4783_v38 }
 0x927   :  { %v4829_v9 = vadd.f32 %v1773_v36, %v1769_v8  ;;  %v1792_v24 = vpop.permute.xlu0 %1791  ;;  %v4831_v33 = vadd.f32 %v1771_v53, %v1767_v18  ;;  %v1788_v31 = vpop.permute.xlu1 %1787 }
 0x928   :  { %v1801_v7 = vsel %vm41_vm3, %v1792_v24, %v1797_v42  ;;  %v1799_v41 = vsel %vm41_vm3, %v1788_v31, %v1795_v23 }
 0x929   :  { %v1809_v4 = vmul.f32 %v1801_v7, %v1737_v16  ;;  %1851 = vrot.lane.b32.xlu0 %v4829_v9, %s3411_s19  ;;  %v1807_v60 = vmul.f32 %v1799_v41, %v4783_v38  ;;  %1847 = vrot.lane.b32.xlu1 %v4831_v33, %s3411_s19  ;;  %v4875_v16 = vld [vmem:[#allocation2 + $0x10] sm:$0xff] }
 0x92b   :  { %v4845_v46 = vadd.f32 %v1809_v4, %v1805_v5  ;;  %v4847_v22 = vadd.f32 %v1807_v60, %v1803_v11 }
 0x92d   :  { %1887 = vrot.lane.b32.xlu0 %v4845_v46, %s3411_s19  ;;  %1883 = vrot.lane.b32.xlu1 %v4847_v22, %s3411_s19 }
 0x931   :  { %1859 = vrot.lane.b32.xlu0 %v4829_v9, %s3412_s20  ;;  %1855 = vrot.lane.b32.xlu1 %v4831_v33, %s3412_s20 }
 0x934   :  { %v1821_v38 = vpop.permute.xlu1 %1820  ;;  %v1829_v26 = vpop.permute.xlu0 %1828 }
 0x935   :  { %1895 = vrot.lane.b32.xlu0 %v4845_v46, %s3412_s20  ;;  %1891 = vrot.lane.b32.xlu1 %v4847_v22, %s3412_s20  ;;  %v1874_v27 = vmul.f32 %v1829_v26, %v4793_v30  ;;  %v1872_v63 = vmul.f32 %v1821_v38, %v4791_v28  ;;  %v1910_v30 = vmul.f32 %v1829_v26, %v4807_v47 }
 0x936   :  { %v1908_v28 = vmul.f32 %v1821_v38, %v4805_v12 }
 0x938   :  { %v4880_v10 = vpop.permute.xlu0 %1816 }
 0x939   :  { %1932 = vperm.xlu0 %3264, %v4382_v54   ;;  %1924 = vperm.xlu1 %3263, %v4862_v6   ;;  %v3450_v54 = vmov 26   ;;  %v1837_v3 = vpop.permute.xlu1 %1836 }
 0x93d   :  { %1920 = vperm.xlu0 %3264, %v4865_v14   ;;  %3265 = vset.pattern.permute.xlu1 %v3449_v2  ;;  %v1845_v57 = vpop.permute.xlu1 %1844  ;;  %v4882_v25 = vpop.permute.xlu0 %1832 }
 0x93e   :  { %1940 = vperm.xlu1 %3265, %v4862_v6  }
 0x941   :  { %3267 = vset.pattern.permute.xlu0 %v3449_v2 }
 0x942   :  { %1936 = vperm.xlu0 %3267, %v4865_v14   ;;  %1948 = vperm.xlu1 %3265, %v4870_v45   ;;  %v1825_v51 = vpop.permute.xlu1 %1824 }
 0x943   :  { %v1873_v38 = vmul.f32 %v1825_v51, %v4829_v9 }
 0x946   :  { %3270 = vset.pattern.permute.xlu0 %v3450_v54  ;;  %3266 = vset.pattern.permute.xlu1 %v3448_v52 }
 0x947   :  { %1928 = vperm.xlu1 %3266, %v4875_v16   ;;  %v1841_v15 = vpop.permute.xlu1 %1840 }
 0x94b   :  { %3268 = vset.pattern.permute.xlu1 %v3449_v2 }
 0x94c   :  { %1944 = vperm.xlu1 %3268, %v4875_v16  }
 0x950   :  { %3269 = vset.pattern.permute.xlu1 %v3450_v54 }
 0x985   :  { %v1850_v52 = vpop.permute.xlu0 %1849  ;;  %v1854_v19 = vpop.permute.xlu1 %1853 }
 0x986   :  { %v1866_v1 = vsub.f32 0.0, %v1854_v19  ;;  %v1864_v55 = vsub.f32 0.0, %v1850_v52 }
 0x989   :  { %v1886_v43 = vpop.permute.xlu0 %1885  ;;  %v1890_v56 = vpop.permute.xlu1 %1889 }
 0x98a   :  { %v1902_v37 = vsub.f32 0.0, %v1890_v56  ;;  %v1900_v21 = vsub.f32 0.0, %v1886_v43 }
 0x98d   :  { %v1862_v50 = vpop.permute.xlu0 %1861  ;;  %v1858_v35 = vpop.permute.xlu1 %1857 }
 0x98e   :  { %v1870_v17 = vsel %vm46_vm4, %v1862_v50, %v1866_v1  ;;  %v1868_v48 = vsel %vm46_vm4, %v1858_v35, %v1864_v55 }
 0x98f   :  { %v1878_v62 = vmul.f32 %v1870_v17, %v1845_v57  ;;  %v1876_v40 = vmul.f32 %v1868_v48, %v1837_v3  ;;  %v1909_v17 = vmul.f32 %v1825_v51, %v4845_v46  ;;  %v3451_v46 = vmov 58  }
 0x991   :  { %v4890_v29 = vadd.f32 %v1878_v62, %v1874_v27  ;;  %v1898_v8 = vpop.permute.xlu0 %1897  ;;  %v4892_v36 = vadd.f32 %v1876_v40, %v1872_v63  ;;  %v1894_v18 = vpop.permute.xlu1 %1893 }
 0x992   :  { %v1906_v61 = vsel %vm46_vm4, %v1898_v8, %v1902_v37  ;;  %v1904_v53 = vsel %vm46_vm4, %v1894_v18, %v1900_v21 }
 0x993   :  { %v1914_v42 = vmul.f32 %v1906_v61, %v1845_v57  ;;  %1957 = vrot.lane.b32.xlu1 %v4890_v29, %s3415_s21  ;;  %v1912_v23 = vmul.f32 %v1904_v53, %v1837_v3  ;;  %1953 = vrot.lane.b32.xlu0 %v4892_v36, %s3415_s21  ;;  %v1871_v57 = vmul.f32 %v4880_v10, %v4831_v33 }
 0x994   :  { %v1907_v33 = vmul.f32 %v4880_v10, %v4847_v22  ;;  %v3452_v22 = vmov 30   ;;  %v3453_v10 = vmov 62  }
 0x995   :  { %v4904_v24 = vadd.f32 %v1914_v42, %v1910_v30  ;;  %v4906_v7 = vadd.f32 %v1912_v23, %v1908_v28 }
 0x997   :  { %1993 = vrot.lane.b32.xlu1 %v4904_v24, %s3415_s21  ;;  %1989 = vrot.lane.b32.xlu0 %v4906_v7, %s3415_s21 }
 0x99b   :  { %1961 = vrot.lane.b32.xlu1 %v4892_v36, %s3416_s22  ;;  %v1852_v47 = vpop.permute.xlu0 %1851  ;;  %1965 = vrot.lane.b32.xlu0 %v4890_v29, %s3416_s22  ;;  %v1848_v12 = vpop.permute.xlu1 %1847 }
 0x99c   :  { %v1865_v4 = vsub.f32 0.0, %v1852_v47  ;;  %v1863_v41 = vsub.f32 0.0, %v1848_v12 }
 0x99f   :  { %1997 = vrot.lane.b32.xlu1 %v4906_v7, %s3416_s22  ;;  %v1888_v31 = vpop.permute.xlu0 %1887  ;;  %2001 = vrot.lane.b32.xlu0 %v4904_v24, %s3416_s22  ;;  %v1884_v5 = vpop.permute.xlu1 %1883 }
 0x9a0   :  { %v1901_v52 = vsub.f32 0.0, %v1888_v31  ;;  %v1899_v43 = vsub.f32 0.0, %v1884_v5 }
 0x9a3   :  { %v1860_v11 = vpop.permute.xlu0 %1859  ;;  %v1856_v2 = vpop.permute.xlu1 %1855 }
 0x9a4   :  { %v1869_v60 = vsel %vm46_vm4, %v1860_v11, %v1865_v4  ;;  %v1867_v26 = vsel %vm46_vm4, %v1856_v2, %v1863_v41 }
 0x9a5   :  { %v1877_v3 = vmul.f32 %v1869_v60, %v1841_v15  ;;  %v1875_v19 = vmul.f32 %v1867_v26, %v4882_v25 }
 0x9a7   :  { %v4928_v56 = vadd.f32 %v1877_v3, %v1873_v38  ;;  %v1896_v1 = vpop.permute.xlu0 %1895  ;;  %v4930_v55 = vadd.f32 %v1875_v19, %v1871_v57  ;;  %v1892_v9 = vpop.permute.xlu1 %1891 }
 0x9a8   :  { %v1905_v50 = vsel %vm46_vm4, %v1896_v1, %v1901_v52  ;;  %v1903_v27 = vsel %vm46_vm4, %v1892_v9, %v1899_v43 }
 0x9a9   :  { %v1913_v35 = vmul.f32 %v1905_v50, %v1841_v15  ;;  %1955 = vrot.lane.b32.xlu0 %v4928_v56, %s3415_s21  ;;  %v1911_v62 = vmul.f32 %v1903_v27, %v4882_v25  ;;  %1951 = vrot.lane.b32.xlu1 %v4930_v55, %s3415_s21 }
 0x9ab   :  { %v4944_v48 = vadd.f32 %v1913_v35, %v1909_v17  ;;  %v4946_v63 = vadd.f32 %v1911_v62, %v1907_v33 }
 0x9ad   :  { %1991 = vrot.lane.b32.xlu0 %v4944_v48, %s3415_s21  ;;  %1987 = vrot.lane.b32.xlu1 %v4946_v63, %s3415_s21 }
 0x9b1   :  { %1963 = vrot.lane.b32.xlu0 %v4928_v56, %s3416_s22  ;;  %1959 = vrot.lane.b32.xlu1 %v4930_v55, %s3416_s22 }
 0x9b4   :  { %v1933_v15 = vpop.permute.xlu0 %1932 }
 0x9b5   :  { %1999 = vrot.lane.b32.xlu0 %v4944_v48, %s3416_s22  ;;  %1995 = vrot.lane.b32.xlu1 %v4946_v63, %s3416_s22  ;;  %v1978_v41 = vmul.f32 %v1933_v15, %v4890_v29  ;;  %v2014_v29 = vmul.f32 %v1933_v15, %v4904_v24 }
 0x9b8   :  { %v1921_v40 = vpop.permute.xlu0 %1920 }
 0x9b9   :  { %2036 = vperm.xlu0 %3270, %v4870_v45   ;;  %2028 = vperm.xlu1 %3269, %v4862_v6  }
 0x9bd   :  { %2024 = vperm.xlu0 %3270, %v4865_v14   ;;  %3271 = vset.pattern.permute.xlu1 %v3451_v46  ;;  %v1937_v8 = vpop.permute.xlu0 %1936 }
 0x9be   :  { %2044 = vperm.xlu1 %3271, %v4862_v6  }
 0x9c1   :  { %3273 = vset.pattern.permute.xlu0 %v3451_v46 }
 0x9c2   :  { %2040 = vperm.xlu0 %3273, %v4865_v14   ;;  %2052 = vperm.xlu1 %3271, %v4870_v45  }
 0x9c6   :  { %3276 = vset.pattern.permute.xlu0 %v3452_v22  ;;  %3272 = vset.pattern.permute.xlu1 %v3450_v54  ;;  %v1925_v54 = vpop.permute.xlu1 %1924 }
 0x9c7   :  { %2124 = vperm.xlu0 %3276, %v4870_v45   ;;  %2032 = vperm.xlu1 %3272, %v4875_v16   ;;  %v1976_v31 = vmul.f32 %v1925_v54, %v4892_v36  ;;  %v2012_v36 = vmul.f32 %v1925_v54, %v4906_v7 }
 0x9ca   :  { %v1941_v51 = vpop.permute.xlu1 %1940 }
 0x9cb   :  { %2112 = vperm.xlu0 %3276, %v4865_v14   ;;  %3274 = vset.pattern.permute.xlu1 %v3451_v46 }
 0x9cc   :  { %2048 = vperm.xlu1 %3274, %v4875_v16  }
 0x9ce   :  { %v1949_v25 = vpop.permute.xlu1 %1948 }
 0x9cf   :  { %3279 = vset.pattern.permute.xlu0 %v3453_v10 }
 0x9d0   :  { %3275 = vset.pattern.permute.xlu1 %v3452_v22 }
 0x9d1   :  { %2116 = vperm.xlu1 %3275, %v4862_v6  }
 0x9d2   :  { %v1929_v37 = vpop.permute.xlu1 %1928 }
 0x9d5   :  { %3277 = vset.pattern.permute.xlu1 %v3453_v10 }
 0x9d6   :  { %2132 = vperm.xlu1 %3277, %v4862_v6   ;;  %v1945_v21 = vpop.permute.xlu1 %1944 }
 0x9da   :  { %2140 = vperm.xlu1 %3277, %v4870_v45  }
 0x9de   :  { %3278 = vset.pattern.permute.xlu1 %v3452_v22 }
 0x9df   :  { %2120 = vperm.xlu1 %3278, %v4875_v16  }
 0x9e3   :  { %3280 = vset.pattern.permute.xlu1 %v3453_v10  ;;  %v1977_v10 = vmul.f32 %v1929_v37, %v4928_v56  ;;  %v2013_v56 = vmul.f32 %v1929_v37, %v4944_v48  ;;  %v3454_v48 = vmov 3   ;;  %v3456_v37 = vmov 7  }
 0xa05   :  { %v1958_v61 = vpop.permute.xlu1 %1957  ;;  %v1954_v18 = vpop.permute.xlu0 %1953 }
 0xa06   :  { %v1968_v53 = vsub.f32 0.0, %v1954_v18  ;;  %v1970_v28 = vsub.f32 0.0, %v1958_v61 }
 0xa09   :  { %v1994_v30 = vpop.permute.xlu1 %1993  ;;  %v1990_v42 = vpop.permute.xlu0 %1989 }
 0xa0a   :  { %v2004_v11 = vsub.f32 0.0, %v1990_v42  ;;  %v2006_v2 = vsub.f32 0.0, %v1994_v30 }
 0xa0d   :  { %v1962_v23 = vpop.permute.xlu1 %1961  ;;  %v1966_v47 = vpop.permute.xlu0 %1965 }
 0xa0e   :  { %v1972_v12 = vsel %vm51_vm5, %v1962_v23, %v1968_v53  ;;  %v1974_v5 = vsel %vm51_vm5, %v1966_v47, %v1970_v28 }
 0xa0f   :  { %v1980_v4 = vmul.f32 %v1972_v12, %v1941_v51  ;;  %v1982_v60 = vmul.f32 %v1974_v5, %v1949_v25 }
 0xa11   :  { %v4981_v38 = vadd.f32 %v1980_v4, %v1976_v31  ;;  %v1998_v3 = vpop.permute.xlu1 %1997  ;;  %v4983_v26 = vadd.f32 %v1982_v60, %v1978_v41  ;;  %v2002_v57 = vpop.permute.xlu0 %2001 }
 0xa12   :  { %v2008_v52 = vsel %vm51_vm5, %v1998_v3, %v2004_v11  ;;  %v2010_v19 = vsel %vm51_vm5, %v2002_v57, %v2006_v2 }
 0xa13   :  { %v2016_v43 = vmul.f32 %v2008_v52, %v1941_v51  ;;  %2057 = vrot.lane.b32.xlu0 %v4981_v38, %s3420_s23  ;;  %v2018_v1 = vmul.f32 %v2010_v19, %v1949_v25  ;;  %2061 = vrot.lane.b32.xlu1 %v4983_v26, %s3420_s23  ;;  %v1975_v25 = vmul.f32 %v1921_v40, %v4930_v55 }
 0xa14   :  { %v2011_v55 = vmul.f32 %v1921_v40, %v4946_v63  ;;  %v3455_v63 = vmov 35  }
 0xa15   :  { %v4995_v50 = vadd.f32 %v2016_v43, %v2012_v36  ;;  %v4997_v9 = vadd.f32 %v2018_v1, %v2014_v29 }
 0xa17   :  { %2085 = vrot.lane.b32.xlu0 %v4995_v50, %s3420_s23  ;;  %2089 = vrot.lane.b32.xlu1 %v4997_v9, %s3420_s23 }
 0xa1b   :  { %v1956_v7 = vpop.permute.xlu0 %1955  ;;  %v1952_v17 = vpop.permute.xlu1 %1951 }
 0xa1c   :  { %v1969_v33 = vsub.f32 0.0, %v1956_v7  ;;  %v1967_v24 = vsub.f32 0.0, %v1952_v17 }
 0xa1f   :  { %v1992_v35 = vpop.permute.xlu0 %1991  ;;  %v1988_v27 = vpop.permute.xlu1 %1987 }
 0xa20   :  { %v2005_v15 = vsub.f32 0.0, %v1992_v35  ;;  %v2003_v18 = vsub.f32 0.0, %v1988_v27 }
 0xa23   :  { %v1964_v62 = vpop.permute.xlu0 %1963  ;;  %v1960_v22 = vpop.permute.xlu1 %1959 }
 0xa24   :  { %v1973_v46 = vsel %vm51_vm5, %v1964_v62, %v1969_v33  ;;  %v1971_v51 = vsel %vm51_vm5, %v1960_v22, %v1967_v24 }
 0xa25   :  { %v1981_v54 = vmul.f32 %v1973_v46, %v1945_v21  ;;  %v1979_v61 = vmul.f32 %v1971_v51, %v1937_v8 }
 0xa27   :  { %v5009_v30 = vadd.f32 %v1981_v54, %v1977_v10  ;;  %v2000_v42 = vpop.permute.xlu0 %1999  ;;  %v5011_v53 = vadd.f32 %v1979_v61, %v1975_v25  ;;  %v1996_v23 = vpop.permute.xlu1 %1995 }
 0xa28   :  { %v2009_v28 = vsel %vm51_vm5, %v2000_v42, %v2005_v15  ;;  %v2007_v12 = vsel %vm51_vm5, %v1996_v23, %v2003_v18 }
 0xa29   :  { %v2017_v47 = vmul.f32 %v2009_v28, %v1945_v21  ;;  %2059 = vrot.lane.b32.xlu1 %v5009_v30, %s3420_s23  ;;  %v2015_v31 = vmul.f32 %v2007_v12, %v1937_v8  ;;  %2055 = vrot.lane.b32.xlu0 %v5011_v53, %s3420_s23 }
 0xa2b   :  { %v5023_v5 = vadd.f32 %v2017_v47, %v2013_v56  ;;  %v5025_v4 = vadd.f32 %v2015_v31, %v2011_v55 }
 0xa2d   :  { %2087 = vrot.lane.b32.xlu1 %v5023_v5, %s3420_s23  ;;  %2083 = vrot.lane.b32.xlu0 %v5025_v4, %s3420_s23 }
 0xa31   :  { %2136 = vperm.xlu1 %3280, %v4875_v16   ;;  %2128 = vperm.xlu0 %3279, %v4865_v14  }
 0xa34   :  { %v2029_v40 = vpop.permute.xlu1 %2028  ;;  %v2037_v60 = vpop.permute.xlu0 %2036 }
 0xa35   :  { %3281 = vset.pattern.permute.xlu1 %v3454_v48  ;;  %3282 = vset.pattern.permute.xlu0 %v3454_v48  ;;  %v2072_v54 = vmul.f32 %v2029_v40, %v4981_v38  ;;  %v2074_v25 = vmul.f32 %v2037_v60, %v4983_v26  ;;  %v2100_v61 = vmul.f32 %v2029_v40, %v4995_v50 }
 0xa36   :  { %2180 = vperm.xlu1 %3281, %v4862_v6   ;;  %2188 = vperm.xlu0 %3282, %v4870_v45   ;;  %v2102_v23 = vmul.f32 %v2037_v60, %v4997_v9 }
 0xa38   :  { %v5047_v3 = vpop.permute.xlu0 %2024 }
 0xa39   :  { %v2045_v21 = vpop.permute.xlu1 %2044 }
 0xa3a   :  { %3283 = vset.pattern.permute.xlu1 %v3455_v63  ;;  %2176 = vperm.xlu0 %3282, %v4865_v14  }
 0xa3b   :  { %2196 = vperm.xlu1 %3283, %v4862_v6  }
 0xa3d   :  { %v2053_v8 = vpop.permute.xlu1 %2052  ;;  %v5049_v57 = vpop.permute.xlu0 %2040 }
 0xa3e   :  { %3285 = vset.pattern.permute.xlu0 %v3455_v63 }
 0xa3f   :  { %2204 = vperm.xlu1 %3283, %v4870_v45   ;;  %2192 = vperm.xlu0 %3285, %v4865_v14  }
 0xa42   :  { %v5043_v41 = vpop.permute.xlu1 %2032  ;;  %v2125_v36 = vpop.permute.xlu0 %2124 }
 0xa43   :  { %3284 = vset.pattern.permute.xlu1 %v3454_v48  ;;  %3288 = vset.pattern.permute.xlu0 %v3456_v37 }
 0xa44   :  { %2184 = vperm.xlu1 %3284, %v4875_v16  }
 0xa46   :  { %v5051_v43 = vpop.permute.xlu0 %2112 }
 0xa47   :  { %v5045_v11 = vpop.permute.xlu1 %2048 }
 0xa48   :  { %3286 = vset.pattern.permute.xlu1 %v3455_v63 }
 0xa49   :  { %2200 = vperm.xlu1 %3286, %v4875_v16  }
 0xa4c   :  { %v2117_v2 = vpop.permute.xlu1 %2116 }
 0xa4d   :  { %3287 = vset.pattern.permute.xlu1 %v3456_v37 }
 0xa51   :  { %v2133_v52 = vpop.permute.xlu1 %2132 }
 0xa55   :  { %v2141_v19 = vpop.permute.xlu1 %2140 }
 0xa5a   :  { %v5053_v29 = vpop.permute.xlu1 %2120 }
 0xa85   :  { %v2058_v1 = vpop.permute.xlu0 %2057  ;;  %v2062_v17 = vpop.permute.xlu1 %2061 }
 0xa86   :  { %v2064_v7 = vsub.f32 0.0, %v2058_v1  ;;  %v2066_v35 = vsub.f32 0.0, %v2062_v17 }
 0xa88   :  { %v2068_v27 = vsel %vm56_vm6, %v2058_v1, %v2064_v7  ;;  %v2070_v24 = vsel %vm56_vm6, %v2062_v17, %v2066_v35 }
 0xa89   :  { %v2076_v33 = vmul.f32 %v2068_v27, %v2045_v21  ;;  %v2086_v62 = vpop.permute.xlu0 %2085  ;;  %v2078_v46 = vmul.f32 %v2070_v24, %v2053_v8  ;;  %v2090_v10 = vpop.permute.xlu1 %2089 }
 0xa8a   :  { %v2092_v22 = vsub.f32 0.0, %v2086_v62  ;;  %v2094_v51 = vsub.f32 0.0, %v2090_v10 }
 0xa8b   :  { %v2080_v18 = vadd.f32 %v2076_v33, %v2072_v54  ;;  %v2082_v56 = vadd.f32 %v2078_v46, %v2074_v25 }
 0xa8c   :  { %v2096_v15 = vsel %vm56_vm6, %v2086_v62, %v2092_v22  ;;  %v2098_v28 = vsel %vm56_vm6, %v2090_v10, %v2094_v51 }
 0xa8d   :  { %v2104_v42 = vmul.f32 %v2096_v15, %v2045_v21  ;;  %v2106_v47 = vmul.f32 %v2098_v28, %v2053_v8  ;;  %v2144_v38 = vmul.f32 %v2117_v2, %v2080_v18  ;;  %v2160_v31 = vmul.f32 %v2133_v52, %v2080_v18 }
 0xa8e   :  { %v2146_v63 = vmul.f32 %v2125_v36, %v2082_v56  ;;  %v2162_v1 = vmul.f32 %v2141_v19, %v2082_v56  ;;  %v2101_v28 = vmul.f32 %v5043_v41, %v5023_v5  ;;  %v2099_v56 = vmul.f32 %v5047_v3, %v5025_v4 }
 0xa8f   :  { %v2108_v12 = vadd.f32 %v2104_v42, %v2100_v61  ;;  %v2110_v55 = vadd.f32 %v2106_v47, %v2102_v23  ;;  %v2073_v42 = vmul.f32 %v5043_v41, %v5009_v30  ;;  %v2071_v23 = vmul.f32 %v5047_v3, %v5011_v53 }
 0xa91   :  { %v2148_v48 = vmul.f32 %v2133_v52, %v2108_v12  ;;  %v2156_v26 = vmul.f32 %v2117_v2, %v2108_v12  ;;  %v2150_v7 = vmul.f32 %v2141_v19, %v2110_v55  ;;  %v2158_v17 = vmul.f32 %v2125_v36, %v2110_v55 }
 0xa93   :  { %v2152_v50 = vsub.f32 %v2144_v38, %v2148_v48  ;;  %v2164_v40 = vadd.f32 %v2160_v31, %v2156_v26  ;;  %v2154_v21 = vsub.f32 %v2146_v63, %v2150_v7  ;;  %v2166_v35 = vadd.f32 %v2162_v1, %v2158_v17 }
 0xa95   :  { %v5068_v27 = vmul.f32 %v2152_v50, %v3769_v34  ;;  %v5071_v9 = vmul.f32 %v2154_v21, %v3769_v34  ;;  %v5078_v8 = vmul.f32 %v2164_v40, %v3782_v0  ;;  %v5081_v60 = vmul.f32 %v2166_v35, %v3782_v0 }
 0xa96   :  { %v3457_v40 = vmov 39   ;;  %v3458_v21 = vmov 11  }
 0xa97   :  { %2209 = vrot.lane.b32.xlu0 %v5068_v27, %s3393_s13  ;;  %2213 = vrot.lane.b32.xlu1 %v5071_v9, %s3393_s13 }
 0xa9b   :  { %2245 = vrot.lane.b32.xlu0 %v5078_v8, %s3393_s13  ;;  %2249 = vrot.lane.b32.xlu1 %v5081_v60, %s3393_s13  ;;  %v2060_v2 = vpop.permute.xlu1 %2059  ;;  %v2056_v52 = vpop.permute.xlu0 %2055 }
 0xa9c   :  { %v2065_v36 = vsub.f32 0.0, %v2060_v2  ;;  %v2063_v19 = vsub.f32 0.0, %v2056_v52 }
 0xa9e   :  { %v2069_v22 = vsel %vm56_vm6, %v2060_v2, %v2065_v36  ;;  %v2067_v54 = vsel %vm56_vm6, %v2056_v52, %v2063_v19 }
 0xa9f   :  { %2221 = vrot.lane.b32.xlu0 %v5071_v9, %s3397_s0  ;;  %2217 = vrot.lane.b32.xlu1 %v5068_v27, %s3397_s0  ;;  %v2088_v33 = vpop.permute.xlu1 %2087  ;;  %v2084_v24 = vpop.permute.xlu0 %2083  ;;  %v2077_v25 = vmul.f32 %v2069_v22, %v5045_v11  ;;  %v2075_v61 = vmul.f32 %v2067_v54, %v5049_v57 }
 0xaa0   :  { %v2093_v62 = vsub.f32 0.0, %v2088_v33  ;;  %v2091_v46 = vsub.f32 0.0, %v2084_v24 }
 0xaa1   :  { %v2081_v47 = vadd.f32 %v2077_v25, %v2073_v42  ;;  %v2079_v55 = vadd.f32 %v2075_v61, %v2071_v23 }
 0xaa2   :  { %v2097_v10 = vsel %vm56_vm6, %v2088_v33, %v2093_v62  ;;  %v2095_v51 = vsel %vm56_vm6, %v2084_v24, %v2091_v46 }
 0xaa3   :  { %2257 = vrot.lane.b32.xlu0 %v5081_v60, %s3397_s0  ;;  %2253 = vrot.lane.b32.xlu1 %v5078_v8, %s3397_s0  ;;  %v2105_v15 = vmul.f32 %v2097_v10, %v5045_v11  ;;  %v2103_v18 = vmul.f32 %v2095_v51, %v5049_v57  ;;  %v2145_v57 = vmul.f32 %v5053_v29, %v2081_v47 }
 0xaa4   :  { %v2143_v5 = vmul.f32 %v5051_v43, %v2079_v55 }
 0xaa5   :  { %v2109_v12 = vadd.f32 %v2105_v15, %v2101_v28  ;;  %v2107_v11 = vadd.f32 %v2103_v18, %v2099_v56 }
 0xaa7   :  { %v2157_v48 = vmul.f32 %v5053_v29, %v2109_v12  ;;  %v2155_v53 = vmul.f32 %v5051_v43, %v2107_v11 }
 0xaac   :  { %v2137_v38 = vpop.permute.xlu1 %2136  ;;  %v2129_v31 = vpop.permute.xlu0 %2128 }
 0xaad   :  { %v2149_v30 = vmul.f32 %v2137_v38, %v2109_v12  ;;  %v2161_v26 = vmul.f32 %v2137_v38, %v2081_v47  ;;  %v2147_v41 = vmul.f32 %v2129_v31, %v2107_v11  ;;  %v2159_v63 = vmul.f32 %v2129_v31, %v2079_v55 }
 0xaaf   :  { %v2153_v1 = vsub.f32 %v2145_v57, %v2149_v30  ;;  %v2165_v4 = vadd.f32 %v2161_v26, %v2157_v48  ;;  %v2151_v3 = vsub.f32 %v2143_v5, %v2147_v41  ;;  %v2163_v7 = vadd.f32 %v2159_v63, %v2155_v53 }
 0xab1   :  { %v5120_v17 = vmul.f32 %v2153_v1, %v3769_v34  ;;  %v5123_v50 = vmul.f32 %v2151_v3, %v3769_v34  ;;  %v5130_v29 = vmul.f32 %v2165_v4, %v3782_v0  ;;  %v5133_v43 = vmul.f32 %v2163_v7, %v3782_v0  ;;  %v2181_v35 = vpop.permute.xlu1 %2180  ;;  %v2189_v52 = vpop.permute.xlu0 %2188 }
 0xab2   :  { %v2234_v18 = vmul.f32 %v2189_v52, %v5071_v9  ;;  %v2232_v23 = vmul.f32 %v2181_v35, %v5068_v27  ;;  %v2270_v9 = vmul.f32 %v2189_v52, %v5081_v60  ;;  %v2268_v27 = vmul.f32 %v2181_v35, %v5078_v8 }
 0xab3   :  { %2211 = vrot.lane.b32.xlu0 %v5120_v17, %s3393_s13  ;;  %2207 = vrot.lane.b32.xlu1 %v5123_v50, %s3393_s13 }
 0xab5   :  { %v5158_v19 = vpop.permute.xlu0 %2176 }
 0xab6   :  { %v2197_v2 = vpop.permute.xlu1 %2196 }
 0xab7   :  { %2247 = vrot.lane.b32.xlu0 %v5130_v29, %s3393_s13  ;;  %2243 = vrot.lane.b32.xlu1 %v5133_v43, %s3393_s13 }
 0xaba   :  { %v2205_v36 = vpop.permute.xlu1 %2204  ;;  %v5160_v24 = vpop.permute.xlu0 %2192 }
 0xabb   :  { %2219 = vrot.lane.b32.xlu0 %v5120_v17, %s3397_s0  ;;  %2215 = vrot.lane.b32.xlu1 %v5123_v50, %s3397_s0 }
 0xabf   :  { %2255 = vrot.lane.b32.xlu0 %v5130_v29, %s3397_s0  ;;  %2251 = vrot.lane.b32.xlu1 %v5133_v43, %s3397_s0  ;;  %v2185_v33 = vpop.permute.xlu1 %2184 }
 0xac0   :  { %v2233_v35 = vmul.f32 %v2185_v33, %v5120_v17 }
 0xac3   :  { %2292 = vperm.xlu0 %3288, %v4870_v45   ;;  %2284 = vperm.xlu1 %3287, %v4862_v6  }
 0xac4   :  { %v2201_v62 = vpop.permute.xlu1 %2200 }
 0xac7   :  { %2280 = vperm.xlu0 %3288, %v4865_v14   ;;  %3289 = vset.pattern.permute.xlu1 %v3457_v40 }
 0xac8   :  { %2300 = vperm.xlu1 %3289, %v4862_v6  }
 0xacb   :  { %3291 = vset.pattern.permute.xlu0 %v3457_v40 }
 0xacc   :  { %2296 = vperm.xlu0 %3291, %v4865_v14   ;;  %2308 = vperm.xlu1 %3289, %v4870_v45  }
 0xad0   :  { %3294 = vset.pattern.permute.xlu0 %v3458_v21  ;;  %3290 = vset.pattern.permute.xlu1 %v3456_v37 }
 0xad1   :  { %2288 = vperm.xlu1 %3290, %v4875_v16  }
 0xad5   :  { %3292 = vset.pattern.permute.xlu1 %v3457_v40 }
 0xad6   :  { %2304 = vperm.xlu1 %3292, %v4875_v16  }
 0xada   :  { %3293 = vset.pattern.permute.xlu1 %v3458_v21 }
 0xb09   :  { %v2210_v46 = vpop.permute.xlu0 %2209  ;;  %v2214_v22 = vpop.permute.xlu1 %2213 }
 0xb0a   :  { %v2226_v54 = vsub.f32 0.0, %v2214_v22  ;;  %v2224_v51 = vsub.f32 0.0, %v2210_v46 }
 0xb0d   :  { %v2246_v37 = vpop.permute.xlu0 %2245  ;;  %v2250_v10 = vpop.permute.xlu1 %2249 }
 0xb0e   :  { %v2262_v56 = vsub.f32 0.0, %v2250_v10  ;;  %v2260_v12 = vsub.f32 0.0, %v2246_v37 }
 0xb11   :  { %v2222_v25 = vpop.permute.xlu0 %2221  ;;  %v2218_v61 = vpop.permute.xlu1 %2217 }
 0xb12   :  { %v2230_v15 = vsel %vm3518_vm0, %v2222_v25, %v2226_v54  ;;  %v2228_v28 = vsel %vm3518_vm0, %v2218_v61, %v2224_v51 }
 0xb13   :  { %v2238_v42 = vmul.f32 %v2230_v15, %v2205_v36  ;;  %v2236_v47 = vmul.f32 %v2228_v28, %v2197_v2  ;;  %v2269_v15 = vmul.f32 %v2185_v33, %v5130_v29  ;;  %v3460_v29 = vmov 15  }
 0xb15   :  { %v5168_v55 = vadd.f32 %v2238_v42, %v2234_v18  ;;  %v2258_v11 = vpop.permute.xlu0 %2257  ;;  %v5170_v38 = vadd.f32 %v2236_v47, %v2232_v23  ;;  %v2254_v57 = vpop.permute.xlu1 %2253 }
 0xb16   :  { %v2266_v31 = vsel %vm3518_vm0, %v2258_v11, %v2262_v56  ;;  %v2264_v30 = vsel %vm3518_vm0, %v2254_v57, %v2260_v12 }
 0xb17   :  { %v2274_v48 = vmul.f32 %v2266_v31, %v2205_v36  ;;  %2317 = vrot.lane.b32.xlu1 %v5168_v55, %s3400_s14  ;;  %v2272_v26 = vmul.f32 %v2264_v30, %v2197_v2  ;;  %2313 = vrot.lane.b32.xlu0 %v5170_v38, %s3400_s14  ;;  %v2231_v36 = vmul.f32 %v5158_v19, %v5123_v50 }
 0xb18   :  { %v2267_v50 = vmul.f32 %v5158_v19, %v5133_v43 }
 0xb19   :  { %v5182_v5 = vadd.f32 %v2274_v48, %v2270_v9  ;;  %v5184_v41 = vadd.f32 %v2272_v26, %v2268_v27 }
 0xb1b   :  { %2353 = vrot.lane.b32.xlu1 %v5182_v5, %s3400_s14  ;;  %2349 = vrot.lane.b32.xlu0 %v5184_v41, %s3400_s14 }
 0xb1f   :  { %2321 = vrot.lane.b32.xlu1 %v5170_v38, %s3401_s15  ;;  %2325 = vrot.lane.b32.xlu0 %v5168_v55, %s3401_s15 }
 0xb23   :  { %2357 = vrot.lane.b32.xlu1 %v5184_v41, %s3401_s15  ;;  %2361 = vrot.lane.b32.xlu0 %v5182_v5, %s3401_s15 }
 0xb25   :  { %v2212_v8 = vpop.permute.xlu0 %2211  ;;  %v2208_v60 = vpop.permute.xlu1 %2207 }
 0xb26   :  { %v2225_v1 = vsub.f32 0.0, %v2212_v8  ;;  %v2223_v4 = vsub.f32 0.0, %v2208_v60 }
 0xb29   :  { %v2248_v53 = vpop.permute.xlu0 %2247  ;;  %v2244_v63 = vpop.permute.xlu1 %2243 }
 0xb2a   :  { %v2261_v46 = vsub.f32 0.0, %v2248_v53  ;;  %v2259_v37 = vsub.f32 0.0, %v2244_v63 }
 0xb2d   :  { %v2220_v3 = vpop.permute.xlu0 %2219  ;;  %v2216_v40 = vpop.permute.xlu1 %2215 }
 0xb2e   :  { %v2229_v7 = vsel %vm3518_vm0, %v2220_v3, %v2225_v1  ;;  %v2227_v52 = vsel %vm3518_vm0, %v2216_v40, %v2223_v4 }
 0xb2f   :  { %v2237_v2 = vmul.f32 %v2229_v7, %v2201_v62  ;;  %v2235_v22 = vmul.f32 %v2227_v52, %v5160_v24 }
 0xb31   :  { %v5206_v10 = vadd.f32 %v2237_v2, %v2233_v35  ;;  %v2256_v54 = vpop.permute.xlu0 %2255  ;;  %v5208_v51 = vadd.f32 %v2235_v22, %v2231_v36  ;;  %v2252_v17 = vpop.permute.xlu1 %2251 }
 0xb32   :  { %v2265_v25 = vsel %vm3518_vm0, %v2256_v54, %v2261_v46  ;;  %v2263_v18 = vsel %vm3518_vm0, %v2252_v17, %v2259_v37 }
 0xb33   :  { %v2273_v61 = vmul.f32 %v2265_v25, %v2201_v62  ;;  %2315 = vrot.lane.b32.xlu0 %v5206_v10, %s3400_s14  ;;  %v2271_v42 = vmul.f32 %v2263_v18, %v5160_v24  ;;  %2311 = vrot.lane.b32.xlu1 %v5208_v51, %s3400_s14 }
 0xb35   :  { %v5222_v28 = vadd.f32 %v2273_v61, %v2269_v15  ;;  %v5224_v23 = vadd.f32 %v2271_v42, %v2267_v50 }
 0xb37   :  { %2351 = vrot.lane.b32.xlu0 %v5222_v28, %s3400_s14  ;;  %2347 = vrot.lane.b32.xlu1 %v5224_v23, %s3400_s14 }
 0xb3b   :  { %2323 = vrot.lane.b32.xlu0 %v5206_v10, %s3401_s15  ;;  %2319 = vrot.lane.b32.xlu1 %v5208_v51, %s3401_s15 }
 0xb3e   :  { %v2285_v43 = vpop.permute.xlu1 %2284  ;;  %v2293_v33 = vpop.permute.xlu0 %2292 }
 0xb3f   :  { %2359 = vrot.lane.b32.xlu0 %v5222_v28, %s3401_s15  ;;  %2355 = vrot.lane.b32.xlu1 %v5224_v23, %s3401_s15  ;;  %v2336_v48 = vmul.f32 %v2285_v43, %v5170_v38  ;;  %v2338_v26 = vmul.f32 %v2293_v33, %v5168_v55  ;;  %v2372_v38 = vmul.f32 %v2285_v43, %v5184_v41 }
 0xb40   :  { %v2374_v55 = vmul.f32 %v2293_v33, %v5182_v5 }
 0xb43   :  { %2396 = vperm.xlu0 %3294, %v4870_v45   ;;  %2388 = vperm.xlu1 %3293, %v4862_v6   ;;  %v2301_v19 = vpop.permute.xlu1 %2300 }
 0xb47   :  { %2384 = vperm.xlu0 %3294, %v4865_v14   ;;  %3295 = vset.pattern.permute.xlu1 %v3459_v20 }
 0xb48   :  { %2404 = vperm.xlu1 %3295, %v4862_v6   ;;  %v2309_v6 = vpop.permute.xlu1 %2308 }
 0xb4b   :  { %3297 = vset.pattern.permute.xlu0 %v3459_v20 }
 0xb4c   :  { %2400 = vperm.xlu0 %3297, %v4865_v14   ;;  %2412 = vperm.xlu1 %3295, %v4870_v45   ;;  %v2289_v24 = vpop.permute.xlu1 %2288  ;;  %v5249_v14 = vpop.permute.xlu0 %2280 }
 0xb4d   :  { %v2337_v61 = vmul.f32 %v2289_v24, %v5206_v10  ;;  %v2335_v42 = vmul.f32 %v5249_v14, %v5208_v51  ;;  %v2371_v51 = vmul.f32 %v5249_v14, %v5224_v23  ;;  %v5335_v23 = vld [vmem:[#allocation2] sm:$0xff]  ;;  %v3462_v14 = vmov 19  }
 0xb50   :  { %3300 = vset.pattern.permute.xlu0 %v3460_v29  ;;  %3296 = vset.pattern.permute.xlu1 %v3458_v21  ;;  %v5251_v62 = vpop.permute.xlu0 %2296 }
 0xb51   :  { %2392 = vperm.xlu1 %3296, %v4875_v16   ;;  %v2305_v45 = vpop.permute.xlu1 %2304 }
 0xb55   :  { %3298 = vset.pattern.permute.xlu1 %v3459_v20 }
 0xb56   :  { %2408 = vperm.xlu1 %3298, %v4875_v16  }
 0xb5a   :  { %3299 = vset.pattern.permute.xlu1 %v3460_v29 }
 0xb89   :  { %v2318_v56 = vpop.permute.xlu1 %2317  ;;  %v2314_v47 = vpop.permute.xlu0 %2313 }
 0xb8a   :  { %v2328_v11 = vsub.f32 0.0, %v2314_v47  ;;  %v2330_v31 = vsub.f32 0.0, %v2318_v56 }
 0xb8d   :  { %v2354_v21 = vpop.permute.xlu1 %2353  ;;  %v2350_v12 = vpop.permute.xlu0 %2349 }
 0xb8e   :  { %v2364_v8 = vsub.f32 0.0, %v2350_v12  ;;  %v2366_v53 = vsub.f32 0.0, %v2354_v21  ;;  %v2373_v21 = vmul.f32 %v2289_v24, %v5222_v28  ;;  %v5332_v28 = vld [vmem:[#allocation2 + $0x8] sm:$0xff]  ;;  %v3461_v24 = vmov 47  }
 0xb91   :  { %v2322_v57 = vpop.permute.xlu1 %2321  ;;  %v2326_v16 = vpop.permute.xlu0 %2325 }
 0xb92   :  { %v2332_v9 = vsel %vm31_vm1, %v2322_v57, %v2328_v11  ;;  %v2334_v30 = vsel %vm31_vm1, %v2326_v16, %v2330_v31 }
 0xb93   :  { %v2340_v27 = vmul.f32 %v2332_v9, %v2301_v19  ;;  %v2342_v60 = vmul.f32 %v2334_v30, %v2309_v6 }
 0xb95   :  { %v5259_v63 = vadd.f32 %v2340_v27, %v2336_v48  ;;  %v2358_v1 = vpop.permute.xlu1 %2357  ;;  %v5261_v4 = vadd.f32 %v2342_v60, %v2338_v26  ;;  %v2362_v3 = vpop.permute.xlu0 %2361 }
 0xb96   :  { %v2368_v7 = vsel %vm31_vm1, %v2358_v1, %v2364_v8  ;;  %v2370_v40 = vsel %vm31_vm1, %v2362_v3, %v2366_v53 }
 0xb97   :  { %v2376_v35 = vmul.f32 %v2368_v7, %v2301_v19  ;;  %2417 = vrot.lane.b32.xlu0 %v5259_v63, %s3404_s16  ;;  %v2378_v2 = vmul.f32 %v2370_v40, %v2309_v6  ;;  %2421 = vrot.lane.b32.xlu1 %v5261_v4, %s3404_s16 }
 0xb99   :  { %v5273_v52 = vadd.f32 %v2376_v35, %v2372_v38  ;;  %v5275_v36 = vadd.f32 %v2378_v2, %v2374_v55 }
 0xb9b   :  { %2453 = vrot.lane.b32.xlu0 %v5273_v52, %s3404_s16  ;;  %2457 = vrot.lane.b32.xlu1 %v5275_v36, %s3404_s16 }
 0xb9f   :  { %2429 = vrot.lane.b32.xlu0 %v5261_v4, %s3405_s17  ;;  %2425 = vrot.lane.b32.xlu1 %v5259_v63, %s3405_s17 }
 0xba3   :  { %2465 = vrot.lane.b32.xlu0 %v5275_v36, %s3405_s17  ;;  %2461 = vrot.lane.b32.xlu1 %v5273_v52, %s3405_s17 }
 0xba5   :  { %v2316_v5 = vpop.permute.xlu0 %2315  ;;  %v2312_v41 = vpop.permute.xlu1 %2311 }
 0xba6   :  { %v2329_v37 = vsub.f32 0.0, %v2316_v5  ;;  %v2327_v54 = vsub.f32 0.0, %v2312_v41 }
 0xba9   :  { %v2352_v46 = vpop.permute.xlu0 %2351  ;;  %v2348_v22 = vpop.permute.xlu1 %2347 }
 0xbaa   :  { %v2365_v20 = vsub.f32 0.0, %v2352_v46  ;;  %v2363_v19 = vsub.f32 0.0, %v2348_v22 }
 0xbad   :  { %v2324_v25 = vpop.permute.xlu0 %2323  ;;  %v2320_v15 = vpop.permute.xlu1 %2319 }
 0xbae   :  { %v2333_v17 = vsel %vm31_vm1, %v2324_v25, %v2329_v37  ;;  %v2331_v50 = vsel %vm31_vm1, %v2320_v15, %v2327_v54 }
 0xbaf   :  { %v2341_v18 = vmul.f32 %v2333_v17, %v2305_v45  ;;  %v2339_v43 = vmul.f32 %v2331_v50, %v5251_v62 }
 0xbb1   :  { %v5297_v6 = vadd.f32 %v2341_v18, %v2337_v61  ;;  %v2360_v33 = vpop.permute.xlu0 %2359  ;;  %v5299_v56 = vadd.f32 %v2339_v43, %v2335_v42  ;;  %v2356_v10 = vpop.permute.xlu1 %2355 }
 0xbb2   :  { %v2369_v47 = vsel %vm31_vm1, %v2360_v33, %v2365_v20  ;;  %v2367_v11 = vsel %vm31_vm1, %v2356_v10, %v2363_v19 }
 0xbb3   :  { %v2377_v12 = vmul.f32 %v2369_v47, %v2305_v45  ;;  %2419 = vrot.lane.b32.xlu0 %v5297_v6, %s3404_s16  ;;  %v2375_v31 = vmul.f32 %v2367_v11, %v5251_v62  ;;  %2415 = vrot.lane.b32.xlu1 %v5299_v56, %s3404_s16  ;;  %v5343_v45 = vld [vmem:[#allocation2 + $0x10] sm:$0xff] }
 0xbb5   :  { %v5313_v57 = vadd.f32 %v2377_v12, %v2373_v21  ;;  %v5315_v16 = vadd.f32 %v2375_v31, %v2371_v51 }
 0xbb7   :  { %2455 = vrot.lane.b32.xlu0 %v5313_v57, %s3404_s16  ;;  %2451 = vrot.lane.b32.xlu1 %v5315_v16, %s3404_s16 }
 0xbbb   :  { %2427 = vrot.lane.b32.xlu0 %v5297_v6, %s3405_s17  ;;  %2423 = vrot.lane.b32.xlu1 %v5299_v56, %s3405_s17 }
 0xbbe   :  { %v2389_v62 = vpop.permute.xlu1 %2388  ;;  %v2397_v48 = vpop.permute.xlu0 %2396 }
 0xbbf   :  { %2463 = vrot.lane.b32.xlu0 %v5313_v57, %s3405_s17  ;;  %2459 = vrot.lane.b32.xlu1 %v5315_v16, %s3405_s17  ;;  %v2442_v2 = vmul.f32 %v2397_v48, %v5261_v4  ;;  %v2440_v46 = vmul.f32 %v2389_v62, %v5259_v63  ;;  %v2478_v4 = vmul.f32 %v2397_v48, %v5275_v36 }
 0xbc0   :  { %v2476_v63 = vmul.f32 %v2389_v62, %v5273_v52 }
 0xbc2   :  { %v5348_v27 = vpop.permute.xlu0 %2384 }
 0xbc3   :  { %2500 = vperm.xlu0 %3300, %v5329_v49   ;;  %2492 = vperm.xlu1 %3299, %v5332_v28   ;;  %v2405_v9 = vpop.permute.xlu1 %2404 }
 0xbc7   :  { %2488 = vperm.xlu0 %3300, %v5335_v23   ;;  %3301 = vset.pattern.permute.xlu1 %v3461_v24  ;;  %v2413_v30 = vpop.permute.xlu1 %2412  ;;  %v5350_v8 = vpop.permute.xlu0 %2400 }
 0xbc8   :  { %2508 = vperm.xlu1 %3301, %v5332_v28  }
 0xbcb   :  { %3303 = vset.pattern.permute.xlu0 %v3461_v24 }
 0xbcc   :  { %2504 = vperm.xlu0 %3303, %v5335_v23   ;;  %2516 = vperm.xlu1 %3301, %v5329_v49   ;;  %v2393_v26 = vpop.permute.xlu1 %2392 }
 0xbcd   :  { %v2441_v31 = vmul.f32 %v2393_v26, %v5297_v6 }
 0xbd0   :  { %3306 = vset.pattern.permute.xlu0 %v3462_v14  ;;  %3302 = vset.pattern.permute.xlu1 %v3460_v29 }
 0xbd1   :  { %2496 = vperm.xlu1 %3302, %v5343_v45   ;;  %v2409_v60 = vpop.permute.xlu1 %2408 }
 0xbd5   :  { %3304 = vset.pattern.permute.xlu1 %v3461_v24 }
 0xbd6   :  { %2512 = vperm.xlu1 %3304, %v5343_v45  }
 0xbda   :  { %3305 = vset.pattern.permute.xlu1 %v3462_v14 }
 0xc09   :  { %v2418_v29 = vpop.permute.xlu0 %2417  ;;  %v2422_v53 = vpop.permute.xlu1 %2421 }
 0xc0a   :  { %v2434_v7 = vsub.f32 0.0, %v2422_v53  ;;  %v2432_v38 = vsub.f32 0.0, %v2418_v29 }
 0xc0d   :  { %v2454_v1 = vpop.permute.xlu0 %2453  ;;  %v2458_v3 = vpop.permute.xlu1 %2457 }
 0xc0e   :  { %v2470_v22 = vsub.f32 0.0, %v2458_v3  ;;  %v2468_v54 = vsub.f32 0.0, %v2454_v1 }
 0xc11   :  { %v2430_v40 = vpop.permute.xlu0 %2429  ;;  %v2426_v55 = vpop.permute.xlu1 %2425 }
 0xc12   :  { %v2438_v35 = vsel %vm36_vm2, %v2430_v40, %v2434_v7  ;;  %v2436_v41 = vsel %vm36_vm2, %v2426_v55, %v2432_v38  ;;  %v2477_v38 = vmul.f32 %v2393_v26, %v5313_v57  ;;  %v3464_v57 = vmov 23  }
 0xc13   :  { %v2446_v5 = vmul.f32 %v2438_v35, %v2413_v30  ;;  %v2444_v37 = vmul.f32 %v2436_v41, %v2405_v9 }
 0xc15   :  { %v5358_v25 = vadd.f32 %v2446_v5, %v2442_v2  ;;  %v2466_v17 = vpop.permute.xlu0 %2465  ;;  %v5360_v15 = vadd.f32 %v2444_v37, %v2440_v46  ;;  %v2462_v18 = vpop.permute.xlu1 %2461 }
 0xc16   :  { %v2474_v61 = vsel %vm36_vm2, %v2466_v17, %v2470_v22  ;;  %v2472_v42 = vsel %vm36_vm2, %v2462_v18, %v2468_v54 }
 0xc17   :  { %v2482_v50 = vmul.f32 %v2474_v61, %v2413_v30  ;;  %2525 = vrot.lane.b32.xlu1 %v5358_v25, %s3408_s18  ;;  %v2480_v20 = vmul.f32 %v2472_v42, %v2405_v9  ;;  %2521 = vrot.lane.b32.xlu0 %v5360_v15, %s3408_s18  ;;  %v2439_v9 = vmul.f32 %v5348_v27, %v5299_v56 }
 0xc18   :  { %v2475_v56 = vmul.f32 %v5348_v27, %v5315_v16 }
 0xc19   :  { %v5372_v43 = vadd.f32 %v2482_v50, %v2478_v4  ;;  %v5374_v19 = vadd.f32 %v2480_v20, %v2476_v63 }
 0xc1b   :  { %2561 = vrot.lane.b32.xlu1 %v5372_v43, %s3408_s18  ;;  %2557 = vrot.lane.b32.xlu0 %v5374_v19, %s3408_s18 }
 0xc1f   :  { %2529 = vrot.lane.b32.xlu1 %v5360_v15, %s3391_s10  ;;  %2533 = vrot.lane.b32.xlu0 %v5358_v25, %s3391_s10 }
 0xc23   :  { %2565 = vrot.lane.b32.xlu1 %v5374_v19, %s3391_s10  ;;  %2569 = vrot.lane.b32.xlu0 %v5372_v43, %s3391_s10 }
 0xc25   :  { %v2420_v52 = vpop.permute.xlu0 %2419  ;;  %v2416_v36 = vpop.permute.xlu1 %2415 }
 0xc26   :  { %v2433_v10 = vsub.f32 0.0, %v2420_v52  ;;  %v2431_v21 = vsub.f32 0.0, %v2416_v36 }
 0xc29   :  { %v2456_v33 = vpop.permute.xlu0 %2455  ;;  %v2452_v47 = vpop.permute.xlu1 %2451 }
 0xc2a   :  { %v2469_v48 = vsub.f32 0.0, %v2456_v33  ;;  %v2467_v29 = vsub.f32 0.0, %v2452_v47 }
 0xc2d   :  { %v2428_v12 = vpop.permute.xlu0 %2427  ;;  %v2424_v51 = vpop.permute.xlu1 %2423 }
 0xc2e   :  { %v2437_v11 = vsel %vm36_vm2, %v2428_v12, %v2433_v10  ;;  %v2435_v62 = vsel %vm36_vm2, %v2424_v51, %v2431_v21 }
 0xc2f   :  { %v2445_v24 = vmul.f32 %v2437_v11, %v2409_v60  ;;  %v2443_v30 = vmul.f32 %v2435_v62, %v5350_v8 }
 0xc31   :  { %v5396_v53 = vadd.f32 %v2445_v24, %v2441_v31  ;;  %v2464_v1 = vpop.permute.xlu0 %2463  ;;  %v5398_v3 = vadd.f32 %v2443_v30, %v2439_v9  ;;  %v2460_v6 = vpop.permute.xlu1 %2459 }
 0xc32   :  { %v2473_v7 = vsel %vm36_vm2, %v2464_v1, %v2469_v48  ;;  %v2471_v35 = vsel %vm36_vm2, %v2460_v6, %v2467_v29 }
 0xc33   :  { %v2481_v40 = vmul.f32 %v2473_v7, %v2409_v60  ;;  %2523 = vrot.lane.b32.xlu0 %v5396_v53, %s3408_s18  ;;  %v2479_v55 = vmul.f32 %v2471_v35, %v5350_v8  ;;  %2519 = vrot.lane.b32.xlu1 %v5398_v3, %s3408_s18 }
 0xc35   :  { %v5412_v2 = vadd.f32 %v2481_v40, %v2477_v38  ;;  %v5414_v5 = vadd.f32 %v2479_v55, %v2475_v56 }
 0xc37   :  { %2559 = vrot.lane.b32.xlu0 %v5412_v2, %s3408_s18  ;;  %2555 = vrot.lane.b32.xlu1 %v5414_v5, %s3408_s18 }
 0xc3b   :  { %2531 = vrot.lane.b32.xlu0 %v5396_v53, %s3391_s10  ;;  %2527 = vrot.lane.b32.xlu1 %v5398_v3, %s3391_s10 }
 0xc3e   :  { %v2493_v16 = vpop.permute.xlu1 %2492  ;;  %v2501_v8 = vpop.permute.xlu0 %2500 }
 0xc3f   :  { %2567 = vrot.lane.b32.xlu0 %v5412_v2, %s3391_s10  ;;  %2563 = vrot.lane.b32.xlu1 %v5414_v5, %s3391_s10  ;;  %v2544_v63 = vmul.f32 %v2493_v16, %v5360_v15  ;;  %v2546_v36 = vmul.f32 %v2501_v8, %v5358_v25  ;;  %v2580_v15 = vmul.f32 %v2493_v16, %v5374_v19 }
 0xc40   :  { %v2582_v25 = vmul.f32 %v2501_v8, %v5372_v43 }
 0xc42   :  { %v5439_v41 = vpop.permute.xlu0 %2488 }
 0xc43   :  { %2604 = vperm.xlu0 %3306, %v5329_v49   ;;  %2596 = vperm.xlu1 %3305, %v5332_v28   ;;  %v2509_v27 = vpop.permute.xlu1 %2508  ;;  %v2543_v16 = vmul.f32 %v5439_v41, %v5398_v3  ;;  %v2579_v3 = vmul.f32 %v5439_v41, %v5414_v5 }
 0xc47   :  { %2592 = vperm.xlu0 %3306, %v5335_v23   ;;  %3307 = vset.pattern.permute.xlu1 %v3463_v32  ;;  %v2517_v26 = vpop.permute.xlu1 %2516  ;;  %v5441_v22 = vpop.permute.xlu0 %2504 }
 0xc48   :  { %2612 = vperm.xlu1 %3307, %v5332_v28  }
 0xc4b   :  { %3309 = vset.pattern.permute.xlu0 %v3463_v32 }
 0xc4c   :  { %2608 = vperm.xlu0 %3309, %v5335_v23   ;;  %2620 = vperm.xlu1 %3307, %v5329_v49   ;;  %v2497_v60 = vpop.permute.xlu1 %2496 }
 0xc4d   :  { %v2545_v56 = vmul.f32 %v2497_v60, %v5396_v53 }
 0xc50   :  { %3312 = vset.pattern.permute.xlu0 %v3464_v57  ;;  %3308 = vset.pattern.permute.xlu1 %v3462_v14 }
 0xc51   :  { %2600 = vperm.xlu1 %3308, %v5343_v45   ;;  %v2513_v46 = vpop.permute.xlu1 %2512 }
 0xc55   :  { %3310 = vset.pattern.permute.xlu1 %v3463_v32 }
 0xc56   :  { %2616 = vperm.xlu1 %3310, %v5343_v45  }
 0xc5a   :  { %3311 = vset.pattern.permute.xlu1 %v3464_v57 }
 0xc89   :  { %v2526_v37 = vpop.permute.xlu1 %2525  ;;  %v2522_v54 = vpop.permute.xlu0 %2521 }
 0xc8a   :  { %v2536_v61 = vsub.f32 0.0, %v2522_v54  ;;  %v2538_v18 = vsub.f32 0.0, %v2526_v37 }
 0xc8d   :  { %v2562_v14 = vpop.permute.xlu1 %2561  ;;  %v2558_v17 = vpop.permute.xlu0 %2557 }
 0xc8e   :  { %v2572_v33 = vsub.f32 0.0, %v2558_v17  ;;  %v2574_v10 = vsub.f32 0.0, %v2562_v14 }
 0xc91   :  { %v2530_v4 = vpop.permute.xlu1 %2529  ;;  %v2534_v50 = vpop.permute.xlu0 %2533 }
 0xc92   :  { %v2540_v42 = vsel %vm41_vm3, %v2530_v4, %v2536_v61  ;;  %v2542_v20 = vsel %vm41_vm3, %v2534_v50, %v2538_v18  ;;  %v2581_v61 = vmul.f32 %v2497_v60, %v5412_v2  ;;  %v3466_v2 = vmov 27  }
 0xc93   :  { %v2548_v52 = vmul.f32 %v2540_v42, %v2509_v27  ;;  %v2550_v47 = vmul.f32 %v2542_v20, %v2517_v26 }
 0xc95   :  { %v5449_v21 = vadd.f32 %v2548_v52, %v2544_v63  ;;  %v2566_v12 = vpop.permute.xlu1 %2565  ;;  %v5451_v11 = vadd.f32 %v2550_v47, %v2546_v36  ;;  %v2570_v51 = vpop.permute.xlu0 %2569 }
 0xc96   :  { %v2576_v31 = vsel %vm41_vm3, %v2566_v12, %v2572_v33  ;;  %v2578_v24 = vsel %vm41_vm3, %v2570_v51, %v2574_v10 }
 0xc97   :  { %v2584_v62 = vmul.f32 %v2576_v31, %v2509_v27  ;;  %2625 = vrot.lane.b32.xlu0 %v5449_v21, %s3411_s19  ;;  %v2586_v9 = vmul.f32 %v2578_v24, %v2517_v26  ;;  %2629 = vrot.lane.b32.xlu1 %v5451_v11, %s3411_s19 }
 0xc99   :  { %v5463_v48 = vadd.f32 %v2584_v62, %v2580_v15  ;;  %v5465_v30 = vadd.f32 %v2586_v9, %v2582_v25 }
 0xc9b   :  { %2661 = vrot.lane.b32.xlu0 %v5463_v48, %s3411_s19  ;;  %2665 = vrot.lane.b32.xlu1 %v5465_v30, %s3411_s19 }
 0xc9f   :  { %2637 = vrot.lane.b32.xlu0 %v5451_v11, %s3412_s20  ;;  %2633 = vrot.lane.b32.xlu1 %v5449_v21, %s3412_s20 }
 0xca3   :  { %2673 = vrot.lane.b32.xlu0 %v5465_v30, %s3412_s20  ;;  %2669 = vrot.lane.b32.xlu1 %v5463_v48, %s3412_s20 }
 0xca5   :  { %v2524_v43 = vpop.permute.xlu0 %2523  ;;  %v2520_v19 = vpop.permute.xlu1 %2519 }
 0xca6   :  { %v2537_v7 = vsub.f32 0.0, %v2524_v43  ;;  %v2535_v6 = vsub.f32 0.0, %v2520_v19 }
 0xca9   :  { %v2560_v29 = vpop.permute.xlu0 %2559  ;;  %v2556_v1 = vpop.permute.xlu1 %2555 }
 0xcaa   :  { %v2573_v27 = vsub.f32 0.0, %v2560_v29  ;;  %v2571_v8 = vsub.f32 0.0, %v2556_v1 }
 0xcad   :  { %v2532_v38 = vpop.permute.xlu0 %2531  ;;  %v2528_v35 = vpop.permute.xlu1 %2527 }
 0xcae   :  { %v2541_v40 = vsel %vm41_vm3, %v2532_v38, %v2537_v7  ;;  %v2539_v32 = vsel %vm41_vm3, %v2528_v35, %v2535_v6 }
 0xcaf   :  { %v2549_v55 = vmul.f32 %v2541_v40, %v2513_v46  ;;  %v2547_v26 = vmul.f32 %v2539_v32, %v5441_v22 }
 0xcb1   :  { %v5487_v37 = vadd.f32 %v2549_v55, %v2545_v56  ;;  %v2568_v54 = vpop.permute.xlu0 %2567  ;;  %v5489_v14 = vadd.f32 %v2547_v26, %v2543_v16  ;;  %v2564_v53 = vpop.permute.xlu1 %2563 }
 0xcb2   :  { %v2577_v17 = vsel %vm41_vm3, %v2568_v54, %v2573_v27  ;;  %v2575_v4 = vsel %vm41_vm3, %v2564_v53, %v2571_v8 }
 0xcb3   :  { %v2585_v18 = vmul.f32 %v2577_v17, %v2513_v46  ;;  %2627 = vrot.lane.b32.xlu0 %v5487_v37, %s3411_s19  ;;  %v2583_v50 = vmul.f32 %v2575_v4, %v5441_v22  ;;  %2623 = vrot.lane.b32.xlu1 %v5489_v14, %s3411_s19 }
 0xcb5   :  { %v5503_v42 = vadd.f32 %v2585_v18, %v2581_v61  ;;  %v5505_v63 = vadd.f32 %v2583_v50, %v2579_v3 }
 0xcb7   :  { %2663 = vrot.lane.b32.xlu0 %v5503_v42, %s3411_s19  ;;  %2659 = vrot.lane.b32.xlu1 %v5505_v63, %s3411_s19 }
 0xcbb   :  { %2635 = vrot.lane.b32.xlu0 %v5487_v37, %s3412_s20  ;;  %2631 = vrot.lane.b32.xlu1 %v5489_v14, %s3412_s20 }
 0xcbe   :  { %v2597_v5 = vpop.permute.xlu1 %2596  ;;  %v2605_v41 = vpop.permute.xlu0 %2604 }
 0xcbf   :  { %2671 = vrot.lane.b32.xlu0 %v5503_v42, %s3412_s20  ;;  %2667 = vrot.lane.b32.xlu1 %v5505_v63, %s3412_s20  ;;  %v2650_v62 = vmul.f32 %v2605_v41, %v5451_v11  ;;  %v2648_v43 = vmul.f32 %v2597_v5, %v5449_v21  ;;  %v2686_v11 = vmul.f32 %v2605_v41, %v5465_v30 }
 0xcc0   :  { %v2684_v21 = vmul.f32 %v2597_v5, %v5463_v48 }
 0xcc2   :  { %v5530_v22 = vpop.permute.xlu0 %2592 }
 0xcc3   :  { %2708 = vperm.xlu0 %3312, %v5329_v49   ;;  %2700 = vperm.xlu1 %3311, %v5332_v28   ;;  %v2613_v60 = vpop.permute.xlu1 %2612 }
 0xcc7   :  { %2696 = vperm.xlu0 %3312, %v5335_v23   ;;  %3313 = vset.pattern.permute.xlu1 %v3465_v13  ;;  %v2621_v46 = vpop.permute.xlu1 %2620  ;;  %v5532_v52 = vpop.permute.xlu0 %2608 }
 0xcc8   :  { %2716 = vperm.xlu1 %3313, %v5332_v28  }
 0xccb   :  { %3315 = vset.pattern.permute.xlu0 %v3465_v13 }
 0xccc   :  { %2712 = vperm.xlu0 %3315, %v5335_v23   ;;  %2724 = vperm.xlu1 %3313, %v5329_v49   ;;  %v2601_v20 = vpop.permute.xlu1 %2600 }
 0xccd   :  { %v2649_v4 = vmul.f32 %v2601_v20, %v5487_v37 }
 0xcd0   :  { %3318 = vset.pattern.permute.xlu0 %v3466_v2  ;;  %3314 = vset.pattern.permute.xlu1 %v3464_v57 }
 0xcd1   :  { %2704 = vperm.xlu1 %3314, %v5343_v45   ;;  %v2617_v36 = vpop.permute.xlu1 %2616 }
 0xcd5   :  { %3316 = vset.pattern.permute.xlu1 %v3465_v13  ;;  %v2647_v13 = vmul.f32 %v5530_v22, %v5489_v14  ;;  %v2683_v14 = vmul.f32 %v5530_v22, %v5505_v63  ;;  %v3469_v63 = vmov 63  }
 0xcd6   :  { %2720 = vperm.xlu1 %3316, %v5343_v45  }
 0xcda   :  { %3317 = vset.pattern.permute.xlu1 %v3466_v2 }
 0xd09   :  { %v2626_v33 = vpop.permute.xlu0 %2625  ;;  %v2630_v47 = vpop.permute.xlu1 %2629 }
 0xd0a   :  { %v2642_v12 = vsub.f32 0.0, %v2630_v47  ;;  %v2640_v51 = vsub.f32 0.0, %v2626_v33 }
 0xd0d   :  { %v2662_v57 = vpop.permute.xlu0 %2661  ;;  %v2666_v10 = vpop.permute.xlu1 %2665 }
 0xd0e   :  { %v2678_v19 = vsub.f32 0.0, %v2666_v10  ;;  %v2676_v1 = vsub.f32 0.0, %v2662_v57  ;;  %v2685_v10 = vmul.f32 %v2601_v20, %v5503_v42  ;;  %v3468_v42 = vmov 31  }
 0xd11   :  { %v2638_v31 = vpop.permute.xlu0 %2637  ;;  %v2634_v24 = vpop.permute.xlu1 %2633 }
 0xd12   :  { %v2646_v15 = vsel %vm46_vm4, %v2638_v31, %v2642_v12  ;;  %v2644_v9 = vsel %vm46_vm4, %v2634_v24, %v2640_v51 }
 0xd13   :  { %v2654_v25 = vmul.f32 %v2646_v15, %v2621_v46  ;;  %v2652_v29 = vmul.f32 %v2644_v9, %v2613_v60 }
 0xd15   :  { %v5540_v7 = vadd.f32 %v2654_v25, %v2650_v62  ;;  %v2674_v6 = vpop.permute.xlu0 %2673  ;;  %v5542_v38 = vadd.f32 %v2652_v29, %v2648_v43  ;;  %v2670_v35 = vpop.permute.xlu1 %2669 }
 0xd16   :  { %v2682_v40 = vsel %vm46_vm4, %v2674_v6, %v2678_v19  ;;  %v2680_v55 = vsel %vm46_vm4, %v2670_v35, %v2676_v1 }
 0xd17   :  { %v2690_v56 = vmul.f32 %v2682_v40, %v2621_v46  ;;  %2733 = vrot.lane.b32.xlu1 %v5540_v7, %s3415_s21  ;;  %v2688_v32 = vmul.f32 %v2680_v55, %v2613_v60  ;;  %2729 = vrot.lane.b32.xlu0 %v5542_v38, %s3415_s21 }
 0xd19   :  { %v5554_v16 = vadd.f32 %v2690_v56, %v2686_v11  ;;  %v5556_v27 = vadd.f32 %v2688_v32, %v2684_v21 }
 0xd1b   :  { %2769 = vrot.lane.b32.xlu1 %v5554_v16, %s3415_s21  ;;  %2765 = vrot.lane.b32.xlu0 %v5556_v27, %s3415_s21 }
 0xd1f   :  { %2737 = vrot.lane.b32.xlu1 %v5542_v38, %s3416_s22  ;;  %2741 = vrot.lane.b32.xlu0 %v5540_v7, %s3416_s22 }
 0xd23   :  { %2773 = vrot.lane.b32.xlu1 %v5556_v27, %s3416_s22  ;;  %2777 = vrot.lane.b32.xlu0 %v5554_v16, %s3416_s22 }
 0xd25   :  { %v2628_v48 = vpop.permute.xlu0 %2627  ;;  %v2624_v30 = vpop.permute.xlu1 %2623 }
 0xd26   :  { %v2641_v54 = vsub.f32 0.0, %v2628_v48  ;;  %v2639_v17 = vsub.f32 0.0, %v2624_v30 }
 0xd29   :  { %v2664_v26 = vpop.permute.xlu0 %2663  ;;  %v2660_v8 = vpop.permute.xlu1 %2659 }
 0xd2a   :  { %v2677_v5 = vsub.f32 0.0, %v2664_v26  ;;  %v2675_v41 = vsub.f32 0.0, %v2660_v8 }
 0xd2d   :  { %v2636_v53 = vpop.permute.xlu0 %2635  ;;  %v2632_v18 = vpop.permute.xlu1 %2631 }
 0xd2e   :  { %v2645_v61 = vsel %vm46_vm4, %v2636_v53, %v2641_v54  ;;  %v2643_v50 = vsel %vm46_vm4, %v2632_v18, %v2639_v17 }
 0xd2f   :  { %v2653_v3 = vmul.f32 %v2645_v61, %v2617_v36  ;;  %v2651_v60 = vmul.f32 %v2643_v50, %v5532_v52 }
 0xd31   :  { %v5578_v46 = vadd.f32 %v2653_v3, %v2649_v4  ;;  %v2672_v33 = vpop.permute.xlu0 %2671  ;;  %v5580_v47 = vadd.f32 %v2651_v60, %v2647_v13  ;;  %v2668_v37 = vpop.permute.xlu1 %2667 }
 0xd32   :  { %v2681_v57 = vsel %vm46_vm4, %v2672_v33, %v2677_v5  ;;  %v2679_v51 = vsel %vm46_vm4, %v2668_v37, %v2675_v41 }
 0xd33   :  { %v2689_v12 = vmul.f32 %v2681_v57, %v2617_v36  ;;  %2731 = vrot.lane.b32.xlu0 %v5578_v46, %s3415_s21  ;;  %v2687_v31 = vmul.f32 %v2679_v51, %v5532_v52  ;;  %2727 = vrot.lane.b32.xlu1 %v5580_v47, %s3415_s21 }
 0xd35   :  { %v5594_v15 = vadd.f32 %v2689_v12, %v2685_v10  ;;  %v5596_v24 = vadd.f32 %v2687_v31, %v2683_v14 }
 0xd37   :  { %2767 = vrot.lane.b32.xlu0 %v5594_v15, %s3415_s21  ;;  %2763 = vrot.lane.b32.xlu1 %v5596_v24, %s3415_s21 }
 0xd3b   :  { %2739 = vrot.lane.b32.xlu0 %v5578_v46, %s3416_s22  ;;  %2735 = vrot.lane.b32.xlu1 %v5580_v47, %s3416_s22 }
 0xd3e   :  { %v2709_v52 = vpop.permute.xlu0 %2708 }
 0xd3f   :  { %2775 = vrot.lane.b32.xlu0 %v5594_v15, %s3416_s22  ;;  %2771 = vrot.lane.b32.xlu1 %v5596_v24, %s3416_s22  ;;  %v2754_v21 = vmul.f32 %v2709_v52, %v5540_v7  ;;  %v3470_v7 = vmov 0.0   ;;  %v2790_v4 = vmul.f32 %v2709_v52, %v5554_v16 }
 0xd40   :  { %3047 = vmatprep.subr.mxu0 %v3470_v7  ;;  %3051 = vmatprep.mubr.msk.f32.mxu0 %vm3471_vm9, %v3470_v7 }
 0xd42   :  { %v2697_v62 = vpop.permute.xlu0 %2696 }
 0xd43   :  { %2812 = vperm.xlu0 %3318, %v5329_v49   ;;  %2804 = vperm.xlu1 %3317, %v5332_v28   ;;  %v2751_v31 = vmul.f32 %v2697_v62, %v5580_v47  ;;  %v2787_v47 = vmul.f32 %v2697_v62, %v5596_v24 }
 0xd47   :  { %2800 = vperm.xlu0 %3318, %v5335_v23   ;;  %3319 = vset.pattern.permute.xlu1 %v3467_v58  ;;  %v2713_v9 = vpop.permute.xlu0 %2712 }
 0xd48   :  { %2820 = vperm.xlu1 %3319, %v5332_v28  }
 0xd4b   :  { %3321 = vset.pattern.permute.xlu0 %v3467_v58 }
 0xd4c   :  { %2816 = vperm.xlu0 %3321, %v5335_v23   ;;  %2828 = vperm.xlu1 %3319, %v5329_v49  }
 0xd50   :  { %3324 = vset.pattern.permute.xlu0 %v3468_v42  ;;  %3320 = vset.pattern.permute.xlu1 %v3466_v2  ;;  %v2701_v2 = vpop.permute.xlu1 %2700 }
 0xd51   :  { %2900 = vperm.xlu0 %3324, %v5329_v49   ;;  %2808 = vperm.xlu1 %3320, %v5343_v45   ;;  %v2752_v11 = vmul.f32 %v2701_v2, %v5542_v38  ;;  %v2788_v38 = vmul.f32 %v2701_v2, %v5556_v27 }
 0xd54   :  { %v2717_v22 = vpop.permute.xlu1 %2716 }
 0xd55   :  { %2888 = vperm.xlu0 %3324, %v5335_v23   ;;  %3322 = vset.pattern.permute.xlu1 %v3467_v58 }
 0xd56   :  { %2824 = vperm.xlu1 %3322, %v5343_v45  }
 0xd58   :  { %v2725_v20 = vpop.permute.xlu1 %2724 }
 0xd59   :  { %3327 = vset.pattern.permute.xlu0 %v3469_v63 }
 0xd5a   :  { %3323 = vset.pattern.permute.xlu1 %v3468_v42 }
 0xd5b   :  { %2892 = vperm.xlu1 %3323, %v5332_v28  }
 0xd5c   :  { %v2705_v36 = vpop.permute.xlu1 %2704 }
 0xd5d   :  { %v2753_v12 = vmul.f32 %v2705_v36, %v5578_v46 }
 0xd5f   :  { %3325 = vset.pattern.permute.xlu1 %v3469_v63 }
 0xd60   :  { %2908 = vperm.xlu1 %3325, %v5332_v28   ;;  %v2721_v25 = vpop.permute.xlu1 %2720 }
 0xd64   :  { %2916 = vperm.xlu1 %3325, %v5329_v49  }
 0xd68   :  { %3326 = vset.pattern.permute.xlu1 %v3468_v42 }
 0xd69   :  { %2896 = vperm.xlu1 %3326, %v5343_v45  }
 0xd6d   :  { %3328 = vset.pattern.permute.xlu1 %v3469_v63 }
 0xd89   :  { %v2734_v43 = vpop.permute.xlu1 %2733  ;;  %v2730_v19 = vpop.permute.xlu0 %2729 }
 0xd8a   :  { %v2744_v6 = vsub.f32 0.0, %v2730_v19  ;;  %v2746_v28 = vsub.f32 0.0, %v2734_v43  ;;  %v2789_v19 = vmul.f32 %v2705_v36, %v5594_v15 }
 0xd8d   :  { %v2770_v29 = vpop.permute.xlu1 %2769  ;;  %v2766_v1 = vpop.permute.xlu0 %2765 }
 0xd8e   :  { %v2780_v32 = vsub.f32 0.0, %v2766_v1  ;;  %v2782_v30 = vsub.f32 0.0, %v2770_v29 }
 0xd91   :  { %v2738_v40 = vpop.permute.xlu1 %2737  ;;  %v2742_v49 = vpop.permute.xlu0 %2741 }
 0xd92   :  { %v2748_v35 = vsel %vm51_vm5, %v2738_v40, %v2744_v6  ;;  %v2750_v56 = vsel %vm51_vm5, %v2742_v49, %v2746_v28 }
 0xd93   :  { %v2756_v55 = vmul.f32 %v2748_v35, %v2717_v22  ;;  %v2758_v48 = vmul.f32 %v2750_v56, %v2725_v20 }
 0xd95   :  { %v5631_v26 = vadd.f32 %v2756_v55, %v2752_v11  ;;  %v2774_v8 = vpop.permute.xlu1 %2773  ;;  %v5633_v54 = vadd.f32 %v2758_v48, %v2754_v21  ;;  %v2778_v17 = vpop.permute.xlu0 %2777 }
 0xd96   :  { %v2784_v53 = vsel %vm51_vm5, %v2774_v8, %v2780_v32  ;;  %v2786_v61 = vsel %vm51_vm5, %v2778_v17, %v2782_v30 }
 0xd97   :  { %v2792_v18 = vmul.f32 %v2784_v53, %v2717_v22  ;;  %2833 = vrot.lane.b32.xlu0 %v5631_v26, %s3420_s23  ;;  %v2794_v3 = vmul.f32 %v2786_v61, %v2725_v20  ;;  %2837 = vrot.lane.b32.xlu1 %v5633_v54, %s3420_s23 }
 0xd99   :  { %v5646_v50 = vadd.f32 %v2792_v18, %v2788_v38  ;;  %v5648_v13 = vadd.f32 %v2794_v3, %v2790_v4 }
 0xd9b   :  { %2861 = vrot.lane.b32.xlu0 %v5646_v50, %s3420_s23  ;;  %2865 = vrot.lane.b32.xlu1 %v5648_v13, %s3420_s23 }
 0xda5   :  { %v2732_v27 = vpop.permute.xlu0 %2731  ;;  %v2728_v5 = vpop.permute.xlu1 %2727 }
 0xda6   :  { %v2745_v33 = vsub.f32 0.0, %v2732_v27  ;;  %v2743_v16 = vsub.f32 0.0, %v2728_v5 }
 0xda9   :  { %v2768_v60 = vpop.permute.xlu0 %2767  ;;  %v2764_v41 = vpop.permute.xlu1 %2763 }
 0xdaa   :  { %v2781_v58 = vsub.f32 0.0, %v2768_v60  ;;  %v2779_v63 = vsub.f32 0.0, %v2764_v41 }
 0xdad   :  { %v2740_v57 = vpop.permute.xlu0 %2739  ;;  %v2736_v10 = vpop.permute.xlu1 %2735 }
 0xdae   :  { %v2749_v37 = vsel %vm51_vm5, %v2740_v57, %v2745_v33  ;;  %v2747_v14 = vsel %vm51_vm5, %v2736_v10, %v2743_v16 }
 0xdaf   :  { %v2757_v51 = vmul.f32 %v2749_v37, %v2721_v25  ;;  %v2755_v42 = vmul.f32 %v2747_v14, %v2713_v9 }
 0xdb1   :  { %v2761_v2 = vadd.f32 %v2757_v51, %v2753_v12  ;;  %v2776_v22 = vpop.permute.xlu0 %2775  ;;  %v5660_v20 = vadd.f32 %v2755_v42, %v2751_v31  ;;  %v2772_v43 = vpop.permute.xlu1 %2771 }
 0xdb2   :  { %v2785_v52 = vsel %vm51_vm5, %v2776_v22, %v2781_v58  ;;  %v2783_v29 = vsel %vm51_vm5, %v2772_v43, %v2779_v63 }
 0xdb3   :  { %v2793_v46 = vmul.f32 %v2785_v52, %v2721_v25  ;;  %2835 = vrot.lane.b32.xlu1 %v2761_v2, %s3420_s23  ;;  %v2791_v1 = vmul.f32 %v2783_v29, %v2713_v9  ;;  %2831 = vrot.lane.b32.xlu0 %v5660_v20, %s3420_s23 }
 0xdb5   :  { %v2797_v6 = vadd.f32 %v2793_v46, %v2789_v19  ;;  %v5671_v28 = vadd.f32 %v2791_v1, %v2787_v47 }
 0xdb7   :  { %2863 = vrot.lane.b32.xlu1 %v2797_v6, %s3420_s23  ;;  %2859 = vrot.lane.b32.xlu0 %v5671_v28, %s3420_s23 }
 0xdbb   :  { %2912 = vperm.xlu1 %3328, %v5343_v45   ;;  %2904 = vperm.xlu0 %3327, %v5335_v23  }
 0xdbe   :  { %v2805_v44 = vpop.permute.xlu1 %2804  ;;  %v2813_v40 = vpop.permute.xlu0 %2812 }
 0xdbf   :  { %v2848_v27 = vmul.f32 %v2805_v44, %v5631_v26  ;;  %v2850_v60 = vmul.f32 %v2813_v40, %v5633_v54  ;;  %v2876_v33 = vmul.f32 %v2805_v44, %v5646_v50  ;;  %v2878_v10 = vmul.f32 %v2813_v40, %v5648_v13 }
 0xdc2   :  { %v5685_v35 = vpop.permute.xlu0 %2800 }
 0xdc3   :  { %v2821_v15 = vpop.permute.xlu1 %2820 }
 0xdc7   :  { %v2829_v24 = vpop.permute.xlu1 %2828  ;;  %v5687_v45 = vpop.permute.xlu0 %2816 }
 0xdcc   :  { %v2809_v36 = vpop.permute.xlu1 %2808  ;;  %v2901_v11 = vpop.permute.xlu0 %2900 }
 0xdcd   :  { %v5679_v62 = vmul.f32 %v2809_v36, %v2761_v2  ;;  %v5681_v25 = vmul.f32 %v2809_v36, %v2797_v6 }
 0xdd0   :  { %v5689_v55 = vpop.permute.xlu0 %2888 }
 0xdd1   :  { %v5683_v9 = vpop.permute.xlu1 %2824 }
 0xdd6   :  { %v2893_v49 = vpop.permute.xlu1 %2892 }
 0xddb   :  { %v2909_v23 = vpop.permute.xlu1 %2908 }
 0xddf   :  { %v2917_v56 = vpop.permute.xlu1 %2916 }
 0xde4   :  { %v5691_v21 = vpop.permute.xlu1 %2896 }
 0xe09   :  { %v2834_v32 = vpop.permute.xlu0 %2833  ;;  %v2838_v30 = vpop.permute.xlu1 %2837 }
 0xe0a   :  { %v2840_v48 = vsub.f32 0.0, %v2834_v32  ;;  %v2842_v8 = vsub.f32 0.0, %v2838_v30 }
 0xe0c   :  { %v2844_v17 = vsel %vm56_vm6, %v2834_v32, %v2840_v48  ;;  %v2846_v38 = vsel %vm56_vm6, %v2838_v30, %v2842_v8 }
 0xe0d   :  { %v2852_v53 = vmul.f32 %v2844_v17, %v2821_v15  ;;  %v2862_v61 = vpop.permute.xlu0 %2861  ;;  %v2854_v18 = vmul.f32 %v2846_v38, %v2829_v24  ;;  %v2866_v3 = vpop.permute.xlu1 %2865 }
 0xe0e   :  { %v2868_v4 = vsub.f32 0.0, %v2862_v61  ;;  %v2870_v5 = vsub.f32 0.0, %v2866_v3 }
 0xe0f   :  { %v2856_v16 = vadd.f32 %v2852_v53, %v2848_v27  ;;  %v2858_v12 = vadd.f32 %v2854_v18, %v2850_v60  ;;  %v2847_v18 = vmul.f32 %v5685_v35, %v5660_v20 }
 0xe10   :  { %v2872_v41 = vsel %vm56_vm6, %v2862_v61, %v2868_v4  ;;  %v2874_v37 = vsel %vm56_vm6, %v2866_v3, %v2870_v5  ;;  %v2875_v4 = vmul.f32 %v5685_v35, %v5671_v28 }
 0xe11   :  { %v2880_v57 = vmul.f32 %v2872_v41, %v2821_v15  ;;  %v2882_v51 = vmul.f32 %v2874_v37, %v2829_v24  ;;  %v2920_v26 = vmul.f32 %v2893_v49, %v2856_v16  ;;  %v2936_v58 = vmul.f32 %v2909_v23, %v2856_v16 }
 0xe12   :  { %v2922_v63 = vmul.f32 %v2901_v11, %v2858_v12  ;;  %v2938_v2 = vmul.f32 %v2917_v56, %v2858_v12 }
 0xe13   :  { %v2884_v14 = vadd.f32 %v2880_v57, %v2876_v33  ;;  %v2886_v31 = vadd.f32 %v2882_v51, %v2878_v10 }
 0xe15   :  { %v2924_v42 = vmul.f32 %v2909_v23, %v2884_v14  ;;  %v2932_v54 = vmul.f32 %v2893_v49, %v2884_v14  ;;  %v2926_v22 = vmul.f32 %v2917_v56, %v2886_v31  ;;  %v2934_v52 = vmul.f32 %v2901_v11, %v2886_v31 }
 0xe17   :  { %v2928_v50 = vsub.f32 %v2920_v26, %v2924_v42  ;;  %v2940_v43 = vadd.f32 %v2936_v58, %v2932_v54  ;;  %v2930_v19 = vsub.f32 %v2922_v63, %v2926_v22  ;;  %v2942_v46 = vadd.f32 %v2938_v2, %v2934_v52 }
 0xe19   :  { %v2944_v29 = vmul.f32 %v2928_v50, %v3769_v34  ;;  %v2948_v13 = vmul.f32 %v2940_v43, %v3782_v0  ;;  %v2946_v47 = vmul.f32 %v2930_v19, %v3769_v34  ;;  %v2950_v1 = vmul.f32 %v2942_v46, %v3782_v0 }
 0xe1b   :  { %v2952_v6 = vmul.f32 %v2946_v47, %v2944_v29  ;;  %v2954_v44 = vmul.f32 %v2950_v1, %v2948_v13 }
 0xe1d   :  { %v2956_v15 = vadd.f32 %v2954_v44, %v2952_v6 }
 0xe1f   :  { %3048 = vmatpush3.xpose.msra.mxu0 %v2956_v15 }
 0xe20   :  { %3049 = vmatprep.subr.mxu0 %v3470_v7 }
 0xe25   :  { %v2836_v24 = vpop.permute.xlu1 %2835  ;;  %v2832_v36 = vpop.permute.xlu0 %2831 }
 0xe26   :  { %v2841_v40 = vsub.f32 0.0, %v2836_v24  ;;  %v2839_v49 = vsub.f32 0.0, %v2832_v36 }
 0xe28   :  { %v2845_v48 = vsel %vm56_vm6, %v2836_v24, %v2841_v40  ;;  %v2843_v8 = vsel %vm56_vm6, %v2832_v36, %v2839_v49 }
 0xe29   :  { %v2864_v23 = vpop.permute.xlu1 %2863  ;;  %v2860_v11 = vpop.permute.xlu0 %2859  ;;  %v2853_v17 = vmul.f32 %v2845_v48, %v5683_v9  ;;  %v2851_v38 = vmul.f32 %v2843_v8, %v5687_v45 }
 0xe2a   :  { %v2869_v56 = vsub.f32 0.0, %v2864_v23  ;;  %v2867_v32 = vsub.f32 0.0, %v2860_v11 }
 0xe2b   :  { %v2857_v3 = vadd.f32 %v2853_v17, %v5679_v62  ;;  %v2855_v39 = vadd.f32 %v2851_v38, %v2847_v18 }
 0xe2c   :  { %v2873_v30 = vsel %vm56_vm6, %v2864_v23, %v2869_v56  ;;  %v2871_v7 = vsel %vm56_vm6, %v2860_v11, %v2867_v32 }
 0xe2d   :  { %v2881_v53 = vmul.f32 %v2873_v30, %v5683_v9  ;;  %v2879_v61 = vmul.f32 %v2871_v7, %v5687_v45  ;;  %v2921_v9 = vmul.f32 %v5691_v21, %v2857_v3  ;;  %v2919_v57 = vmul.f32 %v5689_v55, %v2855_v39 }
 0xe2f   :  { %v2885_v27 = vadd.f32 %v2881_v53, %v5681_v25  ;;  %v2883_v5 = vadd.f32 %v2879_v61, %v2875_v4 }
 0xe31   :  { %v2933_v33 = vmul.f32 %v5691_v21, %v2885_v27  ;;  %v2931_v37 = vmul.f32 %v5689_v55, %v2883_v5 }
 0xe36   :  { %v2913_v60 = vpop.permute.xlu1 %2912  ;;  %v2905_v41 = vpop.permute.xlu0 %2904 }
 0xe37   :  { %v2925_v16 = vmul.f32 %v2913_v60, %v2885_v27  ;;  %v2937_v45 = vmul.f32 %v2913_v60, %v2857_v3  ;;  %v2923_v20 = vmul.f32 %v2905_v41, %v2883_v5  ;;  %v2935_v28 = vmul.f32 %v2905_v41, %v2855_v39 }
 0xe39   :  { %v2929_v35 = vsub.f32 %v2921_v9, %v2925_v16  ;;  %v2941_v62 = vadd.f32 %v2937_v45, %v2933_v33  ;;  %v2927_v10 = vsub.f32 %v2919_v57, %v2923_v20  ;;  %v2939_v25 = vadd.f32 %v2935_v28, %v2931_v37 }
 0xe3b   :  { %v2945_v12 = vmul.f32 %v2929_v35, %v3769_v34  ;;  %v2949_v51 = vmul.f32 %v2941_v62, %v3782_v0  ;;  %v2943_v14 = vmul.f32 %v2927_v10, %v3769_v34  ;;  %v2947_v21 = vmul.f32 %v2939_v25, %v3782_v0 }
 0xe3d   :  { %v2951_v31 = vmul.f32 %v2945_v12, %v2943_v14  ;;  %v2953_v26 = vmul.f32 %v2949_v51, %v2947_v21 }
 0xe3f   :  { %v2955_v58 = vadd.f32 %v2953_v26, %v2951_v31 }
 0xe41   :  { %3050 = vmatpush3.xpose.msra.mxu0 %v2955_v58 }
 0xe44   :  { %3052 = vmatmul.mubr.f32.vlgmr.msra.gmra.mxu0 %v3424_v59 }
 0xf04   :  { %v3023_v55 = vpop.f32.mrf.mxu0 }
 0xf05   :  { %3028 = vst.msk [vmem:[#allocation5] sm:$0x1] %vm3027_vm10, %v3023_v55 }
 0xf06   :  { %v3053_v42 = vpop.f32.mrf.mxu0 }
 0xf07   :  { %3376 = shalt.err (!%p3373_p9)
}
 0xf08   :  { %3038 = dma.vmem_to_hbm [thread:$0]  %s3036_s25, 16, %s5741_s1, [#allocation4]  }
 0xf09   :  { %3387 = dma.done.wait [#allocation4], 16  }
 0xf0a   :  { %3388 = vsyncadd [#allocation4], 4294967280 }
 0xf0b   :  { %3042 = vsyncpa [#allocation3], 1 }
 0xf0c   :  { %3043 = vsyncpa [#allocation4], 1 }

</bundles_post_ra>
